<compile_context>
chip_gen: v6e
topology: v6e:2x2x1
jax: 0.10.0
libtpu: 0.0.40
codegen_flags: <defaults>
</compile_context>

<pallas_src>
import jax
import jax.numpy as jnp
from jax.experimental import pallas as pl
from jax.experimental.pallas import tpu as pltpu

# ---- small stand-in sizes (real model: D=768, F=3072, vocab>=30000) ----
B = 8        # batch (multiple of 8 -> full sublane group)
S = 8        # sequence length
D = 128      # feature_dim
F = 256      # FFN hidden dim
C = 2        # output_dim
N = 5        # ensemble heads
L = 3        # DARTS branches per head
VOCAB = 64

DROP_KEEP = 0.5
DROP_SCALE = 1.0 / DROP_KEEP    # training-mode inverted dropout scaling


# ---------------------------------------------------------------------------
# shared numeric helpers (same recipe used in-kernel and in the reference)
# ---------------------------------------------------------------------------
def _bdot(a, b):
    # bf16 MXU operands, f32 accumulation
    return jnp.dot(a.astype(jnp.bfloat16), b.astype(jnp.bfloat16),
                   preferred_element_type=jnp.float32)


def _beinsum(eq, a, b):
    return jnp.einsum(eq, a.astype(jnp.bfloat16), b.astype(jnp.bfloat16),
                      preferred_element_type=jnp.float32)


def _layer_norm(x, g, b, eps=1e-12):
    mu = jnp.mean(x, axis=-1, keepdims=True)
    var = jnp.mean((x - mu) ** 2, axis=-1, keepdims=True)
    return (x - mu) * jax.lax.rsqrt(var + eps) * g + b


# kernel input order (after emb / mask / drop)
WEIGHT_KEYS = ('wqkv', 'wo', 'ln1g', 'ln1b',
               'w1', 'b1', 'w2', 'b2', 'ln2g', 'ln2b',
               'darts', 'whA', 'bhA',
               'w0p', 'b0p', 'w1b', 'b1b',
               'w2b', 'b2b', 'w2c', 'b2c',
               'wsw_h', 'wsw_p', 'bsw')


# ---------------------------------------------------------------------------
# Fused kernel: encoder stand-in -> CLS -> dropout -> DARTS heads -> switch.
# Whole batch processed in a single (gridless) invocation; everything in VMEM.
# ---------------------------------------------------------------------------
def fused_kernel(emb_ref, mask_ref, drop_ref,
                 wqkv_ref, wo_ref, ln1g_ref, ln1b_ref,
                 w1_ref, b1_ref, w2_ref, b2_ref, ln2g_ref, ln2b_ref,
                 darts_ref, whA_ref, bhA_ref,
                 w0p_ref, b0p_ref, w1b_ref, b1b_ref,
                 w2b_ref, b2b_ref, w2c_ref, b2c_ref,
                 wswh_ref, wswp_ref, bsw_ref,
                 out_ref):
    Bb, Ss, Dd = emb_ref.shape
    x2 = emb_ref[...].reshape(Bb * Ss, Dd)              # (B*S, D) f32

    # ---- fused QKV projection: one lane-dense MXU pass with M = B*S rows ----
    qkv = _bdot(x2, wqkv_ref[...])                      # (B*S, 3D) f32
    q = qkv[:, 0 * Dd:1 * Dd].reshape(Bb, Ss, Dd)
    k = qkv[:, 1 * Dd:2 * Dd].reshape(Bb, Ss, Dd)
    v = qkv[:, 2 * Dd:3 * Dd].reshape(Bb, Ss, Dd)

    # ---- masked self-attention; additive bias built from the (B,S) mask ----
    scale = 1.0 / (float(Dd) ** 0.5)
    s = _beinsum('bqd,bkd->bqk', q, k) * scale          # (B, S, S)
    s = s + (mask_ref[...][:, None, :] - 1.0) * 1e9     # 0 kept / -1e9 masked
    s = s - jnp.max(s, axis=-1, keepdims=True)
    probs = jnp.exp(s)
    probs = probs * pl.reciprocal(jnp.sum(probs, axis=-1, keepdims=True),
                                  approx=True)
    ctx = _beinsum('bqk,bkd->bqd', probs, v)            # (B, S, D)

    attn = _bdot(ctx.reshape(Bb * Ss, Dd), wo_ref[...]) # (B*S, D)
    h = _layer_norm(x2 + attn, ln1g_ref[...], ln1b_ref[...])

    ff = jnp.maximum(_bdot(h, w1_ref[...]) + b1_ref[...], 0.0)
    ff = _bdot(ff, w2_ref[...]) + b2_ref[...]
    y = _layer_norm(h + ff, ln2g_ref[...], ln2b_ref[...])   # (B*S, D)

    # ---- CLS row per sample + inverted dropout (stays in VMEM) ----
    pred = y.reshape(Bb, Ss, Dd)[:, 0, :] * drop_ref[...] * DROP_SCALE   # (B, D)

    # ---- DARTS branch-mix control (softmax), /3 branch mean folded in ----
    dd = darts_ref[...]                                  # (N, L)
    dd = dd - jnp.max(dd, axis=-1, keepdims=True)
    e = jnp.exp(dd)
    ctrl3 = e * pl.reciprocal(jnp.sum(e, axis=-1, keepdims=True),
                              approx=True) * (1.0 / 3.0)
    cw = [ctrl3[:, j:j + 1][:, :, None] for j in range(L)]   # each (N,1,1)

    # ---- level 1: one wide lane-dense matmul for all heads' Linear(D,D) stems ---
    hA = jnp.maximum(_bdot(pred, whA_ref[...]) + bhA_ref[...], 0.0)   # (B, 2*N*D)
    # head split: each slice is a full (B=8, D=128) tile -> cheap tile-level stack
    stems = jnp.concatenate(
        [hA[None, :, i * Dd:(i + 1) * Dd] for i in range(2 * N)], axis=0)  # (2N,B,D)
    h1 = stems[:N]                                       # (N, B, D) branch-1 hidden
    h2 = stems[N:]                                       # (N, B, D) branch-2 hidden

    # ---- branch 0 packed into one (D, N*C) matmul (no pred broadcast) ----
    s0f = _bdot(pred, w0p_ref[...]) + b0p_ref[...]       # (B, N*C)
    s0 = jnp.concatenate(
        [s0f[None, :, i * C:(i + 1) * C] for i in range(N)], axis=0)   # (N, B, C)

    # ---- levels 2/3, batched over heads (leading batch dim N) ----
    s1 = _beinsum('nbd,ndc->nbc', h1, w1b_ref[...]) + b1b_ref[...]
    h3 = jnp.maximum(_beinsum('nbd,nde->nbe', h2, w2b_ref[...]) + b2b_ref[...], 0.0)
    s2 = _beinsum('nbd,ndc->nbc', h3, w2c_ref[...]) + b2c_ref[...]

    sc = cw[0] * s0 + cw[1] * s1 + cw[2] * s2            # (N, B, C) head scores

    # ---- switch(cat(head scores, pred)): lane-dense (N*C -> N) matmul ----
    sc_flat = jnp.concatenate([sc[i] for i in range(N)], axis=1)       # (B, N*C)
    rk = (_bdot(sc_flat, wswh_ref[...]) + _bdot(pred, wswp_ref[...])
          + bsw_ref[...])                                              # (B, N)

    # ---- weighted mean over heads: out[b] = (1/N) * sum_i rk[b,i] * sc[i,b] ----
    out = sc[0] * rk[:, 0:1]
    for i in range(1, N):
        out = out + sc[i] * rk[:, i:i + 1]
    out_ref[...] = out * (1.0 / float(N))                # single (B, C) store


def run_forward(emb, attn_masks, drop_mask, p):
    Bn = emb.shape[0]
    weights = tuple(p[kname] for kname in WEIGHT_KEYS)
    n_in = 3 + len(weights)

    vmem_spec = pl.BlockSpec(memory_space=pltpu.MemorySpace.VMEM)
    out = pl.pallas_call(
        fused_kernel,
        out_shape=jax.ShapeDtypeStruct((Bn, C), jnp.float32),
        in_specs=[vmem_spec] * n_in,
        out_specs=vmem_spec,
        compiler_params=pltpu.CompilerParams(
            # toy footprint ~1 MiB; TODO(synk): re-budget per generation at real sizes
            vmem_limit_bytes=32 * 1024 * 1024),
    )(emb.astype(jnp.float32),
      attn_masks.astype(jnp.float32),
      drop_mask.astype(jnp.float32),
      *weights)
    return out


# ---------------------------------------------------------------------------
# Deterministic parameter init (shapes from __init__; nn.Linear-style uniform).
# Matmul weights are stored bf16; biases / LN params stay f32.
# ---------------------------------------------------------------------------
def init_params(key):
    keys = iter(jax.random.split(key, 32))

    def lin(shape, fan_in):
        bound = 1.0 / (float(fan_in) ** 0.5)
        return jax.random.uniform(next(keys), shape, jnp.float32, -bound, bound)

    bf = lambda a: a.astype(jnp.bfloat16)
    p = {}
    p['emb_w'] = 0.02 * jax.random.normal(next(keys), (VOCAB, D), jnp.float32)

    # encoder stand-in
    wq = lin((D, D), D); wk = lin((D, D), D); wv = lin((D, D), D); wo = lin((D, D), D)
    p['wq'], p['wk'], p['wv'], p['wo'] = bf(wq), bf(wk), bf(wv), bf(wo)
    p['wqkv'] = bf(jnp.concatenate([wq, wk, wv], axis=1))          # (D, 3D)
    p['ln1g'] = jnp.ones((1, D), jnp.float32)
    p['ln1b'] = jnp.zeros((1, D), jnp.float32)
    p['w1'] = bf(lin((D, F), D)); p['b1'] = lin((1, F), D)
    p['w2'] = bf(lin((F, D), F)); p['b2'] = lin((1, D), F)
    p['ln2g'] = jnp.ones((1, D), jnp.float32)
    p['ln2b'] = jnp.zeros((1, D), jnp.float32)

    # DARTS ensemble heads (stacked over the N members)
    w0 = lin((N, D, C), D);   b0 = lin((N, 1, C), D)
    w1a = lin((N, D, D), D);  b1a = lin((N, D), D)
    w1b = lin((N, D, C), D);  p['b1b'] = lin((N, 1, C), D)
    w2a = lin((N, D, D), D);  b2a = lin((N, D), D)
    w2b = lin((N, D, D), D);  p['b2b'] = lin((N, 1, D), D)
    w2c = lin((N, D, C), D);  p['b2c'] = lin((N, 1, C), D)

    # packed level-1 weight [w1a | w2a] along the output (lane) axis -> (D, 2*N*D)
    p['whA'] = bf(jnp.concatenate(
        [jnp.transpose(w1a, (1, 0, 2)).reshape(D, N * D),
         jnp.transpose(w2a, (1, 0, 2)).reshape(D, N * D)], axis=1))
    p['bhA'] = jnp.concatenate(
        [b1a.reshape(1, N * D), b2a.reshape(1, N * D)], axis=1)
    # packed branch-0 weight -> (D, N*C)
    p['w0p'] = bf(jnp.transpose(w0, (1, 0, 2)).reshape(D, N * C))
    p['b0p'] = b0.reshape(1, N * C)

    p['w1b'] = bf(w1b); p['w2b'] = bf(w2b); p['w2c'] = bf(w2c)
    # raw copies for the pure-JAX reference loop
    p['w0'] = bf(w0);   p['b0'] = b0
    p['w1a'] = bf(w1a); p['b1a'] = b1a
    p['w2a'] = bf(w2a); p['b2a'] = b2a

    p['darts'] = jax.random.normal(next(keys), (N, L), jnp.float32)

    # switch: Linear(N*C + D, N), stored split (head part flat (N*C, N))
    wsw = lin((N * C + D, N), N * C + D)
    p['wsw_h'] = bf(wsw[:N * C])          # (N*C, N)
    p['wsw_p'] = bf(wsw[N * C:])          # (D, N)
    p['bsw'] = lin((1, N), N * C + D)
    return p


# ---------------------------------------------------------------------------
# Pure-JAX reference (original per-head loop formulation, same bf16 recipe).
# ---------------------------------------------------------------------------
def ref_forward(emb, attn_masks, drop_mask, p):
    Bn, S_, D_ = emb.shape
    x2 = emb.reshape(Bn * S_, D_)
    q = _bdot(x2, p['wq']).reshape(Bn, S_, D_)
    k = _bdot(x2, p['wk']).reshape(Bn, S_, D_)
    v = _bdot(x2, p['wv']).reshape(Bn, S_, D_)
    s = _beinsum('bqd,bkd->bqk', q, k) * (1.0 / float(D_) ** 0.5)
    s = s + (attn_masks[:, None, :] - 1.0) * 1e9
    pr = jax.nn.softmax(s, axis=-1)
    ctx = _beinsum('bqk,bkd->bqd', pr, v)
    attn = _bdot(ctx.reshape(Bn * S_, D_), p['wo']).reshape(Bn, S_, D_)
    h = _layer_norm(emb + attn, p['ln1g'], p['ln1b'])
    ff = jax.nn.relu(_bdot(h.reshape(Bn * S_, D_), p['w1']) + p['b1'])
    ff = _bdot(ff, p['w2']) + p['b2']
    y = _layer_norm(h + ff.reshape(Bn, S_, D_), p['ln2g'], p['ln2b'])
    pred = y[:, 0, :] * drop_mask * DROP_SCALE

    ctrl = jax.nn.softmax(p['darts'], axis=-1)
    heads = []
    for i in range(N):
        s0 = _bdot(pred, p['w0'][i]) + p['b0'][i]
        h1 = jax.nn.relu(_bdot(pred, p['w1a'][i]) + p['b1a'][i])
        s1 = _bdot(h1, p['w1b'][i]) + p['b1b'][i]
        h2 = jax.nn.relu(_bdot(pred, p['w2a'][i]) + p['b2a'][i])
        h3 = jax.nn.relu(_bdot(h2, p['w2b'][i]) + p['b2b'][i])
        s2 = _bdot(h3, p['w2c'][i]) + p['b2c'][i]
        sc = (ctrl[i, 0] * s0 + ctrl[i, 1] * s1 + ctrl[i, 2] * s2) / 3.0
        heads.append(sc)
    heads_flat = jnp.concatenate(heads, axis=1)                      # (B, N*C)
    wsw_full = jnp.concatenate([p['wsw_h'], p['wsw_p']], axis=0)
    rk = _bdot(jnp.concatenate([heads_flat, pred], axis=1), wsw_full) + p['bsw']
    out = sum(heads[i] * rk[:, i:i + 1] for i in range(N)) / float(N)
    return out


if __name__ == "__main__":
    key = jax.random.PRNGKey(0)
    k_tok, k_drop, k_par = jax.random.split(key, 3)

    # inputs: token ids + attention mask (last two positions padded out)
    seq = jax.random.randint(k_tok, (B, S), 0, VOCAB, dtype=jnp.int32)
    attn_masks = jnp.ones((B, S), jnp.float32).at[:, S - 2:].set(0.0)

    params = init_params(k_par)

    # glue: embedding lookup (self.embedding(seq)) stays outside the kernel
    emb = jnp.take(params['emb_w'], seq, axis=0).astype(jnp.float32)  # (B,S,D)
    # glue: deterministic dropout keep-mask (p=0.5), applied inside the kernel
    drop_mask = jax.random.bernoulli(k_drop, DROP_KEEP, (B, D)).astype(jnp.float32)

    out = run_forward(emb, attn_masks, drop_mask, params)
    out = jax.block_until_ready(out)
    assert out.shape == (B, C), out.shape

    ref = jax.block_until_ready(ref_forward(emb, attn_masks, drop_mask, params))
    assert jnp.allclose(out, ref, rtol=2e-2, atol=2e-2), (out, ref)

    print("KERNEL_OK")
</pallas_src>

<mosaic_0001>
module attributes {stable_mosaic.version = 11 : i64} {
  func.func @fused_kernel(%arg0: memref<8x8x128xf32, #tpu.memory_space<vmem>>, %arg1: memref<8x8xf32, #tpu.memory_space<vmem>>, %arg2: memref<8x128xf32, #tpu.memory_space<vmem>>, %arg3: memref<128x384xbf16, #tpu.memory_space<vmem>>, %arg4: memref<128x128xbf16, #tpu.memory_space<vmem>>, %arg5: memref<1x128xf32, #tpu.memory_space<vmem>>, %arg6: memref<1x128xf32, #tpu.memory_space<vmem>>, %arg7: memref<128x256xbf16, #tpu.memory_space<vmem>>, %arg8: memref<1x256xf32, #tpu.memory_space<vmem>>, %arg9: memref<256x128xbf16, #tpu.memory_space<vmem>>, %arg10: memref<1x128xf32, #tpu.memory_space<vmem>>, %arg11: memref<1x128xf32, #tpu.memory_space<vmem>>, %arg12: memref<1x128xf32, #tpu.memory_space<vmem>>, %arg13: memref<5x3xf32, #tpu.memory_space<vmem>>, %arg14: memref<128x1280xbf16, #tpu.memory_space<vmem>>, %arg15: memref<1x1280xf32, #tpu.memory_space<vmem>>, %arg16: memref<128x10xbf16, #tpu.memory_space<vmem>>, %arg17: memref<1x10xf32, #tpu.memory_space<vmem>>, %arg18: memref<5x128x2xbf16, #tpu.memory_space<vmem>>, %arg19: memref<5x1x2xf32, #tpu.memory_space<vmem>>, %arg20: memref<5x128x128xbf16, #tpu.memory_space<vmem>>, %arg21: memref<5x1x128xf32, #tpu.memory_space<vmem>>, %arg22: memref<5x128x2xbf16, #tpu.memory_space<vmem>>, %arg23: memref<5x1x2xf32, #tpu.memory_space<vmem>>, %arg24: memref<10x5xbf16, #tpu.memory_space<vmem>>, %arg25: memref<128x5xbf16, #tpu.memory_space<vmem>>, %arg26: memref<1x5xf32, #tpu.memory_space<vmem>>, %arg27: memref<8x2xf32, #tpu.memory_space<vmem>>) attributes {dimension_semantics = [], scalar_prefetch = 0 : i64, scratch_operands = 0 : i64, tpu.core_type = #tpu.core_type<tc>} {
    %c0 = arith.constant 0 : index
    %c0_0 = arith.constant 0 : index
    %c0_1 = arith.constant 0 : index
    %0 = vector.load %arg0[%c0, %c0_0, %c0_1] : memref<8x8x128xf32, #tpu.memory_space<vmem>>, vector<8x8x128xf32>
    %1 = vector.shape_cast %0 : vector<8x8x128xf32> to vector<64x128xf32>
    %c0_2 = arith.constant 0 : index
    %c0_3 = arith.constant 0 : index
    %2 = vector.load %arg3[%c0_2, %c0_3] : memref<128x384xbf16, #tpu.memory_space<vmem>>, vector<128x384xbf16>
    %3 = arith.truncf %1 : vector<64x128xf32> to vector<64x128xbf16>
    %cst = arith.constant dense<0.000000e+00> : vector<64x384xf32>
    %4 = tpu.matmul %3, %2, %cst {dimension_numbers = #tpu.dot_dimension_numbers<[1], [0], [0], [1], [0, 0, 1, 1], [], []>} : vector<64x128xbf16>, vector<128x384xbf16>, vector<64x384xf32> -> vector<64x384xf32>
    %5 = vector.extract_strided_slice %4 {offsets = [0, 0], sizes = [64, 128], strides = [1, 1]} : vector<64x384xf32> to vector<64x128xf32>
    %6 = vector.shape_cast %5 : vector<64x128xf32> to vector<8x8x128xf32>
    %7 = vector.extract_strided_slice %4 {offsets = [0, 128], sizes = [64, 128], strides = [1, 1]} : vector<64x384xf32> to vector<64x128xf32>
    %8 = vector.shape_cast %7 : vector<64x128xf32> to vector<8x8x128xf32>
    %9 = vector.extract_strided_slice %4 {offsets = [0, 256], sizes = [64, 128], strides = [1, 1]} : vector<64x384xf32> to vector<64x128xf32>
    %10 = vector.shape_cast %9 : vector<64x128xf32> to vector<8x8x128xf32>
    %11 = arith.truncf %6 : vector<8x8x128xf32> to vector<8x8x128xbf16>
    %12 = arith.truncf %8 : vector<8x8x128xf32> to vector<8x8x128xbf16>
    "tpu.trace_start"() <{level = 10 : i32, message = "bqd,bkd->bqk"}> : () -> ()
    %cst_4 = arith.constant dense<0.000000e+00> : vector<8x8x8xf32>
    %13 = tpu.matmul %11, %12, %cst_4 {dimension_numbers = #tpu.dot_dimension_numbers<[2], [2], [1], [1], [0, 0, 0, 1, 1, 1], [0], [0]>} : vector<8x8x128xbf16>, vector<8x8x128xbf16>, vector<8x8x8xf32> -> vector<8x8x8xf32>
    "tpu.trace_stop"() : () -> ()
    %cst_5 = arith.constant 0.0883883461 : f32
    %14 = vector.broadcast %cst_5 : f32 to vector<8x8x8xf32>
    %15 = arith.mulf %13, %14 : vector<8x8x8xf32>
    %c0_6 = arith.constant 0 : index
    %c0_7 = arith.constant 0 : index
    %16 = vector.load %arg1[%c0_6, %c0_7] : memref<8x8xf32, #tpu.memory_space<vmem>>, vector<8x8xf32>
    %17 = vector.shape_cast %16 : vector<8x8xf32> to vector<8x1x8xf32>
    %cst_8 = arith.constant 1.000000e+00 : f32
    %18 = vector.broadcast %cst_8 : f32 to vector<8x1x8xf32>
    %19 = arith.subf %17, %18 : vector<8x1x8xf32>
    %cst_9 = arith.constant 1.000000e+09 : f32
    %20 = vector.broadcast %cst_9 : f32 to vector<8x1x8xf32>
    %21 = arith.mulf %19, %20 : vector<8x1x8xf32>
    %22 = vector.broadcast %21 : vector<8x1x8xf32> to vector<8x8x8xf32>
    %23 = arith.addf %15, %22 : vector<8x8x8xf32>
    %cst_10 = arith.constant dense<0xFF800000> : vector<8x8xf32>
    %24 = vector.multi_reduction <maximumf>, %23, %cst_10 [2] : vector<8x8x8xf32> to vector<8x8xf32>
    %25 = vector.shape_cast %24 : vector<8x8xf32> to vector<8x8x1xf32>
    %26 = vector.broadcast %25 : vector<8x8x1xf32> to vector<8x8x8xf32>
    %27 = arith.subf %23, %26 : vector<8x8x8xf32>
    %28 = math.exp %27 : vector<8x8x8xf32>
    %cst_11 = arith.constant dense<0.000000e+00> : vector<8x8xf32>
    %29 = vector.multi_reduction <add>, %28, %cst_11 [2] : vector<8x8x8xf32> to vector<8x8xf32>
    %30 = vector.shape_cast %29 : vector<8x8xf32> to vector<8x8x1xf32>
    %31 = tpu.reciprocal %30 {approx = true} : vector<8x8x1xf32> -> vector<8x8x1xf32>
    %32 = vector.broadcast %31 : vector<8x8x1xf32> to vector<8x8x8xf32>
    %33 = arith.mulf %28, %32 : vector<8x8x8xf32>
    %34 = arith.truncf %33 : vector<8x8x8xf32> to vector<8x8x8xbf16>
    %35 = arith.truncf %10 : vector<8x8x128xf32> to vector<8x8x128xbf16>
    "tpu.trace_start"() <{level = 10 : i32, message = "bqk,bkd->bqd"}> : () -> ()
    %cst_12 = arith.constant dense<0.000000e+00> : vector<8x8x128xf32>
    %36 = tpu.matmul %34, %35, %cst_12 {dimension_numbers = #tpu.dot_dimension_numbers<[2], [1], [1], [2], [0, 0, 0, 1, 1, 2], [0], [0]>} : vector<8x8x8xbf16>, vector<8x8x128xbf16>, vector<8x8x128xf32> -> vector<8x8x128xf32>
    "tpu.trace_stop"() : () -> ()
    %37 = vector.shape_cast %36 : vector<8x8x128xf32> to vector<64x128xf32>
    %c0_13 = arith.constant 0 : index
    %c0_14 = arith.constant 0 : index
    %38 = vector.load %arg4[%c0_13, %c0_14] : memref<128x128xbf16, #tpu.memory_space<vmem>>, vector<128x128xbf16>
    %39 = arith.truncf %37 : vector<64x128xf32> to vector<64x128xbf16>
    %cst_15 = arith.constant dense<0.000000e+00> : vector<64x128xf32>
    %40 = tpu.matmul %39, %38, %cst_15 {dimension_numbers = #tpu.dot_dimension_numbers<[1], [0], [0], [1], [0, 0, 1, 1], [], []>} : vector<64x128xbf16>, vector<128x128xbf16>, vector<64x128xf32> -> vector<64x128xf32>
    %41 = arith.addf %1, %40 : vector<64x128xf32>
    %c0_16 = arith.constant 0 : index
    %c0_17 = arith.constant 0 : index
    %42 = vector.load %arg5[%c0_16, %c0_17] : memref<1x128xf32, #tpu.memory_space<vmem>>, vector<1x128xf32>
    %c0_18 = arith.constant 0 : index
    %c0_19 = arith.constant 0 : index
    %43 = vector.load %arg6[%c0_18, %c0_19] : memref<1x128xf32, #tpu.memory_space<vmem>>, vector<1x128xf32>
    %cst_20 = arith.constant dense<0.000000e+00> : vector<64xf32>
    %44 = vector.multi_reduction <add>, %41, %cst_20 [1] : vector<64x128xf32> to vector<64xf32>
    %45 = vector.shape_cast %44 : vector<64xf32> to vector<64x1xf32>
    %cst_21 = arith.constant 1.280000e+02 : f32
    %46 = vector.broadcast %cst_21 : f32 to vector<64x1xf32>
    %47 = arith.divf %45, %46 : vector<64x1xf32>
    %48 = vector.broadcast %47 : vector<64x1xf32> to vector<64x128xf32>
    %49 = arith.subf %41, %48 : vector<64x128xf32>
    %50 = arith.mulf %49, %49 : vector<64x128xf32>
    %cst_22 = arith.constant dense<0.000000e+00> : vector<64xf32>
    %51 = vector.multi_reduction <add>, %50, %cst_22 [1] : vector<64x128xf32> to vector<64xf32>
    %52 = vector.shape_cast %51 : vector<64xf32> to vector<64x1xf32>
    %cst_23 = arith.constant 1.280000e+02 : f32
    %53 = vector.broadcast %cst_23 : f32 to vector<64x1xf32>
    %54 = arith.divf %52, %53 : vector<64x1xf32>
    %55 = vector.broadcast %47 : vector<64x1xf32> to vector<64x128xf32>
    %56 = arith.subf %41, %55 : vector<64x128xf32>
    %cst_24 = arith.constant 9.99999996E-13 : f32
    %57 = vector.broadcast %cst_24 : f32 to vector<64x1xf32>
    %58 = arith.addf %54, %57 : vector<64x1xf32>
    %59 = math.rsqrt %58 : vector<64x1xf32>
    %60 = vector.broadcast %59 : vector<64x1xf32> to vector<64x128xf32>
    %61 = arith.mulf %56, %60 : vector<64x128xf32>
    %62 = vector.broadcast %42 : vector<1x128xf32> to vector<64x128xf32>
    %63 = arith.mulf %61, %62 : vector<64x128xf32>
    %64 = vector.broadcast %43 : vector<1x128xf32> to vector<64x128xf32>
    %65 = arith.addf %63, %64 : vector<64x128xf32>
    %c0_25 = arith.constant 0 : index
    %c0_26 = arith.constant 0 : index
    %66 = vector.load %arg7[%c0_25, %c0_26] : memref<128x256xbf16, #tpu.memory_space<vmem>>, vector<128x256xbf16>
    %67 = arith.truncf %65 : vector<64x128xf32> to vector<64x128xbf16>
    %cst_27 = arith.constant dense<0.000000e+00> : vector<64x256xf32>
    %68 = tpu.matmul %67, %66, %cst_27 {dimension_numbers = #tpu.dot_dimension_numbers<[1], [0], [0], [1], [0, 0, 1, 1], [], []>} : vector<64x128xbf16>, vector<128x256xbf16>, vector<64x256xf32> -> vector<64x256xf32>
    %c0_28 = arith.constant 0 : index
    %c0_29 = arith.constant 0 : index
    %69 = vector.load %arg8[%c0_28, %c0_29] : memref<1x256xf32, #tpu.memory_space<vmem>>, vector<1x256xf32>
    %70 = vector.broadcast %69 : vector<1x256xf32> to vector<64x256xf32>
    %71 = arith.addf %68, %70 : vector<64x256xf32>
    %cst_30 = arith.constant 0.000000e+00 : f32
    %72 = vector.broadcast %cst_30 : f32 to vector<64x256xf32>
    %73 = arith.maximumf %71, %72 : vector<64x256xf32>
    %c0_31 = arith.constant 0 : index
    %c0_32 = arith.constant 0 : index
    %74 = vector.load %arg9[%c0_31, %c0_32] : memref<256x128xbf16, #tpu.memory_space<vmem>>, vector<256x128xbf16>
    %75 = arith.truncf %73 : vector<64x256xf32> to vector<64x256xbf16>
    %cst_33 = arith.constant dense<0.000000e+00> : vector<64x128xf32>
    %76 = tpu.matmul %75, %74, %cst_33 {dimension_numbers = #tpu.dot_dimension_numbers<[1], [0], [0], [1], [0, 0, 1, 1], [], []>} : vector<64x256xbf16>, vector<256x128xbf16>, vector<64x128xf32> -> vector<64x128xf32>
    %c0_34 = arith.constant 0 : index
    %c0_35 = arith.constant 0 : index
    %77 = vector.load %arg10[%c0_34, %c0_35] : memref<1x128xf32, #tpu.memory_space<vmem>>, vector<1x128xf32>
    %78 = vector.broadcast %77 : vector<1x128xf32> to vector<64x128xf32>
    %79 = arith.addf %76, %78 : vector<64x128xf32>
    %80 = arith.addf %65, %79 : vector<64x128xf32>
    %c0_36 = arith.constant 0 : index
    %c0_37 = arith.constant 0 : index
    %81 = vector.load %arg11[%c0_36, %c0_37] : memref<1x128xf32, #tpu.memory_space<vmem>>, vector<1x128xf32>
    %c0_38 = arith.constant 0 : index
    %c0_39 = arith.constant 0 : index
    %82 = vector.load %arg12[%c0_38, %c0_39] : memref<1x128xf32, #tpu.memory_space<vmem>>, vector<1x128xf32>
    %cst_40 = arith.constant dense<0.000000e+00> : vector<64xf32>
    %83 = vector.multi_reduction <add>, %80, %cst_40 [1] : vector<64x128xf32> to vector<64xf32>
    %84 = vector.shape_cast %83 : vector<64xf32> to vector<64x1xf32>
    %cst_41 = arith.constant 1.280000e+02 : f32
    %85 = vector.broadcast %cst_41 : f32 to vector<64x1xf32>
    %86 = arith.divf %84, %85 : vector<64x1xf32>
    %87 = vector.broadcast %86 : vector<64x1xf32> to vector<64x128xf32>
    %88 = arith.subf %80, %87 : vector<64x128xf32>
    %89 = arith.mulf %88, %88 : vector<64x128xf32>
    %cst_42 = arith.constant dense<0.000000e+00> : vector<64xf32>
    %90 = vector.multi_reduction <add>, %89, %cst_42 [1] : vector<64x128xf32> to vector<64xf32>
    %91 = vector.shape_cast %90 : vector<64xf32> to vector<64x1xf32>
    %cst_43 = arith.constant 1.280000e+02 : f32
    %92 = vector.broadcast %cst_43 : f32 to vector<64x1xf32>
    %93 = arith.divf %91, %92 : vector<64x1xf32>
    %94 = vector.broadcast %86 : vector<64x1xf32> to vector<64x128xf32>
    %95 = arith.subf %80, %94 : vector<64x128xf32>
    %cst_44 = arith.constant 9.99999996E-13 : f32
    %96 = vector.broadcast %cst_44 : f32 to vector<64x1xf32>
    %97 = arith.addf %93, %96 : vector<64x1xf32>
    %98 = math.rsqrt %97 : vector<64x1xf32>
    %99 = vector.broadcast %98 : vector<64x1xf32> to vector<64x128xf32>
    %100 = arith.mulf %95, %99 : vector<64x128xf32>
    %101 = vector.broadcast %81 : vector<1x128xf32> to vector<64x128xf32>
    %102 = arith.mulf %100, %101 : vector<64x128xf32>
    %103 = vector.broadcast %82 : vector<1x128xf32> to vector<64x128xf32>
    %104 = arith.addf %102, %103 : vector<64x128xf32>
    %105 = vector.shape_cast %104 : vector<64x128xf32> to vector<8x8x128xf32>
    %106 = vector.extract_strided_slice %105 {offsets = [0, 0, 0], sizes = [8, 1, 128], strides = [1, 1, 1]} : vector<8x8x128xf32> to vector<8x1x128xf32>
    %107 = vector.shape_cast %106 : vector<8x1x128xf32> to vector<8x128xf32>
    %c0_45 = arith.constant 0 : index
    %c0_46 = arith.constant 0 : index
    %108 = vector.load %arg2[%c0_45, %c0_46] : memref<8x128xf32, #tpu.memory_space<vmem>>, vector<8x128xf32>
    %109 = arith.mulf %107, %108 : vector<8x128xf32>
    %cst_47 = arith.constant 2.000000e+00 : f32
    %110 = vector.broadcast %cst_47 : f32 to vector<8x128xf32>
    %111 = arith.mulf %109, %110 : vector<8x128xf32>
    %c0_48 = arith.constant 0 : index
    %c0_49 = arith.constant 0 : index
    %112 = vector.load %arg13[%c0_48, %c0_49] : memref<5x3xf32, #tpu.memory_space<vmem>>, vector<5x3xf32>
    %cst_50 = arith.constant dense<0xFF800000> : vector<5xf32>
    %113 = vector.multi_reduction <maximumf>, %112, %cst_50 [1] : vector<5x3xf32> to vector<5xf32>
    %114 = vector.shape_cast %113 : vector<5xf32> to vector<5x1xf32>
    %115 = vector.broadcast %114 : vector<5x1xf32> to vector<5x3xf32>
    %116 = arith.subf %112, %115 : vector<5x3xf32>
    %117 = math.exp %116 : vector<5x3xf32>
    %cst_51 = arith.constant dense<0.000000e+00> : vector<5xf32>
    %118 = vector.multi_reduction <add>, %117, %cst_51 [1] : vector<5x3xf32> to vector<5xf32>
    %119 = vector.shape_cast %118 : vector<5xf32> to vector<5x1xf32>
    %120 = tpu.reciprocal %119 {approx = true} : vector<5x1xf32> -> vector<5x1xf32>
    %121 = vector.broadcast %120 : vector<5x1xf32> to vector<5x3xf32>
    %122 = arith.mulf %117, %121 : vector<5x3xf32>
    %cst_52 = arith.constant 0.333333343 : f32
    %123 = vector.broadcast %cst_52 : f32 to vector<5x3xf32>
    %124 = arith.mulf %122, %123 : vector<5x3xf32>
    %125 = vector.extract_strided_slice %124 {offsets = [0, 0], sizes = [5, 1], strides = [1, 1]} : vector<5x3xf32> to vector<5x1xf32>
    %126 = vector.shape_cast %125 : vector<5x1xf32> to vector<5x1x1xf32>
    %127 = vector.extract_strided_slice %124 {offsets = [0, 1], sizes = [5, 1], strides = [1, 1]} : vector<5x3xf32> to vector<5x1xf32>
    %128 = vector.shape_cast %127 : vector<5x1xf32> to vector<5x1x1xf32>
    %129 = vector.extract_strided_slice %124 {offsets = [0, 2], sizes = [5, 1], strides = [1, 1]} : vector<5x3xf32> to vector<5x1xf32>
    %130 = vector.shape_cast %129 : vector<5x1xf32> to vector<5x1x1xf32>
    %c0_53 = arith.constant 0 : index
    %c0_54 = arith.constant 0 : index
    %131 = vector.load %arg14[%c0_53, %c0_54] : memref<128x1280xbf16, #tpu.memory_space<vmem>>, vector<128x1280xbf16>
    %132 = arith.truncf %111 : vector<8x128xf32> to vector<8x128xbf16>
    %cst_55 = arith.constant dense<0.000000e+00> : vector<8x1280xf32>
    %133 = tpu.matmul %132, %131, %cst_55 {dimension_numbers = #tpu.dot_dimension_numbers<[1], [0], [0], [1], [0, 0, 1, 1], [], []>} : vector<8x128xbf16>, vector<128x1280xbf16>, vector<8x1280xf32> -> vector<8x1280xf32>
    %c0_56 = arith.constant 0 : index
    %c0_57 = arith.constant 0 : index
    %134 = vector.load %arg15[%c0_56, %c0_57] : memref<1x1280xf32, #tpu.memory_space<vmem>>, vector<1x1280xf32>
    %135 = vector.broadcast %134 : vector<1x1280xf32> to vector<8x1280xf32>
    %136 = arith.addf %133, %135 : vector<8x1280xf32>
    %cst_58 = arith.constant 0.000000e+00 : f32
    %137 = vector.broadcast %cst_58 : f32 to vector<8x1280xf32>
    %138 = arith.maximumf %136, %137 : vector<8x1280xf32>
    %139 = vector.extract_strided_slice %138 {offsets = [0, 0], sizes = [8, 128], strides = [1, 1]} : vector<8x1280xf32> to vector<8x128xf32>
    %140 = vector.shape_cast %139 : vector<8x128xf32> to vector<1x8x128xf32>
    %141 = vector.extract_strided_slice %138 {offsets = [0, 128], sizes = [8, 128], strides = [1, 1]} : vector<8x1280xf32> to vector<8x128xf32>
    %142 = vector.shape_cast %141 : vector<8x128xf32> to vector<1x8x128xf32>
    %143 = vector.extract_strided_slice %138 {offsets = [0, 256], sizes = [8, 128], strides = [1, 1]} : vector<8x1280xf32> to vector<8x128xf32>
    %144 = vector.shape_cast %143 : vector<8x128xf32> to vector<1x8x128xf32>
    %145 = vector.extract_strided_slice %138 {offsets = [0, 384], sizes = [8, 128], strides = [1, 1]} : vector<8x1280xf32> to vector<8x128xf32>
    %146 = vector.shape_cast %145 : vector<8x128xf32> to vector<1x8x128xf32>
    %147 = vector.extract_strided_slice %138 {offsets = [0, 512], sizes = [8, 128], strides = [1, 1]} : vector<8x1280xf32> to vector<8x128xf32>
    %148 = vector.shape_cast %147 : vector<8x128xf32> to vector<1x8x128xf32>
    %149 = vector.extract_strided_slice %138 {offsets = [0, 640], sizes = [8, 128], strides = [1, 1]} : vector<8x1280xf32> to vector<8x128xf32>
    %150 = vector.shape_cast %149 : vector<8x128xf32> to vector<1x8x128xf32>
    %151 = vector.extract_strided_slice %138 {offsets = [0, 768], sizes = [8, 128], strides = [1, 1]} : vector<8x1280xf32> to vector<8x128xf32>
    %152 = vector.shape_cast %151 : vector<8x128xf32> to vector<1x8x128xf32>
    %153 = vector.extract_strided_slice %138 {offsets = [0, 896], sizes = [8, 128], strides = [1, 1]} : vector<8x1280xf32> to vector<8x128xf32>
    %154 = vector.shape_cast %153 : vector<8x128xf32> to vector<1x8x128xf32>
    %155 = vector.extract_strided_slice %138 {offsets = [0, 1024], sizes = [8, 128], strides = [1, 1]} : vector<8x1280xf32> to vector<8x128xf32>
    %156 = vector.shape_cast %155 : vector<8x128xf32> to vector<1x8x128xf32>
    %157 = vector.extract_strided_slice %138 {offsets = [0, 1152], sizes = [8, 128], strides = [1, 1]} : vector<8x1280xf32> to vector<8x128xf32>
    %158 = vector.shape_cast %157 : vector<8x128xf32> to vector<1x8x128xf32>
    %159 = tpu.concatenate %140, %142, %144, %146, %148, %150, %152, %154, %156, %158 in 0 : vector<1x8x128xf32>, vector<1x8x128xf32>, vector<1x8x128xf32>, vector<1x8x128xf32>, vector<1x8x128xf32>, vector<1x8x128xf32>, vector<1x8x128xf32>, vector<1x8x128xf32>, vector<1x8x128xf32>, vector<1x8x128xf32> -> vector<10x8x128xf32>
    %160 = vector.extract_strided_slice %159 {offsets = [0, 0, 0], sizes = [5, 8, 128], strides = [1, 1, 1]} : vector<10x8x128xf32> to vector<5x8x128xf32>
    %161 = vector.extract_strided_slice %159 {offsets = [5, 0, 0], sizes = [5, 8, 128], strides = [1, 1, 1]} : vector<10x8x128xf32> to vector<5x8x128xf32>
    %c0_59 = arith.constant 0 : index
    %c0_60 = arith.constant 0 : index
    %162 = vector.load %arg16[%c0_59, %c0_60] : memref<128x10xbf16, #tpu.memory_space<vmem>>, vector<128x10xbf16>
    %163 = arith.truncf %111 : vector<8x128xf32> to vector<8x128xbf16>
    %cst_61 = arith.constant dense<0.000000e+00> : vector<8x10xf32>
    %164 = tpu.matmul %163, %162, %cst_61 {dimension_numbers = #tpu.dot_dimension_numbers<[1], [0], [0], [1], [0, 0, 1, 1], [], []>} : vector<8x128xbf16>, vector<128x10xbf16>, vector<8x10xf32> -> vector<8x10xf32>
    %c0_62 = arith.constant 0 : index
    %c0_63 = arith.constant 0 : index
    %165 = vector.load %arg17[%c0_62, %c0_63] : memref<1x10xf32, #tpu.memory_space<vmem>>, vector<1x10xf32>
    %166 = vector.broadcast %165 : vector<1x10xf32> to vector<8x10xf32>
    %167 = arith.addf %164, %166 : vector<8x10xf32>
    %168 = vector.extract_strided_slice %167 {offsets = [0, 0], sizes = [8, 2], strides = [1, 1]} : vector<8x10xf32> to vector<8x2xf32>
    %169 = vector.shape_cast %168 : vector<8x2xf32> to vector<1x8x2xf32>
    %170 = vector.extract_strided_slice %167 {offsets = [0, 2], sizes = [8, 2], strides = [1, 1]} : vector<8x10xf32> to vector<8x2xf32>
    %171 = vector.shape_cast %170 : vector<8x2xf32> to vector<1x8x2xf32>
    %172 = vector.extract_strided_slice %167 {offsets = [0, 4], sizes = [8, 2], strides = [1, 1]} : vector<8x10xf32> to vector<8x2xf32>
    %173 = vector.shape_cast %172 : vector<8x2xf32> to vector<1x8x2xf32>
    %174 = vector.extract_strided_slice %167 {offsets = [0, 6], sizes = [8, 2], strides = [1, 1]} : vector<8x10xf32> to vector<8x2xf32>
    %175 = vector.shape_cast %174 : vector<8x2xf32> to vector<1x8x2xf32>
    %176 = vector.extract_strided_slice %167 {offsets = [0, 8], sizes = [8, 2], strides = [1, 1]} : vector<8x10xf32> to vector<8x2xf32>
    %177 = vector.shape_cast %176 : vector<8x2xf32> to vector<1x8x2xf32>
    %178 = tpu.concatenate %169, %171, %173, %175, %177 in 0 : vector<1x8x2xf32>, vector<1x8x2xf32>, vector<1x8x2xf32>, vector<1x8x2xf32>, vector<1x8x2xf32> -> vector<5x8x2xf32>
    %c0_64 = arith.constant 0 : index
    %c0_65 = arith.constant 0 : index
    %c0_66 = arith.constant 0 : index
    %179 = vector.load %arg18[%c0_64, %c0_65, %c0_66] : memref<5x128x2xbf16, #tpu.memory_space<vmem>>, vector<5x128x2xbf16>
    %180 = arith.truncf %160 : vector<5x8x128xf32> to vector<5x8x128xbf16>
    "tpu.trace_start"() <{level = 10 : i32, message = "nbd,ndc->nbc"}> : () -> ()
    %cst_67 = arith.constant dense<0.000000e+00> : vector<5x8x2xf32>
    %181 = tpu.matmul %180, %179, %cst_67 {dimension_numbers = #tpu.dot_dimension_numbers<[2], [1], [1], [2], [0, 0, 0, 1, 1, 2], [0], [0]>} : vector<5x8x128xbf16>, vector<5x128x2xbf16>, vector<5x8x2xf32> -> vector<5x8x2xf32>
    "tpu.trace_stop"() : () -> ()
    %c0_68 = arith.constant 0 : index
    %c0_69 = arith.constant 0 : index
    %c0_70 = arith.constant 0 : index
    %182 = vector.load %arg19[%c0_68, %c0_69, %c0_70] : memref<5x1x2xf32, #tpu.memory_space<vmem>>, vector<5x1x2xf32>
    %183 = vector.broadcast %182 : vector<5x1x2xf32> to vector<5x8x2xf32>
    %184 = arith.addf %181, %183 : vector<5x8x2xf32>
    %c0_71 = arith.constant 0 : index
    %c0_72 = arith.constant 0 : index
    %c0_73 = arith.constant 0 : index
    %185 = vector.load %arg20[%c0_71, %c0_72, %c0_73] : memref<5x128x128xbf16, #tpu.memory_space<vmem>>, vector<5x128x128xbf16>
    %186 = arith.truncf %161 : vector<5x8x128xf32> to vector<5x8x128xbf16>
    "tpu.trace_start"() <{level = 10 : i32, message = "nbd,nde->nbe"}> : () -> ()
    %cst_74 = arith.constant dense<0.000000e+00> : vector<5x8x128xf32>
    %187 = tpu.matmul %186, %185, %cst_74 {dimension_numbers = #tpu.dot_dimension_numbers<[2], [1], [1], [2], [0, 0, 0, 1, 1, 2], [0], [0]>} : vector<5x8x128xbf16>, vector<5x128x128xbf16>, vector<5x8x128xf32> -> vector<5x8x128xf32>
    "tpu.trace_stop"() : () -> ()
    %c0_75 = arith.constant 0 : index
    %c0_76 = arith.constant 0 : index
    %c0_77 = arith.constant 0 : index
    %188 = vector.load %arg21[%c0_75, %c0_76, %c0_77] : memref<5x1x128xf32, #tpu.memory_space<vmem>>, vector<5x1x128xf32>
    %189 = vector.broadcast %188 : vector<5x1x128xf32> to vector<5x8x128xf32>
    %190 = arith.addf %187, %189 : vector<5x8x128xf32>
    %cst_78 = arith.constant 0.000000e+00 : f32
    %191 = vector.broadcast %cst_78 : f32 to vector<5x8x128xf32>
    %192 = arith.maximumf %190, %191 : vector<5x8x128xf32>
    %c0_79 = arith.constant 0 : index
    %c0_80 = arith.constant 0 : index
    %c0_81 = arith.constant 0 : index
    %193 = vector.load %arg22[%c0_79, %c0_80, %c0_81] : memref<5x128x2xbf16, #tpu.memory_space<vmem>>, vector<5x128x2xbf16>
    %194 = arith.truncf %192 : vector<5x8x128xf32> to vector<5x8x128xbf16>
    "tpu.trace_start"() <{level = 10 : i32, message = "nbd,ndc->nbc"}> : () -> ()
    %cst_82 = arith.constant dense<0.000000e+00> : vector<5x8x2xf32>
    %195 = tpu.matmul %194, %193, %cst_82 {dimension_numbers = #tpu.dot_dimension_numbers<[2], [1], [1], [2], [0, 0, 0, 1, 1, 2], [0], [0]>} : vector<5x8x128xbf16>, vector<5x128x2xbf16>, vector<5x8x2xf32> -> vector<5x8x2xf32>
    "tpu.trace_stop"() : () -> ()
    %c0_83 = arith.constant 0 : index
    %c0_84 = arith.constant 0 : index
    %c0_85 = arith.constant 0 : index
    %196 = vector.load %arg23[%c0_83, %c0_84, %c0_85] : memref<5x1x2xf32, #tpu.memory_space<vmem>>, vector<5x1x2xf32>
    %197 = vector.broadcast %196 : vector<5x1x2xf32> to vector<5x8x2xf32>
    %198 = arith.addf %195, %197 : vector<5x8x2xf32>
    %199 = vector.broadcast %126 : vector<5x1x1xf32> to vector<5x8x2xf32>
    %200 = arith.mulf %199, %178 : vector<5x8x2xf32>
    %201 = vector.broadcast %128 : vector<5x1x1xf32> to vector<5x8x2xf32>
    %202 = arith.mulf %201, %184 : vector<5x8x2xf32>
    %203 = arith.addf %200, %202 : vector<5x8x2xf32>
    %204 = vector.broadcast %130 : vector<5x1x1xf32> to vector<5x8x2xf32>
    %205 = arith.mulf %204, %198 : vector<5x8x2xf32>
    %206 = arith.addf %203, %205 : vector<5x8x2xf32>
    %207 = vector.extract_strided_slice %206 {offsets = [0, 0, 0], sizes = [1, 8, 2], strides = [1, 1, 1]} : vector<5x8x2xf32> to vector<1x8x2xf32>
    %208 = vector.shape_cast %207 : vector<1x8x2xf32> to vector<8x2xf32>
    %209 = vector.extract_strided_slice %206 {offsets = [1, 0, 0], sizes = [1, 8, 2], strides = [1, 1, 1]} : vector<5x8x2xf32> to vector<1x8x2xf32>
    %210 = vector.shape_cast %209 : vector<1x8x2xf32> to vector<8x2xf32>
    %211 = vector.extract_strided_slice %206 {offsets = [2, 0, 0], sizes = [1, 8, 2], strides = [1, 1, 1]} : vector<5x8x2xf32> to vector<1x8x2xf32>
    %212 = vector.shape_cast %211 : vector<1x8x2xf32> to vector<8x2xf32>
    %213 = vector.extract_strided_slice %206 {offsets = [3, 0, 0], sizes = [1, 8, 2], strides = [1, 1, 1]} : vector<5x8x2xf32> to vector<1x8x2xf32>
    %214 = vector.shape_cast %213 : vector<1x8x2xf32> to vector<8x2xf32>
    %215 = vector.extract_strided_slice %206 {offsets = [4, 0, 0], sizes = [1, 8, 2], strides = [1, 1, 1]} : vector<5x8x2xf32> to vector<1x8x2xf32>
    %216 = vector.shape_cast %215 : vector<1x8x2xf32> to vector<8x2xf32>
    %217 = tpu.concatenate %208, %210, %212, %214, %216 in 1 : vector<8x2xf32>, vector<8x2xf32>, vector<8x2xf32>, vector<8x2xf32>, vector<8x2xf32> -> vector<8x10xf32>
    %c0_86 = arith.constant 0 : index
    %c0_87 = arith.constant 0 : index
    %218 = vector.load %arg24[%c0_86, %c0_87] : memref<10x5xbf16, #tpu.memory_space<vmem>>, vector<10x5xbf16>
    %219 = arith.truncf %217 : vector<8x10xf32> to vector<8x10xbf16>
    %cst_88 = arith.constant dense<0.000000e+00> : vector<8x5xf32>
    %220 = tpu.matmul %219, %218, %cst_88 {dimension_numbers = #tpu.dot_dimension_numbers<[1], [0], [0], [1], [0, 0, 1, 1], [], []>} : vector<8x10xbf16>, vector<10x5xbf16>, vector<8x5xf32> -> vector<8x5xf32>
    %c0_89 = arith.constant 0 : index
    %c0_90 = arith.constant 0 : index
    %221 = vector.load %arg25[%c0_89, %c0_90] : memref<128x5xbf16, #tpu.memory_space<vmem>>, vector<128x5xbf16>
    %222 = arith.truncf %111 : vector<8x128xf32> to vector<8x128xbf16>
    %cst_91 = arith.constant dense<0.000000e+00> : vector<8x5xf32>
    %223 = tpu.matmul %222, %221, %cst_91 {dimension_numbers = #tpu.dot_dimension_numbers<[1], [0], [0], [1], [0, 0, 1, 1], [], []>} : vector<8x128xbf16>, vector<128x5xbf16>, vector<8x5xf32> -> vector<8x5xf32>
    %224 = arith.addf %220, %223 : vector<8x5xf32>
    %c0_92 = arith.constant 0 : index
    %c0_93 = arith.constant 0 : index
    %225 = vector.load %arg26[%c0_92, %c0_93] : memref<1x5xf32, #tpu.memory_space<vmem>>, vector<1x5xf32>
    %226 = vector.broadcast %225 : vector<1x5xf32> to vector<8x5xf32>
    %227 = arith.addf %224, %226 : vector<8x5xf32>
    %228 = vector.extract_strided_slice %206 {offsets = [0, 0, 0], sizes = [1, 8, 2], strides = [1, 1, 1]} : vector<5x8x2xf32> to vector<1x8x2xf32>
    %229 = vector.shape_cast %228 : vector<1x8x2xf32> to vector<8x2xf32>
    %230 = vector.extract_strided_slice %227 {offsets = [0, 0], sizes = [8, 1], strides = [1, 1]} : vector<8x5xf32> to vector<8x1xf32>
    %231 = vector.broadcast %230 : vector<8x1xf32> to vector<8x2xf32>
    %232 = arith.mulf %229, %231 : vector<8x2xf32>
    %233 = vector.extract_strided_slice %206 {offsets = [1, 0, 0], sizes = [1, 8, 2], strides = [1, 1, 1]} : vector<5x8x2xf32> to vector<1x8x2xf32>
    %234 = vector.shape_cast %233 : vector<1x8x2xf32> to vector<8x2xf32>
    %235 = vector.extract_strided_slice %227 {offsets = [0, 1], sizes = [8, 1], strides = [1, 1]} : vector<8x5xf32> to vector<8x1xf32>
    %236 = vector.broadcast %235 : vector<8x1xf32> to vector<8x2xf32>
    %237 = arith.mulf %234, %236 : vector<8x2xf32>
    %238 = arith.addf %232, %237 : vector<8x2xf32>
    %239 = vector.extract_strided_slice %206 {offsets = [2, 0, 0], sizes = [1, 8, 2], strides = [1, 1, 1]} : vector<5x8x2xf32> to vector<1x8x2xf32>
    %240 = vector.shape_cast %239 : vector<1x8x2xf32> to vector<8x2xf32>
    %241 = vector.extract_strided_slice %227 {offsets = [0, 2], sizes = [8, 1], strides = [1, 1]} : vector<8x5xf32> to vector<8x1xf32>
    %242 = vector.broadcast %241 : vector<8x1xf32> to vector<8x2xf32>
    %243 = arith.mulf %240, %242 : vector<8x2xf32>
    %244 = arith.addf %238, %243 : vector<8x2xf32>
    %245 = vector.extract_strided_slice %206 {offsets = [3, 0, 0], sizes = [1, 8, 2], strides = [1, 1, 1]} : vector<5x8x2xf32> to vector<1x8x2xf32>
    %246 = vector.shape_cast %245 : vector<1x8x2xf32> to vector<8x2xf32>
    %247 = vector.extract_strided_slice %227 {offsets = [0, 3], sizes = [8, 1], strides = [1, 1]} : vector<8x5xf32> to vector<8x1xf32>
    %248 = vector.broadcast %247 : vector<8x1xf32> to vector<8x2xf32>
    %249 = arith.mulf %246, %248 : vector<8x2xf32>
    %250 = arith.addf %244, %249 : vector<8x2xf32>
    %251 = vector.extract_strided_slice %206 {offsets = [4, 0, 0], sizes = [1, 8, 2], strides = [1, 1, 1]} : vector<5x8x2xf32> to vector<1x8x2xf32>
    %252 = vector.shape_cast %251 : vector<1x8x2xf32> to vector<8x2xf32>
    %253 = vector.extract_strided_slice %227 {offsets = [0, 4], sizes = [8, 1], strides = [1, 1]} : vector<8x5xf32> to vector<8x1xf32>
    %254 = vector.broadcast %253 : vector<8x1xf32> to vector<8x2xf32>
    %255 = arith.mulf %252, %254 : vector<8x2xf32>
    %256 = arith.addf %250, %255 : vector<8x2xf32>
    %cst_94 = arith.constant 2.000000e-01 : f32
    %257 = vector.broadcast %cst_94 : f32 to vector<8x2xf32>
    %258 = arith.mulf %256, %257 : vector<8x2xf32>
    %c0_95 = arith.constant 0 : index
    %c0_96 = arith.constant 0 : index
    %259 = vector.load %arg27[%c0_95, %c0_96] : memref<8x2xf32, #tpu.memory_space<vmem>>, vector<8x2xf32>
    tpu.vector_store %arg27[%c0_95, %c0_96], %258 {strides = array<i32>} : memref<8x2xf32, #tpu.memory_space<vmem>>, vector<8x2xf32>,
    return
  }
}

</mosaic_0001>

<bundles_post_ra>
// kernel: tpu_custom_call.1
= control target key start
LH: loop header
LB: loop body
LE: loop exit
PB: predicated region body
PF: predicated region fallthrough
CT: control target
= control target key end

     0   :  { %s8702_s0 = inlined_call_operand.hbm [shape: f32[8,8,128], index: 0, kind: input, shape index: {}]   ;;  %s8703_s1 = inlined_call_operand.hbm [shape: f32[8,8], index: 1, kind: input, shape index: {}]   ;;  %s8704_s2 = inlined_call_operand.hbm [shape: f32[8,128], index: 2, kind: input, shape index: {}]   ;;  %s8705_s3 = inlined_call_operand.vmem [shape: bf16[128,384], index: 3, kind: input, shape index: {}]   ;;  %s8706_s4 = inlined_call_operand.hbm [shape: bf16[128,128], index: 4, kind: input, shape index: {}]   ;;  %s8707_s5 = inlined_call_operand.hbm [shape: f32[1,128], index: 5, kind: input, shape index: {}]   ;;  %s8708_s6 = inlined_call_operand.hbm [shape: f32[1,128], index: 6, kind: input, shape index: {}]   ;;  %s8709_s7 = inlined_call_operand.hbm [shape: bf16[128,256], index: 7, kind: input, shape index: {}]   ;;  %s8710_s8 = inlined_call_operand.hbm [shape: f32[1,256], index: 8, kind: input, shape index: {}]   ;;  %s8711_s9 = inlined_call_operand.hbm [shape: bf16[256,128], index: 9, kind: input, shape index: {}]   ;;  %s8712_s10 = inlined_call_operand.hbm [shape: f32[1,128], index: 10, kind: input, shape index: {}]   ;;  %s8713_s11 = inlined_call_operand.hbm [shape: f32[1,128], index: 11, kind: input, shape index: {}]   ;;  %s8714_s12 = inlined_call_operand.hbm [shape: f32[1,128], index: 12, kind: input, shape index: {}]   ;;  %s8715_s13 = inlined_call_operand.vmem [shape: f32[5,3], index: 13, kind: input, shape index: {}]   ;;  %s8716_s14 = inlined_call_operand.vmem [shape: bf16[128,1280], index: 14, kind: input, shape index: {}]   ;;  %s8717_s15 = inlined_call_operand.vmem [shape: f32[1,1280], index: 15, kind: input, shape index: {}]   ;;  %s8718_s16 = inlined_call_operand.vmem [shape: bf16[128,10], index: 16, kind: input, shape index: {}]   ;;  %s8719_s17 = inlined_call_operand.hbm [shape: f32[1,10], index: 17, kind: input, shape index: {}]   ;;  %s8720_s18 = inlined_call_operand.vmem [shape: bf16[5,128,2], index: 18, kind: input, shape index: {}]   ;;  %s8721_s19 = inlined_call_operand.vmem [shape: f32[5,1,2], index: 19, kind: input, shape index: {}]   ;;  %s8722_s20 = inlined_call_operand.hbm [shape: bf16[5,128,128], index: 20, kind: input, shape index: {}]   ;;  %s8723_s21 = inlined_call_operand.vmem [shape: f32[5,1,128], index: 21, kind: input, shape index: {}]   ;;  %s8724_s22 = inlined_call_operand.vmem [shape: bf16[5,128,2], index: 22, kind: input, shape index: {}]   ;;  %s8725_s23 = inlined_call_operand.vmem [shape: f32[5,1,2], index: 23, kind: input, shape index: {}]   ;;  %s8726_s24 = inlined_call_operand.vmem [shape: bf16[10,5], index: 24, kind: input, shape index: {}]   ;;  %s8727_s25 = inlined_call_operand.vmem [shape: bf16[128,5], index: 25, kind: input, shape index: {}]   ;;  %s8728_s26 = inlined_call_operand.hbm [shape: f32[1,5], index: 26, kind: input, shape index: {}]   ;;  %s8729_s27 = inlined_call_operand.vmem [shape: f32[8,2], index: 27, kind: output, shape index: {}]  }
   0x1   :  { %8735 = sst [smem:[#allocation33_spill]] %s8702_s0 }
   0x2   :  { %8736 = sst [smem:[#allocation34_spill]] %s8703_s1 }
   0x3   :  { %8737 = sst [smem:[#allocation35_spill]] %s8704_s2 }
   0x4   :  { %8738 = sst [smem:[#allocation36_spill]] %s8705_s3 }
   0x5   :  { %8739 = sst [smem:[#allocation37_spill]] %s8706_s4 }
   0x6   :  { %8740 = sst [smem:[#allocation38_spill]] %s8707_s5 }
   0x7   :  { %8741 = sst [smem:[#allocation39_spill]] %s8708_s6 }
   0x8   :  { %8742 = sst [smem:[#allocation40_spill]] %s8709_s7 }
   0x9   :  { %8743 = sst [smem:[#allocation41_spill]] %s8710_s8 }
   0xa   :  { %8744 = sst [smem:[#allocation42_spill]] %s8711_s9 }
   0xb   :  { %8745 = sst [smem:[#allocation43_spill]] %s8712_s10 }
   0xc   :  { %8746 = sst [smem:[#allocation44_spill]] %s8713_s11 }
   0xd   :  { %32 = vsyncpa [#allocation3], 0 }
   0xe   :  { %33 = vsyncpa [#allocation5], 0 }
   0xf   :  { %34 = vsyncpa [#allocation8], 0 }
  0x10   :  { %35 = vsyncpa [#allocation11], 0 }
  0x11   :  { %36 = vsyncpa [#allocation14], 0 }
  0x12   :  { %37 = vsyncpa [#allocation17], 0 }
  0x13   :  { %38 = vsyncpa [#allocation20], 0 }
  0x14   :  { %39 = vsyncpa [#allocation23], 0  ;;  %s7199_s7 = smov [#allocation4]   ;;  %s7200_s8 = smov [#allocation7]  }
  0x15   :  { %s58_s4 = sshll.u32 %s7199_s7, 4  ;;  %s79_s30 = sshll.u32 %s7200_s8, 4  ;;  %s59_s4 = int_to_ptr.vmem [resolvable:$true] %s58_s4  ;;  %s80_s30 = int_to_ptr.vmem [resolvable:$true] %s79_s30 }
  0x16   :  { %s6891_s9 = scalar_lea.vmem %s59_s4, 128  ;;  %p6896_p1 = scmp.lt.s32.totalorder %s59_s4, %s59_s4 }
  0x17   :  { %p6892_p0 = scmp.ne.s32.totalorder %s59_s4, %s6891_s9  ;;  %p6897_p2 = scmp.lt.s32.totalorder %s6891_s9, %s6891_s9 }
  0x19   :  { %p6898_p3 = por %p6897_p2, %p6896_p1 }
  0x1b   :  { %p6899_p4 = pnand %p6898_p3, %p6892_p0 }
  0x1d   :  { %6902 = shalt.err (!%p6899_p4)
}
  0x1e   :  { %s8747_s0 = sld [smem:[#allocation34_spill]]  ;;  %s6911_s10 = scalar_lea.vmem %s80_s30, 1024 }
  0x1f   :  { %p6912_p5 = scmp.ne.s32.totalorder %s80_s30, %s6911_s10  ;;  %p6916_p6 = scmp.lt.s32.totalorder %s80_s30, %s80_s30 }
  0x20   :  { %p6917_p7 = scmp.lt.s32.totalorder %s6911_s10, %s6911_s10 }
  0x22   :  { %p6918_p8 = por %p6917_p7, %p6916_p6 }
  0x24   :  { %61 = dma.hbm_to_vmem [thread:$0]  %s8747_s0, 128, %s59_s4, [#allocation5]  }
  0x25   :  { %p6919_p9 = pnand %p6918_p8, %p6912_p5 }
  0x27   :  { %6922 = shalt.err (!%p6919_p9)
}
  0x28   :  { %s8731_s29 = smov 64   ;;  %s8733_s1 = smov 4  }
  0x29   :  { %s8748_s2 = sld [smem:[#allocation37_spill]]  ;;  %s7203_s3 = smov [#allocation10]  }
  0x2a   :  { %s102_s7 = sshll.u32 %s7203_s3, 4  ;;  %s7204_s8 = smov [#allocation13]   ;;  %s103_s7 = int_to_ptr.vmem [resolvable:$true] %s102_s7 }
  0x2b   :  { %s124_s4 = sshll.u32 %s7204_s8, 4  ;;  %s6931_s9 = scalar_lea.vmem %s103_s7, 16  ;;  %s125_s4 = int_to_ptr.vmem [resolvable:$true] %s124_s4 }
  0x2c   :  { %p6932_p10 = scmp.ne.s32.totalorder %s103_s7, %s6931_s9  ;;  %s6935_s5 = scalar_lea.vmem %s103_s7, 32 }
  0x2d   :  { %p6936_p11 = scmp.lt.s32.totalorder %s103_s7, %s103_s7  ;;  %p6937_p12 = scmp.lt.s32.totalorder %s6935_s5, %s6931_s9 }
  0x2f   :  { %85 = dma.hbm_to_vmem [thread:$0]  %s8748_s2, 1024, %s80_s30, [#allocation8], %s8731_s29, %s8731_s29, %s8733_s1  }
  0x30   :  { %p6938_p13 = por %p6937_p12, %p6936_p11 }
  0x32   :  { %p6939_p0 = pnand %p6938_p13, %p6932_p10 }
  0x34   :  { %6942 = shalt.err (!%p6939_p0)
}
  0x35   :  { %s8749_s10 = sld [smem:[#allocation39_spill]]  ;;  %s6951_s6 = scalar_lea.vmem %s125_s4, 32 }
  0x36   :  { %p6952_p1 = scmp.ne.s32.totalorder %s125_s4, %s6951_s6  ;;  %p6956_p2 = scmp.lt.s32.totalorder %s125_s4, %s125_s4 }
  0x37   :  { %p6957_p3 = scmp.lt.s32.totalorder %s6951_s6, %s6951_s6 }
  0x39   :  { %p6958_p4 = por %p6957_p3, %p6956_p2 }
  0x3b   :  { %105 = dma.hbm_to_vmem [thread:$0]  %s8749_s10, 16, %s103_s7, [#allocation11]  }
  0x3c   :  { %p6959_p5 = pnand %p6958_p4, %p6952_p1 }
  0x3e   :  { %6962 = shalt.err (!%p6959_p5)
}
  0x3f   :  { %s8750_s2 = sld [smem:[#allocation41_spill]]  ;;  %s7205_s3 = smov [#allocation16]  }
  0x40   :  { %s146_s8 = sshll.u32 %s7205_s3, 4  ;;  %s7206_s9 = smov [#allocation19]   ;;  %s147_s8 = int_to_ptr.vmem [resolvable:$true] %s146_s8 }
  0x41   :  { %s166_s5 = sshll.u32 %s7206_s9, 4  ;;  %s6971_s29 = scalar_lea.vmem %s147_s8, 16  ;;  %s167_s5 = int_to_ptr.vmem [resolvable:$true] %s166_s5 }
  0x42   :  { %p6972_p6 = scmp.ne.s32.totalorder %s147_s8, %s6971_s29  ;;  %s6975_s7 = scalar_lea.vmem %s147_s8, 32 }
  0x43   :  { %p6976_p7 = scmp.lt.s32.totalorder %s147_s8, %s147_s8  ;;  %p6977_p8 = scmp.lt.s32.totalorder %s6975_s7, %s6971_s29 }
  0x45   :  { %127 = dma.hbm_to_vmem [thread:$0]  %s8750_s2, 32, %s125_s4, [#allocation14]  }
  0x46   :  { %p6978_p9 = por %p6977_p8, %p6976_p7 }
  0x48   :  { %p6979_p10 = pnand %p6978_p9, %p6972_p6 }
  0x4a   :  { %6982 = shalt.err (!%p6979_p10)
}
  0x4b   :  { %s8751_s10 = sld [smem:[#allocation43_spill]]  ;;  %s6991_s6 = scalar_lea.vmem %s167_s5, 16 }
  0x4c   :  { %p6992_p11 = scmp.ne.s32.totalorder %s167_s5, %s6991_s6  ;;  %s6995_s4 = scalar_lea.vmem %s167_s5, 32 }
  0x4d   :  { %p6996_p12 = scmp.lt.s32.totalorder %s167_s5, %s167_s5  ;;  %p6997_p13 = scmp.lt.s32.totalorder %s6995_s4, %s6991_s6 }
  0x4f   :  { %p6998_p0 = por %p6997_p13, %p6996_p12 }
  0x51   :  { %149 = dma.hbm_to_vmem [thread:$0]  %s8751_s10, 16, %s147_s8, [#allocation17]  }
  0x52   :  { %p6999_p1 = pnand %p6998_p0, %p6992_p11 }
  0x54   :  { %7002 = shalt.err (!%p6999_p1)
}
  0x55   :  { %169 = dma.hbm_to_vmem [thread:$0]  %s8714_s12, 16, %s167_s5, [#allocation20]  }
  0x56   :  { %s7207_s29 = smov [#allocation22]   ;;  %s7208_s3 = smov [#allocation2]  }
  0x57   :  { %s197_s2 = sshll.u32 %s7207_s29, 4  ;;  %s45_s9 = sshll.u32 %s7208_s3, 4  ;;  %s198_s2 = int_to_ptr.vmem [resolvable:$true] %s197_s2  ;;  %s46_s9 = int_to_ptr.vmem [resolvable:$true] %s45_s9 }
  0x58   :  { %s7011_s7 = scalar_lea.vmem %s198_s2, 5120  ;;  %p7016_p3 = scmp.lt.s32.totalorder %s198_s2, %s198_s2 }
  0x59   :  { %p7012_p2 = scmp.ne.s32.totalorder %s198_s2, %s7011_s7  ;;  %p7017_p4 = scmp.lt.s32.totalorder %s7011_s7, %s7011_s7 }
  0x5b   :  { %p7018_p5 = por %p7017_p4, %p7016_p3 }
  0x5d   :  { %p7019_p6 = pnand %p7018_p5, %p7012_p2 }
  0x5f   :  { %7022 = shalt.err (!%p7019_p6)
}
  0x60   :  { %s8752_s8 = smov 64   ;;  %s7031_s12 = scalar_lea.vmem %s46_s9, 1024 }
  0x61   :  { %203 = dma.hbm_to_vmem [thread:$0]  %s8722_s20, 5120, %s198_s2, [#allocation23], %s8752_s8, %s8752_s8, %s8733_s1  }
  0x62   :  { %p7032_p7 = scmp.ne.s32.totalorder %s46_s9, %s7031_s12  ;;  %p7036_p8 = scmp.lt.s32.totalorder %s46_s9, %s46_s9 }
  0x63   :  { %p7037_p9 = scmp.lt.s32.totalorder %s7031_s12, %s7031_s12 }
  0x65   :  { %p7038_p10 = por %p7037_p9, %p7036_p8 }
  0x67   :  { %p7039_p11 = pnand %p7038_p10, %p7032_p7 }
  0x69   :  { %7042 = shalt.err (!%p7039_p11)
}
  0x6a   :  { %s7209_s5 = smov 128   ;;  %s7210_s10 = smov 8  }
  0x6b   :  { %s8753_s30 = sld [smem:[#allocation33_spill]]  ;;  %s7211_s11 = smov [#allocation6]  }
  0x6c   :  { %s68_s29 = sshll.u32 %s7211_s11, 4  ;;  %s7212_s3 = smov [#allocation9]   ;;  %s69_s29 = int_to_ptr.vmem [resolvable:$true] %s68_s29 }
  0x6d   :  { %s92_s20 = sshll.u32 %s7212_s3, 4  ;;  %s7051_s2 = scalar_lea.vmem %s69_s29, 128  ;;  %s93_s20 = int_to_ptr.vmem [resolvable:$true] %s92_s20 }
  0x6e   :  { %p7052_p12 = scmp.ne.s32.totalorder %s69_s29, %s7051_s2  ;;  %p7056_p13 = scmp.lt.s32.totalorder %s69_s29, %s69_s29 }
  0x6f   :  { %p7057_p0 = scmp.lt.s32.totalorder %s7051_s2, %s7051_s2 }
  0x71   :  { %51 = dma.hbm_to_vmem [thread:$0]  %s8753_s30, 1024, %s46_s9, [#allocation3], %s7209_s5, %s7209_s5, %s7210_s10  }
  0x72   :  { %p7058_p1 = por %p7057_p0, %p7056_p13 }
  0x74   :  { %p7059_p2 = pnand %p7058_p1, %p7052_p12 }
  0x76   :  { %7062 = shalt.err (!%p7059_p2)
}
  0x77   :  { %s8754_s0 = sld [smem:[#allocation35_spill]]  ;;  %s7071_s12 = scalar_lea.vmem %s93_s20, 16 }
  0x78   :  { %p7072_p3 = scmp.ne.s32.totalorder %s93_s20, %s7071_s12  ;;  %s7075_s9 = scalar_lea.vmem %s93_s20, 32 }
  0x79   :  { %p7076_p4 = scmp.lt.s32.totalorder %s93_s20, %s93_s20  ;;  %p7077_p5 = scmp.lt.s32.totalorder %s7075_s9, %s7071_s12 }
  0x7b   :  { %p7078_p6 = por %p7077_p5, %p7076_p4 }
  0x7d   :  { %71 = dma.hbm_to_vmem [thread:$0]  %s8754_s0, 128, %s69_s29, [#allocation5]  }
  0x7e   :  { %p7079_p7 = pnand %p7078_p6, %p7072_p3 }
  0x80   :  { %7082 = shalt.err (!%p7079_p7)
}
  0x81   :  { %s8755_s30 = sld [smem:[#allocation38_spill]]  ;;  %s7213_s11 = smov [#allocation12]  }
  0x82   :  { %s111_s3 = sshll.u32 %s7213_s11, 4  ;;  %s7214_s2 = smov [#allocation15]   ;;  %s112_s3 = int_to_ptr.vmem [resolvable:$true] %s111_s3 }
  0x83   :  { %s133_s1 = sshll.u32 %s7214_s2, 4  ;;  %s7091_s7 = scalar_lea.vmem %s112_s3, 2048  ;;  %s134_s1 = int_to_ptr.vmem [resolvable:$true] %s133_s1 }
  0x84   :  { %p7092_p8 = scmp.ne.s32.totalorder %s112_s3, %s7091_s7  ;;  %p7096_p9 = scmp.lt.s32.totalorder %s112_s3, %s112_s3 }
  0x85   :  { %p7097_p10 = scmp.lt.s32.totalorder %s7091_s7, %s7091_s7 }
  0x87   :  { %95 = dma.hbm_to_vmem [thread:$0]  %s8755_s30, 16, %s93_s20, [#allocation8]  }
  0x88   :  { %p7098_p11 = por %p7097_p10, %p7096_p9 }
  0x8a   :  { %p7099_p12 = pnand %p7098_p11, %p7092_p8 }
  0x8c   :  { %7102 = shalt.err (!%p7099_p12)
}
  0x8d   :  { %s8756_s0 = sld [smem:[#allocation40_spill]]  ;;  %s7111_s20 = scalar_lea.vmem %s134_s1, 2048 }
  0x8e   :  { %p7112_p13 = scmp.ne.s32.totalorder %s134_s1, %s7111_s20  ;;  %p7116_p0 = scmp.lt.s32.totalorder %s134_s1, %s134_s1 }
  0x8f   :  { %p7117_p1 = scmp.lt.s32.totalorder %s7111_s20, %s7111_s20 }
  0x91   :  { %p7118_p2 = por %p7117_p1, %p7116_p0 }
  0x93   :  { %117 = dma.hbm_to_vmem [thread:$0]  %s8756_s0, 2048, %s112_s3, [#allocation11], %s7209_s5, %s7209_s5, %s7210_s10  }
  0x94   :  { %p7119_p3 = pnand %p7118_p2, %p7112_p13 }
  0x96   :  { %7122 = shalt.err (!%p7119_p3)
}
  0x97   :  { %s8757_s12 = smov 4   ;;  %s8758_s4 = sld [smem:[#allocation42_spill]] }
  0x98   :  { %s7215_s30 = smov [#allocation18]   ;;  %s7216_s2 = smov [#allocation21]  }
  0x99   :  { %s156_s11 = sshll.u32 %s7215_s30, 4  ;;  %s184_s7 = sshll.u32 %s7216_s2, 4  ;;  %s157_s11 = int_to_ptr.vmem [resolvable:$true] %s156_s11  ;;  %s185_s7 = int_to_ptr.vmem [resolvable:$true] %s184_s7 }
  0x9a   :  { %s7131_s5 = scalar_lea.vmem %s157_s11, 16  ;;  %s7135_s3 = scalar_lea.vmem %s157_s11, 32 }
  0x9b   :  { %p7132_p4 = scmp.ne.s32.totalorder %s157_s11, %s7131_s5  ;;  %p7136_p5 = scmp.lt.s32.totalorder %s157_s11, %s157_s11 }
  0x9c   :  { %p7137_p6 = scmp.lt.s32.totalorder %s7135_s3, %s7131_s5 }
  0x9d   :  { %139 = dma.hbm_to_vmem [thread:$0]  %s8758_s4, 2048, %s134_s1, [#allocation14], %s8752_s8, %s8752_s8, %s8757_s12  }
  0x9e   :  { %p7138_p7 = por %p7137_p6, %p7136_p5 }
  0xa0   :  { %p7139_p8 = pnand %p7138_p7, %p7132_p4 }
  0xa2   :  { %7142 = shalt.err (!%p7139_p8)
}
  0xa3   :  { %s8759_s0 = sld [smem:[#allocation44_spill]]  ;;  %s7151_s20 = scalar_lea.vmem %s185_s7, 16 }
  0xa4   :  { %p7152_p9 = scmp.ne.s32.totalorder %s185_s7, %s7151_s20  ;;  %s7155_s1 = scalar_lea.vmem %s185_s7, 32 }
  0xa5   :  { %p7156_p10 = scmp.lt.s32.totalorder %s185_s7, %s185_s7  ;;  %p7157_p11 = scmp.lt.s32.totalorder %s7155_s1, %s7151_s20 }
  0xa7   :  { %p7158_p12 = por %p7157_p11, %p7156_p10 }
  0xa9   :  { %159 = dma.hbm_to_vmem [thread:$0]  %s8759_s0, 16, %s157_s11, [#allocation17]  }
  0xaa   :  { %p7159_p13 = pnand %p7158_p12, %p7152_p9 }
  0xac   :  { %7162 = shalt.err (!%p7159_p13)
}
  0xad   :  { %187 = dma.hbm_to_vmem [thread:$0]  %s8719_s17, 16, %s185_s7, [#allocation20]  }
  0xae   :  { %s7217_s6 = smov [#allocation24]  }
  0xaf   :  { %s220_s4 = sshll.u32 %s7217_s6, 4  ;;  %s221_s4 = int_to_ptr.vmem [resolvable:$true] %s220_s4 }
  0xb0   :  { %s7171_s30 = scalar_lea.vmem %s221_s4, 16  ;;  %s7175_s2 = scalar_lea.vmem %s221_s4, 32 }
  0xb1   :  { %p7172_p0 = scmp.ne.s32.totalorder %s221_s4, %s7171_s30  ;;  %p7176_p1 = scmp.lt.s32.totalorder %s221_s4, %s221_s4 }
  0xb2   :  { %p7177_p2 = scmp.lt.s32.totalorder %s7175_s2, %s7171_s30 }
  0xb4   :  { %p7178_p3 = por %p7177_p2, %p7176_p1 }
  0xb6   :  { %p7179_p4 = pnand %p7178_p3, %p7172_p0 }
  0xb8   :  { %7182 = shalt.err (!%p7179_p4)
}
  0xb9   :  { %223 = dma.hbm_to_vmem [thread:$0]  %s8728_s26, 16, %s221_s4, [#allocation23]  }
  0xba   :  { %7183 = dma.done.wait [#allocation3], 1024  }
  0xbb   :  { %7184 = vsyncadd [#allocation3], 4294966272 }
  0xbc   :  { %7185 = dma.done.wait [#allocation5], 256  }
  0xbd   :  { %7186 = vsyncadd [#allocation5], 4294967040 }
  0xbe   :  { %7187 = dma.done.wait [#allocation8], 1040  }
  0xbf   :  { %7188 = vsyncadd [#allocation8], 4294966256 }
  0xc0   :  { %7189 = dma.done.wait [#allocation11], 2064  }
  0xc1   :  { %7190 = vsyncadd [#allocation11], 4294965232 }
  0xc2   :  { %7191 = dma.done.wait [#allocation14], 2080  }
  0xc3   :  { %7192 = vsyncadd [#allocation14], 4294965216 }
  0xc4   :  { %7193 = dma.done.wait [#allocation17], 32  }
  0xc5   :  { %7194 = vsyncadd [#allocation17], 4294967264 }
  0xc6   :  { %7195 = dma.done.wait [#allocation20], 32  }
  0xc7   :  { %7196 = vsyncadd [#allocation20], 4294967264 }
  0xc8   :  { %7197 = dma.done.wait [#allocation23], 5136  }
  0xc9   :  { %7198 = vsyncadd [#allocation23], 4294962160  ;;  %v7218_v0 = vmov 0   ;;  %s8760_s7 = sld [smem:[#allocation36_spill]]  ;;  %v270_v8 = vld [vmem:[#allocation2] sm:$0xff]  ;;  %v271_v10 = vld [vmem:[#allocation2 + $0x8] sm:$0xff] }
  0xca   :  { %474 = vmatprep.mubr.bf16.mxu0 %v7218_v0  ;;  %6450 = vset.pattern.permute.xlu0 %v7218_v0  ;;  %v310_v12 = vpack.c.bf16 %v271_v10, %v270_v8  ;;  %v272_v27 = vld [vmem:[#allocation2 + $0x10] sm:$0xff]  ;;  %v273_v28 = vld [vmem:[#allocation2 + $0x18] sm:$0xff]  ;;  %v274_v31 = vld [vmem:[#allocation2 + $0x20] sm:$0xff]  ;;  %v7219_v37 = vmov 0.0   ;;  %vm7220_vm0 = vmmov 0   ;;  %vm1163_vm1 = vcmask 1043456  }
  0xcb   :  { %v311_v30 = vpack.c.bf16 %v273_v28, %v272_v27  ;;  %v275_v32 = vld [vmem:[#allocation2 + $0x28] sm:$0xff]  ;;  %v276_v34 = vld [vmem:[#allocation2 + $0x30] sm:$0xff]  ;;  %v277_v35 = vld [vmem:[#allocation2 + $0x38] sm:$0xff]  ;;  %v7221_v28 = vmov 1966171168   ;;  %vm1055_vm2 = vcmask 64512  }
  0xcc   :  { %5943 = vmatprep.mubr.bf16.mxu1 %v310_v12  ;;  %v312_v33 = vpack.c.bf16 %v275_v32, %v274_v31  ;;  %v313_v36 = vpack.c.bf16 %v277_v35, %v276_v34  ;;  %v924_v34 = vld [vmem:[#allocation4] sm:$0xff]  ;;  %vm2358_vm3 = vcmask 20480   ;;  %vm2570_vm4 = vcmask 1041409   ;;  %s7225_s17 = smov 126   ;;  %s7228_s28 = smov 2  }
  0xcd   :  { %vm2573_vm5 = vcmask 1042434   ;;  %vm2576_vm6 = vcmask 1043459   ;;  %vm2579_vm7 = vcmask 1044484   ;;  %vm2582_vm8 = vcmask 1045509  }
  0xce   :  { %vm2585_vm9 = vcmask 1046534   ;;  %vm2588_vm10 = vcmask 1047559   ;;  %vm5260_vm11 = vcmask 1044480   ;;  %vm5137_vm12 = vcmask 15360  }
  0xcf   :  { %v6469_v1 = vld [vmem:[%s8760_s7 + $0xac] ss:$12 sps:$4 sm:$0xff]   ;;  %v6471_v2 = vld [vmem:[%s8760_s7 + $0xa8] ss:$12 sps:$4 sm:$0xff]   ;;  %v6474_v4 = vld [vmem:[%s8760_s7 + $0x90] ss:$12 sps:$4 sm:$0xff]  }
  0xd0   :  { %442 = vmatprep.subr.bf16.mxu0 %v6469_v1  ;;  %v6472_v3 = vld [vmem:[%s8760_s7 + $0x94] ss:$12 sps:$4 sm:$0xff]   ;;  %v6475_v5 = vld [vmem:[%s8760_s7 + $0x7c] ss:$12 sps:$4 sm:$0xff]   ;;  %v6477_v6 = vld [vmem:[%s8760_s7 + $0x78] ss:$12 sps:$4 sm:$0xff]  }
  0xd1   :  { %443 = vmatpush1.bf16.msra.mxu0 %v6471_v2  ;;  %v6478_v7 = vld [vmem:[%s8760_s7 + $0x64] ss:$12 sps:$4 sm:$0xff]   ;;  %v6480_v9 = vld [vmem:[%s8760_s7 + $0x60] ss:$12 sps:$4 sm:$0xff]   ;;  %v6483_v13 = vld [vmem:[%s8760_s7 + $0x48] ss:$12 sps:$4 sm:$0xff]  }
  0xd2   :  { %444 = vmatprep.subr.bf16.mxu0 %v6472_v3  ;;  %v6481_v11 = vld [vmem:[%s8760_s7 + $0x4c] ss:$12 sps:$4 sm:$0xff]   ;;  %v6493_v14 = vld [vmem:[%s8760_s7 + $0xb0] ss:$12 sps:$4 sm:$0xff]   ;;  %v6484_v16 = vld [vmem:[%s8760_s7 + $0x34] ss:$12 sps:$4 sm:$0xff]  }
  0xd3   :  { %v6494_v15 = vld [vmem:[%s8760_s7 + $0x98] ss:$12 sps:$4 sm:$0xff]   ;;  %5927 = vmatprep.subr.bf16.mxu1 %v6493_v14  ;;  %v6495_v17 = vld [vmem:[%s8760_s7 + $0x80] ss:$12 sps:$4 sm:$0xff]   ;;  %v6486_v18 = vld [vmem:[%s8760_s7 + $0x30] ss:$12 sps:$4 sm:$0xff]  }
  0xd4   :  { %5928 = vmatpush3.bf16.msra.mxu1 %v6493_v14  ;;  %v6487_v19 = vld [vmem:[%s8760_s7 + $0x1c] ss:$12 sps:$4 sm:$0xff]   ;;  %v6489_v20 = vld [vmem:[%s8760_s7 + $0x18] ss:$12 sps:$4 sm:$0xff]   ;;  %v6492_v24 = vld [vmem:[%s8760_s7] ss:$12 sps:$4 sm:$0xff]  }
  0xd5   :  { %445 = vmatpush1.bf16.msra.mxu0 %v6474_v4  ;;  %5929 = vmatprep.subr.bf16.mxu1 %v6494_v15  ;;  %v6496_v21 = vld [vmem:[%s8760_s7 + $0x68] ss:$12 sps:$4 sm:$0xff]   ;;  %v6490_v22 = vld [vmem:[%s8760_s7 + $0x4] ss:$12 sps:$4 sm:$0xff]   ;;  %v6499_v26 = vld [vmem:[%s8760_s7 + $0x20] ss:$12 sps:$4 sm:$0xff]  }
  0xd6   :  { %446 = vmatprep.subr.bf16.mxu0 %v6475_v5  ;;  %v6497_v23 = vld [vmem:[%s8760_s7 + $0x50] ss:$12 sps:$4 sm:$0xff]   ;;  %v6498_v25 = vld [vmem:[%s8760_s7 + $0x38] ss:$12 sps:$4 sm:$0xff]   ;;  %v6500_v29 = vld [vmem:[%s8760_s7 + $0x8] ss:$12 sps:$4 sm:$0xff]  }
  0xd7   :  { %s7224_s7 = smov 122   ;;  %vm5139_vm13 = vcmask 31744   ;;  %vm5141_vm14 = vcmask 48128   ;;  %vm5256_vm15 = vcmask 80896  }
  0xd8   :  { %5930 = vmatpush3.bf16.msra.mxu1 %v6494_v15 }
  0xd9   :  { %447 = vmatpush1.bf16.msra.mxu0 %v6477_v6  ;;  %5931 = vmatprep.subr.bf16.mxu1 %v6495_v17 }
  0xda   :  { %448 = vmatprep.subr.bf16.mxu0 %v6478_v7 }
  0xdc   :  { %5932 = vmatpush3.bf16.msra.mxu1 %v6495_v17 }
  0xdd   :  { %449 = vmatpush1.bf16.msra.mxu0 %v6480_v9  ;;  %5933 = vmatprep.subr.bf16.mxu1 %v6496_v21 }
  0xde   :  { %450 = vmatprep.subr.bf16.mxu0 %v6481_v11 }
  0xe0   :  { %5934 = vmatpush3.bf16.msra.mxu1 %v6496_v21 }
  0xe1   :  { %451 = vmatpush1.bf16.msra.mxu0 %v6483_v13  ;;  %5935 = vmatprep.subr.bf16.mxu1 %v6497_v23 }
  0xe2   :  { %452 = vmatprep.subr.bf16.mxu0 %v6484_v16 }
  0xe4   :  { %5936 = vmatpush3.bf16.msra.mxu1 %v6497_v23 }
  0xe5   :  { %453 = vmatpush1.bf16.msra.mxu0 %v6486_v18  ;;  %5937 = vmatprep.subr.bf16.mxu1 %v6498_v25 }
  0xe6   :  { %454 = vmatprep.subr.bf16.mxu0 %v6487_v19 }
  0xe8   :  { %5938 = vmatpush3.bf16.msra.mxu1 %v6498_v25 }
  0xe9   :  { %455 = vmatpush1.bf16.msra.mxu0 %v6489_v20  ;;  %5939 = vmatprep.subr.bf16.mxu1 %v6499_v26 }
  0xea   :  { %456 = vmatprep.subr.bf16.mxu0 %v6490_v22 }
  0xec   :  { %5940 = vmatpush3.bf16.msra.mxu1 %v6499_v26 }
  0xed   :  { %457 = vmatpush1.bf16.msra.mxu0 %v6492_v24  ;;  %5941 = vmatprep.subr.bf16.mxu1 %v6500_v29 }
  0xee   :  { %5975 = vmatprep.subr.bf16.mxu0 %v7219_v37 }
  0xf0   :  { %475 = vmatmul.mubr.bf16.vlgmr.msra.gmra.mxu0 %v310_v12  ;;  %5942 = vmatpush3.bf16.msra.mxu1 %v6500_v29  ;;  %v928_v29 = vunpack.c.l.s4 %v7221_v28 }
  0xf1   :  { %484 = vmatprep.mubr.bf16.mxu0 %v7218_v0  ;;  %5951 = vmatprep.subr.bf16.mxu1 %v7219_v37 }
  0xf2   :  { %v929_v31 = vunpack.c.0.s8 %v928_v29 }
  0xf3   :  { %5944 = vmatmul.mubr.bf16.vlgmr.msra.gmra.mxu1 %v311_v30 }
  0xf4   :  { %5947 = vmatprep.mubr.bf16.mxu1 %v312_v33 }
  0xf8   :  { %485 = vmatmul.mubr.bf16.gmra.mxu0 %v311_v30  ;;  %v930_v30 = vlaneseq }
  0xf9   :  { %494 = vmatprep.mubr.bf16.mxu0 %v7218_v0 }
  0xfa   :  { %v7558_v32 = vshrl.u32 %v930_v30, 7 }
  0xfb   :  { %5948 = vmatmul.mubr.bf16.gmra.mxu1 %v313_v36 }
  0xfc   :  { %5953 = vmatprep.mubr.msk.bf16.mxu1 %vm7220_vm0, %v7219_v37 }
 0x100   :  { %495 = vmatmul.mubr.bf16.gmra.mxu0 %v312_v33  ;;  %v7561_v33 = vsub.s32 %v929_v31, %v7558_v32 }
 0x101   :  { %504 = vmatprep.mubr.bf16.mxu0 %v7218_v0 }
 0x102   :  { %v933_v35 = vrot.slane %v924_v34, %v7561_v33 }
 0x108   :  { %505 = vmatmul.mubr.bf16.gmra.mxu0 %v313_v36  ;;  %v949_v36 = vrot.slane %v933_v35, %v7561_v33 }
 0x109   :  { %5977 = vmatprep.mubr.msk.bf16.mxu0 %vm7220_vm0, %v7219_v37 }
 0x1b0   :  { %v476_v38 = vpop.f32.mrf.mxu0 }
 0x1b1   :  { %v580_v44 = vpack.c.bf16 %v476_v38, %v476_v38  ;;  %v5380_v38 = vadd.f32 -1.0, %v949_v36 }
 0x1b2   :  { %v478_v39 = vpop.f32.mrf.mxu0 }
 0x1b3   :  { %v588_v40 = vpack.c.bf16 %v478_v39, %v478_v39  ;;  %v5945_v49 = vpop.f32.mrf.mxu1  ;;  %v941_v39 = vcombine.high %v933_v35, %v933_v35 }
 0x1b4   :  { %v480_v41 = vpop.f32.mrf.mxu0  ;;  %v1154_v50 = vpack.c.bf16 %v5945_v49, %v5945_v49 }
 0x1b5   :  { %5952 = vmatpush3.bf16.xpose.msra.mxu1 %v588_v40  ;;  %v549_v52 = vpop.f32.mrf.mxu1  ;;  %v581_v54 = vpack.c.bf16 %v480_v41, %v480_v41  ;;  %v926_v40 = vcombine.high %v924_v34, %v924_v34  ;;  %v991_v41 = vmul.f32 1e+09, %v5380_v38 }
 0x1b6   :  { %v482_v42 = vpop.f32.mrf.mxu0  ;;  %5957 = vmatprep.subr.bf16.mxu1 %v7219_v37  ;;  %v7520_v53 = vsel %vm1163_vm1, %v1154_v50, 0  ;;  %v1152_v16 = vpack.c.bf16 %v549_v52, %v549_v52 }
 0x1b7   :  { %v589_v46 = vpack.c.bf16 %v482_v42, %v482_v42  ;;  %v5946_v56 = vpop.f32.mrf.mxu1  ;;  %v7566_v42 = vsub.s32 0, %v7558_v32 }
 0x1b8   :  { %v486_v43 = vpop.f32.mrf.mxu0  ;;  %v1155_v59 = vpack.c.bf16 %v5946_v56, %v5946_v56  ;;  %v1165_v20 = vsel %vm1163_vm1, %v1152_v16, 0 }
 0x1b9   :  { %v552_v61 = vpop.f32.mrf.mxu1  ;;  %v582_v8 = vpack.c.bf16 %v486_v43, %v486_v43  ;;  %v963_v43 = vrot.slane %v941_v39, %v7561_v33 }
 0x1ba   :  { %v488_v45 = vpop.f32.mrf.mxu0  ;;  %v7523_v62 = vsel %vm1163_vm1, %v1155_v59, 0  ;;  %v1153_v25 = vpack.c.bf16 %v552_v61, %v552_v61 }
 0x1bb   :  { %v590_v57 = vpack.c.bf16 %v488_v45, %v488_v45  ;;  %v5949_v1 = vpop.f32.mrf.mxu1  ;;  %v1010_v45 = vrot.slane %v991_v41, %v7566_v42 }
 0x1bc   :  { %v490_v47 = vpop.f32.mrf.mxu0  ;;  %5954 = vmatmul.mubr.bf16.vlgmr.msra.gmra.mxu1 %v580_v44  ;;  %v1158_v2 = vpack.c.bf16 %v5949_v1, %v5949_v1  ;;  %v1211_v27 = vsel %vm1163_vm1, %v1153_v25, 0 }
 0x1bd   :  { %5958 = vmatpush3.bf16.xpose.msra.mxu1 %v589_v46  ;;  %5959 = vmatprep.mubr.msk.bf16.mxu1 %vm7220_vm0, %v7219_v37  ;;  %v565_v5 = vpop.f32.mrf.mxu1  ;;  %v583_v18 = vpack.c.bf16 %v490_v47, %v490_v47  ;;  %v5381_v46 = vadd.f32 -1.0, %v963_v43  ;;  %v940_v47 = vrot.slane %v926_v40, %v7561_v33 }
 0x1be   :  { %v492_v48 = vpop.f32.mrf.mxu0  ;;  %5963 = vmatprep.subr.bf16.mxu1 %v7219_v37  ;;  %v7530_v6 = vsel %vm1163_vm1, %v1158_v2, 0  ;;  %v1156_v7 = vpack.c.bf16 %v565_v5, %v565_v5 }
 0x1bf   :  { %v5950_v10 = vpop.f32.mrf.mxu1  ;;  %v591_v11 = vpack.c.bf16 %v492_v48, %v492_v48  ;;  %v992_v52 = vmul.f32 1e+09, %v5381_v46 }
 0x1c0   :  { %v496_v51 = vpop.f32.mrf.mxu0  ;;  %v7533_v13 = vsel %vm1163_vm1, %v1156_v7, 0  ;;  %v1159_v14 = vpack.c.bf16 %v5950_v10, %v5950_v10 }
 0x1c1   :  { %v584_v3 = vpack.c.bf16 %v496_v51, %v496_v51  ;;  %v7569_v44 = vpop.f32.mrf.mxu1  ;;  %v1014_v59 = vrot.slane %v992_v52, %v7566_v42 }
 0x1c2   :  { %v498_v55 = vpop.f32.mrf.mxu0  ;;  %v7536_v15 = vsel %vm1163_vm1, %v1159_v14, 0 }
 0x1c3   :  { %v592_v58 = vpack.c.bf16 %v498_v55, %v498_v55  ;;  %v956_v55 = vrot.slane %v940_v47, %v7561_v33 }
 0x1c4   :  { %v500_v60 = vpop.f32.mrf.mxu0  ;;  %5960 = vmatmul.mubr.bf16.vlgmr.msra.gmra.mxu1 %v581_v54  ;;  %v971_v54 = vcombine.high %v949_v36, %v949_v36 }
 0x1c5   :  { %5964 = vmatpush3.bf16.xpose.msra.mxu1 %v590_v57  ;;  %5976 = vmatpush3.bf16.xpose.msra.mxu0 %v592_v58  ;;  %v585_v23 = vpack.c.bf16 %v500_v60, %v500_v60  ;;  %v5384_v61 = vadd.f32 -1.0, %v956_v55 }
 0x1c6   :  { %v502_v63 = vpop.f32.mrf.mxu0  ;;  %5965 = vmatprep.mubr.msk.bf16.mxu1 %vm7220_vm0, %v7219_v37  ;;  %5969 = vmatprep.subr.bf16.mxu1 %v7219_v37  ;;  %v5382_v60 = vadd.f32 -1.0, %v971_v54 }
 0x1c7   :  { %5987 = vmatprep.subr.bf16.mxu0 %v7219_v37  ;;  %v593_v19 = vpack.c.bf16 %v502_v63, %v502_v63  ;;  %v995_v7 = vmul.f32 1e+09, %v5384_v61 }
 0x1c8   :  { %v506_v4 = vpop.f32.mrf.mxu0  ;;  %v993_v5 = vmul.f32 1e+09, %v5382_v60 }
 0x1c9   :  { %v586_v17 = vpack.c.bf16 %v506_v4, %v506_v4  ;;  %v1026_v16 = vrot.slane %v995_v7, %v7566_v42 }
 0x1ca   :  { %v508_v9 = vpop.f32.mrf.mxu0  ;;  %v1018_v14 = vrot.slane %v993_v5, %v7566_v42 }
 0x1cb   :  { %v594_v12 = vpack.c.bf16 %v508_v9, %v508_v9 }
 0x1cc   :  { %5966 = vmatmul.mubr.bf16.vlgmr.msra.gmra.mxu1 %v582_v8  ;;  %5978 = vmatmul.mubr.bf16.vlgmr.msra.gmra.mxu0 %v584_v3  ;;  %v510_v21 = vpop.f32.mrf.mxu0  ;;  %v973_v3 = vcombine.high %v963_v43, %v963_v43  ;;  %v972_v8 = vcombine.high %v956_v55, %v956_v55 }
 0x1cd   :  { %5970 = vmatpush3.bf16.xpose.msra.mxu1 %v591_v11  ;;  %5988 = vmatpush3.bf16.xpose.msra.mxu0 %v594_v12  ;;  %v587_v26 = vpack.c.bf16 %v510_v21, %v510_v21 }
 0x1ce   :  { %5971 = vmatprep.mubr.msk.bf16.mxu1 %vm7220_vm0, %v7219_v37  ;;  %5989 = vmatprep.mubr.msk.bf16.mxu0 %vm7220_vm0, %v7219_v37  ;;  %v512_v22 = vpop.f32.mrf.mxu0  ;;  %v5383_v12 = vadd.f32 -1.0, %v973_v3 }
 0x1cf   :  { %5981 = vmatprep.subr.bf16.mxu1 %v7219_v37  ;;  %5999 = vmatprep.subr.bf16.mxu0 %v7219_v37  ;;  %v595_v24 = vpack.c.bf16 %v512_v22, %v512_v22 }
 0x1d0   :  { %v994_v25 = vmul.f32 1e+09, %v5383_v12 }
 0x1d2   :  { %v1022_v39 = vrot.slane %v994_v25, %v7566_v42 }
 0x1d4   :  { %5972 = vmatmul.mubr.bf16.vlgmr.msra.gmra.mxu1 %v583_v18  ;;  %5990 = vmatmul.mubr.bf16.vlgmr.msra.gmra.mxu0 %v586_v17  ;;  %v5386_v17 = vadd.f32 -1.0, %v972_v8  ;;  %v942_v18 = vcombine.high %v940_v47, %v940_v47 }
 0x1d5   :  { %5982 = vmatpush3.bf16.xpose.msra.mxu1 %v593_v19  ;;  %5983 = vmatprep.mubr.msk.bf16.mxu1 %vm7220_vm0, %v7219_v37 }
 0x1d6   :  { %5993 = vmatprep.subr.bf16.mxu1 %v7219_v37  ;;  %6000 = vmatpush3.bf16.msra.mxu0 %v1165_v20  ;;  %v997_v28 = vmul.f32 1e+09, %v5386_v17  ;;  %v970_v29 = vrot.slane %v942_v18, %v7561_v33 }
 0x1d7   :  { %6001 = vmatprep.mubr.msk.bf16.mxu0 %vm7220_vm0, %v7219_v37  ;;  %6011 = vmatprep.subr.bf16.mxu0 %v7219_v37 }
 0x1d8   :  { %v1034_v40 = vrot.slane %v997_v28, %v7566_v42  ;;  %v5385_v41 = vadd.f32 -1.0, %v970_v29  ;;  %v974_v55 = vcombine.high %v970_v29, %v970_v29 }
 0x1da   :  { %v996_v54 = vmul.f32 1e+09, %v5385_v41 }
 0x1dc   :  { %5984 = vmatmul.mubr.bf16.vlgmr.msra.gmra.mxu1 %v585_v23 }
 0x1dd   :  { %5994 = vmatpush3.bf16.xpose.msra.mxu1 %v595_v24  ;;  %5995 = vmatprep.mubr.msk.bf16.mxu1 %vm7220_vm0, %v7219_v37 }
 0x1de   :  { %6005 = vmatprep.subr.bf16.mxu1 %v7219_v37 }
 0x1e4   :  { %5996 = vmatmul.mubr.bf16.vlgmr.msra.gmra.mxu1 %v587_v26 }
 0x1e5   :  { %6006 = vmatpush3.bf16.msra.mxu1 %v1211_v27  ;;  %6007 = vmatprep.mubr.msk.bf16.mxu1 %vm7220_vm0, %v7219_v37 }
 0x1e6   :  { %6017 = vmatprep.subr.bf16.mxu1 %v7219_v37 }
 0x27c   :  { %v630_v48 = vpop.f32.mrf.mxu1 }
 0x27d   :  { %v916_v49 = vmul.f32 0.088388346, %v630_v48 }
 0x27e   :  { %v5955_v50 = vpop.f32.mrf.mxu1 }
 0x27f   :  { %v7573_v51 = vadd.f32 %v1010_v45, %v916_v49 }
 0x280   :  { %v633_v56 = vpop.f32.mrf.mxu1 }
 0x281   :  { %v1056_v57 = vsel %vm1055_vm2, %v7573_v51, -inf }
 0x282   :  { %1057 = vmax.xlane.f32.xlu0 %v1056_v57  ;;  %v5956_v58 = vpop.f32.mrf.mxu1 }
 0x284   :  { %v670_v63 = vpop.f32.mrf.mxu1 }
 0x285   :  { %v917_v1 = vmul.f32 0.088388346, %v670_v63  ;;  %v1030_v63 = vrot.slane %v996_v54, %v7566_v42 }
 0x286   :  { %v5961_v2 = vpop.f32.mrf.mxu1 }
 0x287   :  { %v7579_v4 = vadd.f32 %v1014_v59, %v917_v1  ;;  %v5387_v1 = vadd.f32 -1.0, %v974_v55 }
 0x288   :  { %v673_v9 = vpop.f32.mrf.mxu1 }
 0x289   :  { %v1059_v10 = vsel %vm1055_vm2, %v7579_v4, -inf  ;;  %v998_v8 = vmul.f32 1e+09, %v5387_v1 }
 0x28a   :  { %1060 = vmax.xlane.f32.xlu0 %v1059_v10  ;;  %v5962_v11 = vpop.f32.mrf.mxu1 }
 0x28b   :  { %v1038_v12 = vrot.slane %v998_v8, %v7566_v42 }
 0x28c   :  { %v710_v19 = vpop.f32.mrf.mxu1  ;;  %v790_v20 = vpop.f32.mrf.mxu0 }
 0x28d   :  { %v918_v21 = vmul.f32 0.088388346, %v710_v19  ;;  %v920_v22 = vmul.f32 0.088388346, %v790_v20 }
 0x28e   :  { %v5967_v23 = vpop.f32.mrf.mxu1  ;;  %v5979_v24 = vpop.f32.mrf.mxu0 }
 0x28f   :  { %v7585_v26 = vadd.f32 %v1018_v14, %v918_v21  ;;  %v7587_v27 = vadd.f32 %v1026_v16, %v920_v22 }
 0x290   :  { %v713_v30 = vpop.f32.mrf.mxu1  ;;  %v793_v31 = vpop.f32.mrf.mxu0 }
 0x291   :  { %v1062_v34 = vsel %vm1055_vm2, %v7585_v26, -inf  ;;  %v1068_v35 = vsel %vm1055_vm2, %v7587_v27, -inf }
 0x292   :  { %1063 = vmax.xlane.f32.xlu1 %v1062_v34  ;;  %v5968_v36 = vpop.f32.mrf.mxu1  ;;  %1069 = vmax.xlane.f32.xlu0 %v1068_v35  ;;  %v5980_v38 = vpop.f32.mrf.mxu0 }
 0x294   :  { %v750_v43 = vpop.f32.mrf.mxu1  ;;  %v870_v45 = vpop.f32.mrf.mxu0 }
 0x295   :  { %v919_v46 = vmul.f32 0.088388346, %v750_v43  ;;  %v922_v47 = vmul.f32 0.088388346, %v870_v45 }
 0x296   :  { %v5973_v48 = vpop.f32.mrf.mxu1  ;;  %v5991_v49 = vpop.f32.mrf.mxu0 }
 0x297   :  { %v1050_v50 = vadd.f32 %v1022_v39, %v919_v46  ;;  %v1053_v52 = vadd.f32 %v1034_v40, %v922_v47 }
 0x298   :  { %v753_v56 = vpop.f32.mrf.mxu1  ;;  %v873_v57 = vpop.f32.mrf.mxu0 }
 0x299   :  { %v1065_v58 = vsel %vm1055_vm2, %v1050_v50, -inf  ;;  %v1074_v59 = vsel %vm1055_vm2, %v1053_v52, -inf }
 0x29a   :  { %1066 = vmax.xlane.f32.xlu1 %v1065_v58  ;;  %v5974_v60 = vpop.f32.mrf.mxu1  ;;  %1075 = vmax.xlane.f32.xlu0 %v1074_v59  ;;  %v5992_v61 = vpop.f32.mrf.mxu0 }
 0x29c   :  { %v830_v2 = vpop.f32.mrf.mxu1 }
 0x29d   :  { %v921_v3 = vmul.f32 0.088388346, %v830_v2 }
 0x29e   :  { %v5985_v5 = vpop.f32.mrf.mxu1 }
 0x29f   :  { %v1052_v7 = vadd.f32 %v1030_v63, %v921_v3 }
 0x2a0   :  { %v833_v9 = vpop.f32.mrf.mxu1 }
 0x2a1   :  { %v1071_v10 = vsel %vm1055_vm2, %v1052_v7, -inf }
 0x2a2   :  { %1072 = vmax.xlane.f32.xlu1 %v1071_v10  ;;  %v5986_v11 = vpop.f32.mrf.mxu1 }
 0x2a4   :  { %v910_v14 = vpop.f32.mrf.mxu1 }
 0x2a5   :  { %v923_v16 = vmul.f32 0.088388346, %v910_v14 }
 0x2a6   :  { %v5997_v17 = vpop.f32.mrf.mxu1 }
 0x2a7   :  { %v1054_v18 = vadd.f32 %v1038_v12, %v923_v16 }
 0x2a8   :  { %v913_v19 = vpop.f32.mrf.mxu1 }
 0x2a9   :  { %v1077_v20 = vsel %vm1055_vm2, %v1054_v18, -inf }
 0x2aa   :  { %1078 = vmax.xlane.f32.xlu1 %v1077_v20  ;;  %v5998_v21 = vpop.f32.mrf.mxu1 }
 0x30b   :  { %v1058_v22 = vpop.xlane.xlu0 %1057 }
 0x30c   :  { %v1080_v23 = vsub.f32 %v7573_v51, %v1058_v22 }
 0x30e   :  { %v1088_v24 = vmul.f32 1.442695, %v1080_v23 }
 0x310   :  { %6807 = vpow2.f32 %v1088_v24 }
 0x313   :  { %v1061_v25 = vpop.xlane.xlu0 %1060 }
 0x314   :  { %v1081_v28 = vsub.f32 %v7579_v4, %v1061_v25 }
 0x316   :  { %v1090_v29 = vmul.f32 1.442695, %v1081_v28  ;;  %v1157_v28 = vpack.c.bf16 %v7569_v44, %v7569_v44 }
 0x318   :  { %6809 = vpow2.f32 %v1090_v29 }
 0x31b   :  { %v1064_v30 = vpop.xlane.xlu1 %1063  ;;  %v1070_v31 = vpop.xlane.xlu0 %1069 }
 0x31c   :  { %v1082_v34 = vsub.f32 %v7585_v26, %v1064_v30  ;;  %v1084_v35 = vsub.f32 %v7587_v27, %v1070_v31 }
 0x31d   :  { %v6808_v36 = vpop.eup %6807 }
 0x31e   :  { %v1092_v38 = vmul.f32 1.442695, %v1082_v34  ;;  %v1096_v39 = vmul.f32 1.442695, %v1084_v35  ;;  %v1104_v40 = vsel %vm1055_vm2, %v6808_v36, 0.0 }
 0x31f   :  { %1105 = vadd.xlane.f32.xlu0 %v1104_v40 }
 0x320   :  { %6811 = vpow2.f32 %v1092_v38  ;;  %v1395_v38 = vsel %vm1163_vm1, %v1157_v28, 0 }
 0x321   :  { %6813 = vpow2.f32 %v1096_v39 }
 0x323   :  { %v1067_v51 = vpop.xlane.xlu1 %1066  ;;  %v1076_v41 = vpop.xlane.xlu0 %1075 }
 0x324   :  { %v1083_v43 = vsub.f32 %v1050_v50, %v1067_v51  ;;  %v1086_v4 = vsub.f32 %v1053_v52, %v1076_v41  ;;  %v6503_v41 = vld [vmem:[#allocation7 + $0x30] sm:$0xff]  }
 0x325   :  { %v6810_v45 = vpop.eup %6809 }
 0x326   :  { %v1094_v46 = vmul.f32 1.442695, %v1083_v43  ;;  %v1100_v47 = vmul.f32 1.442695, %v1086_v4  ;;  %v1107_v48 = vsel %vm1055_vm2, %v6810_v45, 0.0 }
 0x327   :  { %1108 = vadd.xlane.f32.xlu1 %v1107_v48  ;;  %v6508_v48 = vld [vmem:[#allocation7 + $0x8] sm:$0xff]  }
 0x328   :  { %6815 = vpow2.f32 %v1094_v46  ;;  %v6505_v46 = vld [vmem:[#allocation7 + $0x20] sm:$0xff]  }
 0x329   :  { %6817 = vpow2.f32 %v1100_v47  ;;  %v6507_v47 = vld [vmem:[#allocation7 + $0x10] sm:$0xff]  }
 0x32b   :  { %v1073_v26 = vpop.xlane.xlu1 %1072 }
 0x32c   :  { %v1085_v27 = vsub.f32 %v1052_v7, %v1073_v26  ;;  %v6509_v26 = vld [vmem:[#allocation7] sm:$0xff]  }
 0x32d   :  { %v6812_v49 = vpop.eup %6811 }
 0x32e   :  { %v1098_v54 = vmul.f32 1.442695, %v1085_v27  ;;  %v1110_v55 = vsel %vm1055_vm2, %v6812_v49, 0.0  ;;  %v6814_v56 = vpop.eup %6813 }
 0x32f   :  { %1111 = vadd.xlane.f32.xlu0 %v1110_v55  ;;  %v1116_v50 = vsel %vm1055_vm2, %v6814_v56, 0.0 }
 0x330   :  { %6819 = vpow2.f32 %v1098_v54 }
 0x333   :  { %1117 = vadd.xlane.f32.xlu0 %v1116_v50  ;;  %v1079_v52 = vpop.xlane.xlu1 %1078 }
 0x334   :  { %v1087_v57 = vsub.f32 %v1054_v18, %v1079_v52 }
 0x335   :  { %v6816_v58 = vpop.eup %6815 }
 0x336   :  { %v7610_v59 = vpop.eup %6817  ;;  %v1102_v60 = vmul.f32 1.442695, %v1087_v57  ;;  %v1113_v61 = vsel %vm1055_vm2, %v6816_v58, 0.0 }
 0x337   :  { %v1122_v63 = vsel %vm1055_vm2, %v7610_v59, 0.0  ;;  %1114 = vadd.xlane.f32.xlu1 %v1113_v61 }
 0x338   :  { %6821 = vpow2.f32 %v1102_v60  ;;  %1123 = vadd.xlane.f32.xlu0 %v1122_v63 }
 0x33d   :  { %v7615_v1 = vpop.eup %6819 }
 0x33e   :  { %v1119_v2 = vsel %vm1055_vm2, %v7615_v1, 0.0 }
 0x33f   :  { %1120 = vadd.xlane.f32.xlu1 %v1119_v2 }
 0x345   :  { %v7619_v3 = vpop.eup %6821 }
 0x346   :  { %v1125_v5 = vsel %vm1055_vm2, %v7619_v3, 0.0 }
 0x347   :  { %1126 = vadd.xlane.f32.xlu1 %v1125_v5 }
 0x3a8   :  { %v1106_v7 = vpop.xlane.xlu0 %1105 }
 0x3a9   :  { %6823 = vrcp.f32 %v1106_v7 }
 0x3b0   :  { %v1109_v8 = vpop.xlane.xlu1 %1108 }
 0x3b1   :  { %6825 = vrcp.f32 %v1109_v8 }
 0x3b6   :  { %v6824_v9 = vpop.eup %6823 }
 0x3b7   :  { %v1136_v10 = vmul.f32 %v6824_v9, %v6808_v36  ;;  %v6502_v36 = vld [vmem:[#allocation7 + $0x38] sm:$0xff]  }
 0x3b8   :  { %v1112_v11 = vpop.xlane.xlu0 %1111 }
 0x3b9   :  { %6827 = vrcp.f32 %v1112_v11  ;;  %v1144_v12 = vpack.c.bf16 %v1136_v10, %v1136_v10 }
 0x3bb   :  { %6002 = vmatmul.mubr.msk.bf16.vlgmr.msra.gmra.mxu0 %vm1055_vm2, %v1144_v12 }
 0x3bc   :  { %6012 = vmatpush3.bf16.msra.mxu0 %v7520_v53  ;;  %v1118_v14 = vpop.xlane.xlu0 %1117  ;;  %6013 = vmatprep.mubr.msk.bf16.mxu0 %vm7220_vm0, %v7219_v37 }
 0x3bd   :  { %6829 = vrcp.f32 %v1118_v14  ;;  %6023 = vmatprep.subr.bf16.mxu0 %v7219_v37 }
 0x3be   :  { %v6826_v16 = vpop.eup %6825 }
 0x3bf   :  { %v1137_v17 = vmul.f32 %v6826_v16, %v6810_v45  ;;  %v6504_v45 = vld [vmem:[#allocation7 + $0x28] sm:$0xff]  }
 0x3c0   :  { %v1115_v18 = vpop.xlane.xlu1 %1114 }
 0x3c1   :  { %6831 = vrcp.f32 %v1115_v18  ;;  %v1145_v19 = vpack.c.bf16 %v1137_v17, %v1137_v17  ;;  %v1124_v20 = vpop.xlane.xlu0 %1123 }
 0x3c2   :  { %6833 = vrcp.f32 %v1124_v20 }
 0x3c3   :  { %6008 = vmatmul.mubr.msk.bf16.vlgmr.msra.gmra.mxu1 %vm1055_vm2, %v1145_v19 }
 0x3c4   :  { %6018 = vmatpush3.bf16.msra.mxu1 %v7523_v62  ;;  %6019 = vmatprep.mubr.msk.bf16.mxu1 %vm7220_vm0, %v7219_v37 }
 0x3c5   :  { %6029 = vmatprep.subr.bf16.mxu1 %v7219_v37 }
 0x3c6   :  { %v6828_v53 = vpop.eup %6827 }
 0x3c7   :  { %v1138_v21 = vmul.f32 %v6828_v53, %v6812_v49 }
 0x3c8   :  { %v1121_v22 = vpop.xlane.xlu1 %1120 }
 0x3c9   :  { %6835 = vrcp.f32 %v1121_v22  ;;  %v1146_v23 = vpack.c.bf16 %v1138_v21, %v1138_v21 }
 0x3ca   :  { %v6830_v24 = vpop.eup %6829 }
 0x3cb   :  { %6014 = vmatmul.mubr.msk.bf16.vlgmr.msra.gmra.mxu0 %vm1055_vm2, %v1146_v23  ;;  %v1140_v62 = vmul.f32 %v6830_v24, %v6814_v56 }
 0x3cc   :  { %6024 = vmatpush3.bf16.msra.mxu0 %v7533_v13  ;;  %6025 = vmatprep.mubr.msk.bf16.mxu0 %vm7220_vm0, %v7219_v37 }
 0x3cd   :  { %6035 = vmatprep.subr.bf16.mxu0 %v7219_v37  ;;  %v1148_v34 = vpack.c.bf16 %v1140_v62, %v1140_v62 }
 0x3ce   :  { %v6832_v25 = vpop.eup %6831 }
 0x3cf   :  { %v1139_v29 = vmul.f32 %v6832_v25, %v6816_v58  ;;  %v6834_v35 = vpop.eup %6833 }
 0x3d0   :  { %v1127_v30 = vpop.xlane.xlu1 %1126  ;;  %v1142_v13 = vmul.f32 %v6834_v35, %v7610_v59 }
 0x3d1   :  { %6837 = vrcp.f32 %v1127_v30  ;;  %v1147_v31 = vpack.c.bf16 %v1139_v29, %v1139_v29  ;;  %v6875_v30 = vld [vmem:[#allocation2] sm:$0xff] }
 0x3d2   :  { %v1150_v51 = vpack.c.bf16 %v1142_v13, %v1142_v13  ;;  %v6877_v13 = vld [vmem:[#allocation2 + $0x8] sm:$0xff] }
 0x3d3   :  { %6020 = vmatmul.mubr.msk.bf16.vlgmr.msra.gmra.mxu1 %vm1055_vm2, %v1147_v31  ;;  %6026 = vmatmul.mubr.msk.bf16.vlgmr.msra.gmra.mxu0 %vm1055_vm2, %v1148_v34 }
 0x3d4   :  { %6030 = vmatpush3.bf16.msra.mxu1 %v1395_v38  ;;  %6036 = vmatpush3.bf16.msra.mxu0 %v7530_v6 }
 0x3d5   :  { %6031 = vmatprep.mubr.msk.bf16.mxu1 %vm7220_vm0, %v7219_v37  ;;  %6037 = vmatprep.mubr.msk.bf16.mxu0 %vm7220_vm0, %v7219_v37 }
 0x3d6   :  { %v6836_v44 = vpop.eup %6835  ;;  %6041 = vmatprep.subr.bf16.mxu1 %v7219_v37  ;;  %6047 = vmatprep.subr.bf16.mxu0 %v6502_v36 }
 0x3d7   :  { %v1141_v39 = vmul.f32 %v6836_v44, %v7615_v1 }
 0x3d9   :  { %v1149_v40 = vpack.c.bf16 %v1141_v39, %v1141_v39  ;;  %v6878_v39 = vld [vmem:[#allocation2 + $0x18] sm:$0xff] }
 0x3db   :  { %6032 = vmatmul.mubr.msk.bf16.vlgmr.msra.gmra.mxu1 %vm1055_vm2, %v1149_v40  ;;  %6038 = vmatmul.mubr.msk.bf16.vlgmr.msra.gmra.mxu0 %vm1055_vm2, %v1150_v51 }
 0x3dc   :  { %6042 = vmatpush3.bf16.msra.mxu1 %v7536_v15  ;;  %6043 = vmatprep.mubr.msk.bf16.mxu1 %vm7220_vm0, %v7219_v37  ;;  %v6506_v15 = vld [vmem:[#allocation7 + $0x18] sm:$0xff]  }
 0x3dd   :  { %6048 = vmatpush3.bf16.msra.mxu0 %v6502_v36  ;;  %v6876_v36 = vld [vmem:[#allocation2 + $0x10] sm:$0xff] }
 0x3de   :  { %v6838_v6 = vpop.eup %6837  ;;  %6049 = vmatprep.subr.bf16.mxu0 %v6503_v41 }
 0x3df   :  { %v1143_v43 = vmul.f32 %v6838_v6, %v7619_v3  ;;  %v6879_v6 = vld [vmem:[#allocation2 + $0x20] sm:$0xff] }
 0x3e1   :  { %v1151_v4 = vpack.c.bf16 %v1143_v43, %v1143_v43  ;;  %6050 = vmatpush3.bf16.msra.mxu0 %v6503_v41 }
 0x3e2   :  { %6051 = vmatprep.subr.bf16.mxu0 %v6504_v45 }
 0x3e3   :  { %6044 = vmatmul.mubr.msk.bf16.vlgmr.msra.gmra.mxu1 %vm1055_vm2, %v1151_v4 }
 0x3e4   :  { %1933 = vmatprep.mubr.bf16.mxu1 %v7218_v0 }
 0x3e5   :  { %6052 = vmatpush3.bf16.msra.mxu0 %v6504_v45 }
 0x3e6   :  { %6053 = vmatprep.subr.bf16.mxu0 %v6505_v46 }
 0x3e9   :  { %6054 = vmatpush3.bf16.msra.mxu0 %v6505_v46  ;;  %v6880_v46 = vld [vmem:[#allocation2 + $0x30] sm:$0xff] }
 0x3ea   :  { %6055 = vmatprep.subr.bf16.mxu0 %v6506_v15 }
 0x3ed   :  { %6056 = vmatpush3.bf16.msra.mxu0 %v6506_v15 }
 0x3ee   :  { %6057 = vmatprep.subr.bf16.mxu0 %v6507_v47 }
 0x3f1   :  { %6058 = vmatpush3.bf16.msra.mxu0 %v6507_v47  ;;  %v6881_v47 = vld [vmem:[#allocation2 + $0x28] sm:$0xff] }
 0x3f2   :  { %6059 = vmatprep.subr.bf16.mxu0 %v6508_v48 }
 0x3f5   :  { %6060 = vmatpush3.bf16.msra.mxu0 %v6508_v48 }
 0x3f6   :  { %6061 = vmatprep.subr.bf16.mxu0 %v6509_v26 }
 0x3f9   :  { %6062 = vmatpush3.bf16.msra.mxu0 %v6509_v26  ;;  %v6882_v26 = vld [vmem:[#allocation2 + $0x38] sm:$0xff] }
 0x47b   :  { %v1201_v27 = vpop.f32.mrf.mxu0 }
 0x47d   :  { %v6003_v49 = vpop.f32.mrf.mxu0 }
 0x47e   :  { %v6510_v49 = vld [vmem:[#allocation12 + $0x70] ss:$8 sps:$4 sm:$0xff]  }
 0x47f   :  { %v1204_v54 = vpop.f32.mrf.mxu0 }
 0x480   :  { %v6512_v54 = vld [vmem:[#allocation12 + $0x74] ss:$8 sps:$4 sm:$0xff]  }
 0x481   :  { %v6004_v55 = vpop.f32.mrf.mxu0  ;;  %1901 = vmatprep.subr.bf16.mxu1 %v6512_v54 }
 0x482   :  { %1902 = vmatpush1.bf16.msra.mxu1 %v6510_v49 }
 0x483   :  { %v1247_v56 = vpop.f32.mrf.mxu1 }
 0x484   :  { %v1545_v50 = vpack.c.bf16 %v1247_v56, %v1201_v27 }
 0x485   :  { %v6009_v52 = vpop.f32.mrf.mxu1 }
 0x486   :  { %6063 = vmatprep.mubr.bf16.mxu0 %v1545_v50 }
 0x487   :  { %v1250_v57 = vpop.f32.mrf.mxu1 }
 0x489   :  { %v6010_v58 = vpop.f32.mrf.mxu1 }
 0x48b   :  { %v1293_v59 = vpop.f32.mrf.mxu0 }
 0x48d   :  { %v6015_v60 = vpop.f32.mrf.mxu0 }
 0x48f   :  { %v1296_v61 = vpop.f32.mrf.mxu0 }
 0x491   :  { %v6016_v63 = vpop.f32.mrf.mxu0 }
 0x493   :  { %v1339_v1 = vpop.f32.mrf.mxu1  ;;  %v1385_v2 = vpop.f32.mrf.mxu0 }
 0x494   :  { %v1546_v3 = vpack.c.bf16 %v1339_v1, %v1293_v59 }
 0x495   :  { %v6021_v5 = vpop.f32.mrf.mxu1  ;;  %v6027_v7 = vpop.f32.mrf.mxu0 }
 0x496   :  { %6064 = vmatmul.mubr.bf16.vlgmr.msra.gmra.mxu0 %v1546_v3 }
 0x497   :  { %v1342_v8 = vpop.f32.mrf.mxu1  ;;  %v1388_v9 = vpop.f32.mrf.mxu0 }
 0x499   :  { %v6022_v10 = vpop.f32.mrf.mxu1  ;;  %v6028_v11 = vpop.f32.mrf.mxu0 }
 0x49a   :  { %v6515_v11 = vld [vmem:[#allocation12 + $0x64] ss:$8 sps:$4 sm:$0xff]  }
 0x49b   :  { %v1431_v12 = vpop.f32.mrf.mxu1  ;;  %v1477_v14 = vpop.f32.mrf.mxu0  ;;  %1903 = vmatprep.subr.bf16.mxu1 %v6515_v11 }
 0x49c   :  { %v1547_v16 = vpack.c.bf16 %v1431_v12, %v1385_v2 }
 0x49d   :  { %v6033_v17 = vpop.f32.mrf.mxu1  ;;  %v6039_v18 = vpop.f32.mrf.mxu0 }
 0x49e   :  { %6067 = vmatprep.mubr.bf16.mxu0 %v1547_v16 }
 0x49f   :  { %v1434_v19 = vpop.f32.mrf.mxu1  ;;  %v1480_v20 = vpop.f32.mrf.mxu0 }
 0x4a1   :  { %v6034_v53 = vpop.f32.mrf.mxu1  ;;  %v6040_v21 = vpop.f32.mrf.mxu0 }
 0x4a2   :  { %v6518_v53 = vld [vmem:[#allocation12 + $0x54] ss:$8 sps:$4 sm:$0xff]  }
 0x4a3   :  { %v1523_v22 = vpop.f32.mrf.mxu1 }
 0x4a4   :  { %v1548_v23 = vpack.c.bf16 %v1523_v22, %v1477_v14  ;;  %v6513_v14 = vld [vmem:[#allocation12 + $0x60] ss:$8 sps:$4 sm:$0xff]  }
 0x4a5   :  { %v6045_v24 = vpop.f32.mrf.mxu1  ;;  %1904 = vmatpush1.bf16.msra.mxu1 %v6513_v14 }
 0x4a6   :  { %6068 = vmatmul.mubr.bf16.gmra.mxu0 %v1548_v23  ;;  %v6516_v23 = vld [vmem:[#allocation12 + $0x50] ss:$8 sps:$4 sm:$0xff]   ;;  %1905 = vmatprep.subr.bf16.mxu1 %v6518_v53 }
 0x4a7   :  { %v1526_v62 = vpop.f32.mrf.mxu1 }
 0x4a9   :  { %v6046_v25 = vpop.f32.mrf.mxu1  ;;  %1906 = vmatpush1.bf16.msra.mxu1 %v6516_v23 }
 0x556   :  { %v6065_v28 = vpop.f32.mrf.mxu0 }
 0x557   :  { %v1664_v38 = vadd.f32 %v6876_v36, %v6065_v28  ;;  %v6524_v36 = vld [vmem:[#allocation12 + $0x34] ss:$8 sps:$4 sm:$0xff]  }
 0x558   :  { %v1631_v29 = vpop.f32.mrf.mxu0 }
 0x559   :  { %v1662_v31 = vadd.f32 %v6875_v30, %v1631_v29  ;;  %v6521_v29 = vld [vmem:[#allocation12 + $0x44] ss:$8 sps:$4 sm:$0xff]  }
 0x55a   :  { %v6066_v34 = vpop.f32.mrf.mxu0  ;;  %1907 = vmatprep.subr.bf16.mxu1 %v6521_v29  ;;  %v5405_v29 = vld [vmem:[#allocation10] ss:$0 sm:$0xff] }
 0x55b   :  { %1672 = vadd.xlane.f32.xlu0 %v1662_v31  ;;  %v1665_v40 = vadd.f32 %v6878_v39, %v6066_v34  ;;  %v6528_v39 = vld [vmem:[#allocation12 + $0x10] ss:$8 sps:$4 sm:$0xff]  }
 0x55c   :  { %v1634_v35 = vpop.f32.mrf.mxu0 }
 0x55d   :  { %v1663_v44 = vadd.f32 %v6877_v13, %v1634_v35  ;;  %v6522_v35 = vld [vmem:[#allocation12 + $0x30] ss:$8 sps:$4 sm:$0xff]   ;;  %v6525_v13 = vld [vmem:[#allocation12 + $0x20] ss:$8 sps:$4 sm:$0xff]  }
 0x55f   :  { %1676 = vadd.xlane.f32.xlu0 %v1664_v38  ;;  %1674 = vadd.xlane.f32.xlu1 %v1663_v44 }
 0x563   :  { %1678 = vadd.xlane.f32.xlu1 %v1665_v40 }
 0x566   :  { %v6069_v51 = vpop.f32.mrf.mxu0 }
 0x567   :  { %v1668_v15 = vadd.f32 %v6880_v46, %v6069_v51  ;;  %v6531_v51 = vld [vmem:[#allocation12] ss:$8 sps:$4 sm:$0xff]  }
 0x568   :  { %v1647_v41 = vpop.f32.mrf.mxu0  ;;  %v6539_v46 = vld [vmem:[#allocation15 + $0x28] sm:$0xff]  }
 0x569   :  { %v1666_v43 = vadd.f32 %v6879_v6, %v1647_v41  ;;  %v6534_v41 = vld [vmem:[#allocation15 + $0x78] sm:$0xff]  }
 0x56a   :  { %v6070_v4 = vpop.f32.mrf.mxu0  ;;  %v6535_v6 = vld [vmem:[#allocation15 + $0x38] sm:$0xff]   ;;  %5732 = vmatprep.subr.bf16.mxu0 %v6534_v41 }
 0x56b   :  { %1680 = vadd.xlane.f32.xlu0 %v1666_v43  ;;  %v1669_v27 = vadd.f32 %v6882_v26, %v6070_v4  ;;  %5733 = vmatpush3.bf16.msra.mxu0 %v6535_v6  ;;  %v6537_v4 = vld [vmem:[#allocation15 + $0x30] sm:$0xff]   ;;  %v6543_v26 = vld [vmem:[#allocation15 + $0x18] sm:$0xff]  }
 0x56c   :  { %v1650_v45 = vpop.f32.mrf.mxu0 }
 0x56d   :  { %v1667_v48 = vadd.f32 %v6881_v47, %v1650_v45  ;;  %v6538_v45 = vld [vmem:[#allocation15 + $0x68] sm:$0xff]   ;;  %v6541_v47 = vld [vmem:[#allocation15 + $0x20] sm:$0xff]  }
 0x56f   :  { %1684 = vadd.xlane.f32.xlu0 %v1668_v15  ;;  %1682 = vadd.xlane.f32.xlu1 %v1667_v48 }
 0x573   :  { %1686 = vadd.xlane.f32.xlu1 %v1669_v27 }
 0x5e4   :  { %v1673_v55 = vpop.xlane.xlu0 %1672 }
 0x5e5   :  { %v1689_v56 = vmul.f32 0.0078125, %v1673_v55 }
 0x5e7   :  { %v7659_v50 = vsub.f32 %v1662_v31, %v1689_v56  ;;  %v6519_v31 = vld [vmem:[#allocation12 + $0x40] ss:$8 sps:$4 sm:$0xff]  }
 0x5e8   :  { %v1677_v52 = vpop.xlane.xlu0 %1676  ;;  %v1675_v57 = vpop.xlane.xlu1 %1674  ;;  %1908 = vmatpush1.bf16.msra.mxu1 %v6519_v31 }
 0x5e9   :  { %v1691_v58 = vmul.f32 0.0078125, %v1677_v52  ;;  %v1690_v59 = vmul.f32 0.0078125, %v1675_v57  ;;  %v1705_v60 = vmul.f32 %v7659_v50, %v7659_v50  ;;  %1909 = vmatprep.subr.bf16.mxu1 %v6524_v36 }
 0x5eb   :  { %v7663_v61 = vsub.f32 %v1664_v38, %v1691_v58  ;;  %v7665_v63 = vsub.f32 %v1663_v44, %v1690_v59  ;;  %1713 = vadd.xlane.f32.xlu0 %v1705_v60  ;;  %v6527_v38 = vld [vmem:[#allocation12 + $0x24] ss:$8 sps:$4 sm:$0xff]   ;;  %v6530_v44 = vld [vmem:[#allocation12 + $0x14] ss:$8 sps:$4 sm:$0xff]  }
 0x5ec   :  { %v1679_v1 = vpop.xlane.xlu1 %1678  ;;  %1910 = vmatpush1.bf16.msra.mxu1 %v6522_v35 }
 0x5ed   :  { %v1692_v2 = vmul.f32 0.0078125, %v1679_v1  ;;  %v1707_v3 = vmul.f32 %v7663_v61, %v7663_v61  ;;  %v1706_v5 = vmul.f32 %v7665_v63, %v7665_v63  ;;  %1911 = vmatprep.subr.bf16.mxu1 %v6527_v38 }
 0x5ef   :  { %v7671_v7 = vsub.f32 %v1665_v40, %v1692_v2  ;;  %1717 = vadd.xlane.f32.xlu0 %v1707_v3  ;;  %1715 = vadd.xlane.f32.xlu1 %v1706_v5  ;;  %v6533_v40 = vld [vmem:[#allocation12 + $0x4] ss:$8 sps:$4 sm:$0xff]  }
 0x5f0   :  { %1912 = vmatpush1.bf16.msra.mxu1 %v6525_v13 }
 0x5f1   :  { %v1708_v8 = vmul.f32 %v7671_v7, %v7671_v7  ;;  %1913 = vmatprep.subr.bf16.mxu1 %v6530_v44 }
 0x5f3   :  { %1719 = vadd.xlane.f32.xlu1 %v1708_v8 }
 0x5f4   :  { %v1681_v9 = vpop.xlane.xlu0 %1680  ;;  %1914 = vmatpush1.bf16.msra.mxu1 %v6528_v39 }
 0x5f5   :  { %v1693_v10 = vmul.f32 0.0078125, %v1681_v9  ;;  %1915 = vmatprep.subr.bf16.mxu1 %v6533_v40 }
 0x5f7   :  { %v7675_v12 = vsub.f32 %v1666_v43, %v1693_v10  ;;  %v6536_v43 = vld [vmem:[#allocation15 + $0x70] sm:$0xff]  }
 0x5f8   :  { %v1685_v16 = vpop.xlane.xlu0 %1684  ;;  %v1683_v17 = vpop.xlane.xlu1 %1682  ;;  %1916 = vmatpush1.bf16.msra.mxu1 %v6531_v51  ;;  %5734 = vmatprep.subr.bf16.mxu0 %v6536_v43 }
 0x5f9   :  { %v1695_v18 = vmul.f32 0.0078125, %v1685_v16  ;;  %v1694_v19 = vmul.f32 0.0078125, %v1683_v17  ;;  %v1709_v20 = vmul.f32 %v7675_v12, %v7675_v12  ;;  %5735 = vmatpush3.bf16.msra.mxu0 %v6537_v4 }
 0x5fa   :  { %5736 = vmatprep.subr.bf16.mxu0 %v6538_v45 }
 0x5fb   :  { %v7679_v21 = vsub.f32 %v1668_v15, %v1695_v18  ;;  %v7681_v22 = vsub.f32 %v1667_v48, %v1694_v19  ;;  %1721 = vadd.xlane.f32.xlu0 %v1709_v20  ;;  %v6540_v15 = vld [vmem:[#allocation15 + $0x60] sm:$0xff]   ;;  %v6542_v48 = vld [vmem:[#allocation15 + $0x58] sm:$0xff]  }
 0x5fc   :  { %v1687_v24 = vpop.xlane.xlu1 %1686  ;;  %v5404_v18 = vld [vmem:[#allocation9] ss:$0 sm:$0xff] }
 0x5fd   :  { %v1696_v62 = vmul.f32 0.0078125, %v1687_v24  ;;  %v1711_v25 = vmul.f32 %v7679_v21, %v7679_v21  ;;  %v1710_v28 = vmul.f32 %v7681_v22, %v7681_v22  ;;  %5737 = vmatpush3.bf16.msra.mxu0 %v6539_v46 }
 0x5fe   :  { %5738 = vmatprep.subr.bf16.mxu0 %v6540_v15 }
 0x5ff   :  { %v7687_v30 = vsub.f32 %v1669_v27, %v1696_v62  ;;  %1725 = vadd.xlane.f32.xlu0 %v1711_v25  ;;  %1723 = vadd.xlane.f32.xlu1 %v1710_v28 }
 0x601   :  { %v1712_v34 = vmul.f32 %v7687_v30, %v7687_v30  ;;  %5739 = vmatpush3.bf16.msra.mxu0 %v6541_v47 }
 0x602   :  { %5740 = vmatprep.subr.bf16.mxu0 %v6542_v48 }
 0x603   :  { %1727 = vadd.xlane.f32.xlu1 %v1712_v34 }
 0x605   :  { %5741 = vmatpush3.bf16.msra.mxu0 %v6543_v26 }
 0x674   :  { %v1714_v27 = vpop.xlane.xlu0 %1713 }
 0x675   :  { %v1729_v49 = vmul.f32 0.0078125, %v1714_v27 }
 0x677   :  { %v1737_v54 = vadd.f32 1e-12, %v1729_v49 }
 0x678   :  { %v1718_v55 = vpop.xlane.xlu0 %1717  ;;  %v1716_v56 = vpop.xlane.xlu1 %1715 }
 0x679   :  { %6839 = vrsqrt.f32 %v1737_v54  ;;  %v1731_v52 = vmul.f32 0.0078125, %v1718_v55  ;;  %v1730_v57 = vmul.f32 0.0078125, %v1716_v56  ;;  %v6544_v56 = vld [vmem:[#allocation15 + $0x50] sm:$0xff]  }
 0x67a   :  { %5742 = vmatprep.subr.bf16.mxu0 %v6544_v56 }
 0x67b   :  { %v1738_v58 = vadd.f32 1e-12, %v1730_v57  ;;  %v1739_v59 = vadd.f32 1e-12, %v1731_v52  ;;  %v6546_v52 = vld [vmem:[#allocation15 + $0x48] sm:$0xff]  }
 0x67c   :  { %v1720_v60 = vpop.xlane.xlu1 %1719  ;;  %v6547_v57 = vld [vmem:[#allocation15 + $0x8] sm:$0xff]  }
 0x67d   :  { %v1732_v1 = vmul.f32 0.0078125, %v1720_v60  ;;  %6841 = vrsqrt.f32 %v1738_v58  ;;  %v6548_v58 = vld [vmem:[#allocation15 + $0x40] sm:$0xff]   ;;  %v7728_v60 = vsub.s32 1, %v7558_v32 }
 0x67e   :  { %6843 = vrsqrt.f32 %v1739_v59  ;;  %v6549_v59 = vld [vmem:[#allocation15] sm:$0xff]  }
 0x67f   :  { %v1740_v2 = vadd.f32 1e-12, %v1732_v1  ;;  %v1809_v1 = vld [vmem:[#allocation13] sm:$0x3] }
 0x681   :  { %6845 = vrsqrt.f32 %v1740_v2 }
 0x684   :  { %v1722_v3 = vpop.xlane.xlu0 %1721 }
 0x685   :  { %v1733_v5 = vmul.f32 0.0078125, %v1722_v3  ;;  %v1818_v3 = vrot.slane %v1809_v1, %v7728_v60 }
 0x686   :  { %v6840_v8 = vpop.eup %6839 }
 0x687   :  { %v1741_v9 = vadd.f32 1e-12, %v1733_v5  ;;  %v1753_v14 = vmul.f32 %v6840_v8, %v7659_v50  ;;  %v1814_v5 = vrot.slane %v1809_v1, %v7566_v42 }
 0x688   :  { %v1726_v10 = vpop.xlane.xlu0 %1725  ;;  %v1724_v11 = vpop.xlane.xlu1 %1723 }
 0x689   :  { %6847 = vrsqrt.f32 %v1741_v9  ;;  %v1735_v16 = vmul.f32 0.0078125, %v1726_v10  ;;  %v1734_v17 = vmul.f32 0.0078125, %v1724_v11  ;;  %v1767_v62 = vmul.f32 %v5404_v18, %v1753_v14 }
 0x68a   :  { %v6842_v19 = vpop.eup %6841 }
 0x68b   :  { %v1742_v20 = vadd.f32 1e-12, %v1734_v17  ;;  %v1743_v53 = vadd.f32 1e-12, %v1735_v16  ;;  %v1754_v24 = vmul.f32 %v6842_v19, %v7665_v63  ;;  %v6844_v25 = vpop.eup %6843  ;;  %v7694_v36 = vadd.f32 %v5405_v29, %v1767_v62 }
 0x68c   :  { %v1728_v23 = vpop.xlane.xlu1 %1727  ;;  %v1755_v13 = vmul.f32 %v6844_v25, %v7663_v61 }
 0x68d   :  { %v1736_v28 = vmul.f32 0.0078125, %v1728_v23  ;;  %6849 = vrsqrt.f32 %v1742_v20  ;;  %v1768_v34 = vmul.f32 %v5404_v18, %v1754_v24 }
 0x68e   :  { %v6846_v31 = vpop.eup %6845  ;;  %6851 = vrsqrt.f32 %v1743_v53  ;;  %v1769_v39 = vmul.f32 %v5404_v18, %v1755_v13 }
 0x68f   :  { %v1744_v35 = vadd.f32 1e-12, %v1736_v28  ;;  %v1756_v50 = vmul.f32 %v6846_v31, %v7671_v7  ;;  %v7696_v38 = vadd.f32 %v5405_v29, %v1768_v34 }
 0x690   :  { %v7704_v7 = vadd.f32 %v5405_v29, %v1769_v39 }
 0x691   :  { %6853 = vrsqrt.f32 %v1744_v35  ;;  %v1805_v63 = vpack.c.bf16 %v7696_v38, %v7694_v36  ;;  %v1770_v44 = vmul.f32 %v5404_v18, %v1756_v50 }
 0x693   :  { %1934 = vmatmul.mubr.bf16.vlgmr.msra.gmra.mxu1 %v1805_v63  ;;  %v7702_v51 = vadd.f32 %v5405_v29, %v1770_v44 }
 0x694   :  { %1943 = vmatprep.mubr.bf16.mxu1 %v7218_v0 }
 0x695   :  { %v1806_v6 = vpack.c.bf16 %v7702_v51, %v7704_v7 }
 0x696   :  { %v6848_v40 = vpop.eup %6847 }
 0x697   :  { %v1757_v41 = vmul.f32 %v6848_v40, %v7675_v12 }
 0x699   :  { %v1771_v4 = vmul.f32 %v5404_v18, %v1757_v41 }
 0x69a   :  { %v6850_v61 = vpop.eup %6849 }
 0x69b   :  { %1944 = vmatmul.mubr.bf16.gmra.mxu1 %v1806_v6  ;;  %v1758_v43 = vmul.f32 %v6850_v61, %v7681_v22  ;;  %v6852_v45 = vpop.eup %6851  ;;  %v7712_v48 = vadd.f32 %v5405_v29, %v1771_v4 }
 0x69c   :  { %1953 = vmatprep.mubr.bf16.mxu1 %v7218_v0  ;;  %v1759_v12 = vmul.f32 %v6852_v45, %v7679_v21  ;;  %v6545_v21 = vld [vmem:[#allocation15 + $0x10] sm:$0xff]  }
 0x69d   :  { %v1772_v15 = vmul.f32 %v5404_v18, %v1758_v43  ;;  %5743 = vmatpush3.bf16.msra.mxu0 %v6545_v21 }
 0x69e   :  { %v6854_v46 = vpop.eup %6853  ;;  %v1773_v22 = vmul.f32 %v5404_v18, %v1759_v12  ;;  %5744 = vmatprep.subr.bf16.mxu0 %v6546_v52 }
 0x69f   :  { %v1760_v47 = vmul.f32 %v6854_v46, %v7687_v30  ;;  %v7714_v26 = vadd.f32 %v5405_v29, %v1772_v15 }
 0x6a0   :  { %v7722_v55 = vadd.f32 %v5405_v29, %v1773_v22 }
 0x6a1   :  { %v1807_v27 = vpack.c.bf16 %v7714_v26, %v7712_v48  ;;  %v1774_v49 = vmul.f32 %v5404_v18, %v1760_v47  ;;  %5745 = vmatpush3.bf16.msra.mxu0 %v6547_v57 }
 0x6a2   :  { %5746 = vmatprep.subr.bf16.mxu0 %v6548_v58 }
 0x6a3   :  { %1954 = vmatmul.mubr.bf16.gmra.mxu1 %v1807_v27  ;;  %v7720_v54 = vadd.f32 %v5405_v29, %v1774_v49 }
 0x6a4   :  { %1963 = vmatprep.mubr.bf16.mxu1 %v7218_v0 }
 0x6a5   :  { %v1808_v30 = vpack.c.bf16 %v7720_v54, %v7722_v55  ;;  %5747 = vmatpush3.bf16.msra.mxu0 %v6549_v59 }
 0x6ab   :  { %1964 = vmatmul.mubr.bf16.gmra.mxu1 %v1808_v30 }
 0x6ac   :  { %3024 = vmatprep.mubr.bf16.mxu1 %v7218_v0 }
 0x753   :  { %v1935_v2 = vpop.f32.mrf.mxu1 }
 0x754   :  { %v1936_v14 = vadd.f32 %v1935_v2, %v1814_v5 }
 0x755   :  { %v1937_v8 = vpop.f32.mrf.mxu1 }
 0x756   :  { %v1938_v10 = vadd.f32 %v1937_v8, %v1818_v3  ;;  %v1974_v23 = vmax.f32 %v1936_v14, 0.0 }
 0x757   :  { %v1939_v9 = vpop.f32.mrf.mxu1 }
 0x758   :  { %v1940_v11 = vadd.f32 %v1939_v9, %v1814_v5  ;;  %v1975_v20 = vmax.f32 %v1938_v10, 0.0 }
 0x759   :  { %v1941_v16 = vpop.f32.mrf.mxu1 }
 0x75a   :  { %v1942_v17 = vadd.f32 %v1941_v16, %v1818_v3  ;;  %v1976_v18 = vmax.f32 %v1940_v11, 0.0 }
 0x75b   :  { %v1945_v19 = vpop.f32.mrf.mxu1 }
 0x75c   :  { %v1977_v53 = vmax.f32 %v1942_v17, 0.0  ;;  %v2022_v25 = vpack.c.bf16 %v1976_v18, %v1974_v23  ;;  %v1946_v34 = vadd.f32 %v1945_v19, %v1814_v5  ;;  %v5422_v19 = vld [vmem:[#allocation16] ss:$0 sm:$0xff] }
 0x75d   :  { %v1947_v24 = vpop.f32.mrf.mxu1 }
 0x75e   :  { %v2023_v62 = vpack.c.bf16 %v1977_v53, %v1975_v20  ;;  %v1948_v29 = vadd.f32 %v1947_v24, %v1818_v3  ;;  %v1978_v40 = vmax.f32 %v1946_v34, 0.0 }
 0x75f   :  { %v1949_v28 = vpop.f32.mrf.mxu1 }
 0x760   :  { %v1950_v31 = vadd.f32 %v1949_v28, %v1814_v5  ;;  %2165 = vmatprep.mubr.bf16.mxu0 %v2023_v62  ;;  %v1979_v44 = vmax.f32 %v1948_v29, 0.0 }
 0x761   :  { %v1951_v35 = vpop.f32.mrf.mxu1  ;;  %2166 = vmatmul.mubr.bf16.vlgmr.msra.gmra.mxu0 %v2022_v25 }
 0x762   :  { %v1952_v50 = vadd.f32 %v1951_v35, %v1818_v3  ;;  %v1980_v13 = vmax.f32 %v1950_v31, 0.0 }
 0x763   :  { %v1955_v63 = vpop.f32.mrf.mxu1 }
 0x764   :  { %v1981_v39 = vmax.f32 %v1952_v50, 0.0  ;;  %v2024_v61 = vpack.c.bf16 %v1980_v13, %v1978_v40  ;;  %v1956_v46 = vadd.f32 %v1955_v63, %v1814_v5 }
 0x765   :  { %v1957_v41 = vpop.f32.mrf.mxu1 }
 0x766   :  { %v2025_v6 = vpack.c.bf16 %v1981_v39, %v1979_v44  ;;  %v1958_v4 = vadd.f32 %v1957_v41, %v1818_v3  ;;  %v1982_v30 = vmax.f32 %v1956_v46, 0.0 }
 0x767   :  { %v1959_v43 = vpop.f32.mrf.mxu1 }
 0x768   :  { %v1960_v45 = vadd.f32 %v1959_v43, %v1814_v5  ;;  %2173 = vmatprep.mubr.bf16.mxu0 %v2025_v6  ;;  %v1983_v49 = vmax.f32 %v1958_v4, 0.0 }
 0x769   :  { %v1961_v15 = vpop.f32.mrf.mxu1  ;;  %2174 = vmatmul.mubr.bf16.gmra.mxu0 %v2024_v61 }
 0x76a   :  { %v1962_v47 = vadd.f32 %v1961_v15, %v1818_v3  ;;  %v1984_v12 = vmax.f32 %v1960_v45, 0.0 }
 0x76b   :  { %v1965_v27 = vpop.f32.mrf.mxu1 }
 0x76c   :  { %v1985_v22 = vmax.f32 %v1962_v47, 0.0  ;;  %v2026_v52 = vpack.c.bf16 %v1984_v12, %v1982_v30  ;;  %v1966_v1 = vadd.f32 %v1965_v27, %v1814_v5 }
 0x76d   :  { %v1967_v56 = vpop.f32.mrf.mxu1 }
 0x76e   :  { %v2027_v21 = vpack.c.bf16 %v1985_v22, %v1983_v49  ;;  %v1968_v58 = vadd.f32 %v1967_v56, %v1818_v3  ;;  %v1986_v14 = vmax.f32 %v1966_v1, 0.0 }
 0x76f   :  { %v1969_v57 = vpop.f32.mrf.mxu1 }
 0x770   :  { %v1970_v59 = vadd.f32 %v1969_v57, %v1814_v5  ;;  %2181 = vmatprep.mubr.bf16.mxu0 %v2027_v21  ;;  %v1987_v10 = vmax.f32 %v1968_v58, 0.0 }
 0x771   :  { %v1971_v2 = vpop.f32.mrf.mxu1  ;;  %2182 = vmatmul.mubr.bf16.gmra.mxu0 %v2026_v52 }
 0x772   :  { %v1972_v8 = vadd.f32 %v1971_v2, %v1818_v3  ;;  %v1988_v9 = vmax.f32 %v1970_v59, 0.0 }
 0x774   :  { %v1989_v11 = vmax.f32 %v1972_v8, 0.0  ;;  %v2028_v17 = vpack.c.bf16 %v1988_v9, %v1986_v14 }
 0x776   :  { %v2029_v16 = vpack.c.bf16 %v1989_v11, %v1987_v10 }
 0x778   :  { %2189 = vmatprep.mubr.bf16.mxu0 %v2029_v16 }
 0x779   :  { %2190 = vmatmul.mubr.bf16.gmra.mxu0 %v2028_v17 }
 0x77a   :  { %3065 = vmatprep.mubr.bf16.mxu0 %v7218_v0 }
 0x821   :  { %v5748_v18 = vpop.f32.mrf.mxu0 }
 0x823   :  { %v5749_v20 = vpop.f32.mrf.mxu0 }
 0x824   :  { %v5750_v53 = vadd.f32 %v5749_v20, %v5748_v18 }
 0x825   :  { %v5751_v23 = vpop.f32.mrf.mxu0 }
 0x826   :  { %v2168_v24 = vadd.f32 %v5750_v53, %v5422_v19 }
 0x827   :  { %v5752_v5 = vpop.f32.mrf.mxu0 }
 0x828   :  { %v5753_v62 = vadd.f32 %v5752_v5, %v5751_v23  ;;  %v2198_v3 = vadd.f32 %v2168_v24, %v7694_v36 }
 0x829   :  { %v5754_v25 = vpop.f32.mrf.mxu0 }
 0x82a   :  { %v2171_v28 = vadd.f32 %v5753_v62, %v5422_v19  ;;  %2208 = vadd.xlane.f32.xlu0 %v2198_v3 }
 0x82b   :  { %v5755_v29 = vpop.f32.mrf.mxu0 }
 0x82c   :  { %v5756_v31 = vadd.f32 %v5755_v29, %v5754_v25  ;;  %v2199_v34 = vadd.f32 %v2171_v28, %v7696_v38 }
 0x82d   :  { %v5757_v35 = vpop.f32.mrf.mxu0 }
 0x82e   :  { %v2176_v50 = vadd.f32 %v5756_v31, %v5422_v19  ;;  %2210 = vadd.xlane.f32.xlu0 %v2199_v34 }
 0x82f   :  { %v5758_v13 = vpop.f32.mrf.mxu0 }
 0x830   :  { %v5759_v63 = vadd.f32 %v5758_v13, %v5757_v35  ;;  %v2200_v44 = vadd.f32 %v2176_v50, %v7704_v7 }
 0x831   :  { %v5760_v39 = vpop.f32.mrf.mxu0 }
 0x832   :  { %v2179_v40 = vadd.f32 %v5759_v63, %v5422_v19  ;;  %2212 = vadd.xlane.f32.xlu1 %v2200_v44  ;;  %v6552_v63 = vld [vmem:[%s8716_s14 + $0x234] ss:$40 sps:$4 sm:$0xff]  }
 0x833   :  { %v5761_v41 = vpop.f32.mrf.mxu0  ;;  %2992 = vmatprep.subr.bf16.mxu1 %v6552_v63 }
 0x834   :  { %v5762_v6 = vadd.f32 %v5761_v41, %v5760_v39  ;;  %v2201_v36 = vadd.f32 %v2179_v40, %v7702_v51  ;;  %v6550_v39 = vld [vmem:[%s8716_s14 + $0x230] ss:$40 sps:$4 sm:$0xff]   ;;  %v6558_v41 = vld [vmem:[%s8716_s14 + $0x1e4] ss:$40 sps:$4 sm:$0xff]  }
 0x835   :  { %v5763_v61 = vpop.f32.mrf.mxu0  ;;  %v6553_v40 = vld [vmem:[%s8716_s14 + $0x238] ss:$40 sps:$4 sm:$0xff]   ;;  %2993 = vmatpush1.bf16.msra.mxu1 %v6550_v39 }
 0x836   :  { %v2184_v43 = vadd.f32 %v5762_v6, %v5422_v19  ;;  %2214 = vadd.xlane.f32.xlu1 %v2201_v36  ;;  %v6561_v6 = vld [vmem:[%s8716_s14 + $0x1ec] ss:$40 sps:$4 sm:$0xff]   ;;  %2994 = vmatprep.subr.bf16.mxu1 %v6558_v41 }
 0x837   :  { %v5764_v4 = vpop.f32.mrf.mxu0 }
 0x838   :  { %v5765_v45 = vadd.f32 %v5764_v4, %v5763_v61  ;;  %v2202_v38 = vadd.f32 %v2184_v43, %v7712_v48  ;;  %v6559_v61 = vld [vmem:[%s8716_s14 + $0x1e8] ss:$40 sps:$4 sm:$0xff]   ;;  %v6564_v43 = vld [vmem:[%s8716_s14 + $0x194] ss:$40 sps:$4 sm:$0xff]  }
 0x839   :  { %v5766_v46 = vpop.f32.mrf.mxu0  ;;  %v6567_v4 = vld [vmem:[%s8716_s14 + $0x19c] ss:$40 sps:$4 sm:$0xff]  }
 0x83a   :  { %v2187_v15 = vadd.f32 %v5765_v45, %v5422_v19  ;;  %2216 = vadd.xlane.f32.xlu0 %v2202_v38  ;;  %v6562_v45 = vld [vmem:[%s8716_s14 + $0x190] ss:$40 sps:$4 sm:$0xff]  }
 0x83b   :  { %v5767_v47 = vpop.f32.mrf.mxu0 }
 0x83c   :  { %v5768_v12 = vadd.f32 %v5767_v47, %v5766_v46  ;;  %v2203_v7 = vadd.f32 %v2187_v15, %v7714_v26  ;;  %v6570_v46 = vld [vmem:[%s8716_s14 + $0x144] ss:$40 sps:$4 sm:$0xff]   ;;  %v6568_v47 = vld [vmem:[%s8716_s14 + $0x140] ss:$40 sps:$4 sm:$0xff]  }
 0x83d   :  { %v5769_v27 = vpop.f32.mrf.mxu0  ;;  %v6573_v15 = vld [vmem:[%s8716_s14 + $0x14c] ss:$40 sps:$4 sm:$0xff]  }
 0x83e   :  { %v2192_v49 = vadd.f32 %v5768_v12, %v5422_v19  ;;  %2218 = vadd.xlane.f32.xlu1 %v2203_v7  ;;  %v6571_v12 = vld [vmem:[%s8716_s14 + $0x148] ss:$40 sps:$4 sm:$0xff]  }
 0x83f   :  { %v5770_v22 = vpop.f32.mrf.mxu0 }
 0x840   :  { %v5771_v30 = vadd.f32 %v5770_v22, %v5769_v27  ;;  %v2204_v51 = vadd.f32 %v2192_v49, %v7722_v55  ;;  %v6579_v27 = vld [vmem:[%s8716_s14 + $0xfc] ss:$40 sps:$4 sm:$0xff]   ;;  %v6574_v49 = vld [vmem:[%s8716_s14 + $0xf0] ss:$40 sps:$4 sm:$0xff]  }
 0x841   :  { %v6577_v22 = vld [vmem:[%s8716_s14 + $0xf8] ss:$40 sps:$4 sm:$0xff]  }
 0x842   :  { %v2195_v56 = vadd.f32 %v5771_v30, %v5422_v19  ;;  %2220 = vadd.xlane.f32.xlu0 %v2204_v51  ;;  %v6582_v30 = vld [vmem:[%s8716_s14 + $0xa4] ss:$40 sps:$4 sm:$0xff]  }
 0x844   :  { %v2205_v21 = vadd.f32 %v2195_v56, %v7720_v54  ;;  %v6580_v56 = vld [vmem:[%s8716_s14 + $0xa0] ss:$40 sps:$4 sm:$0xff]  }
 0x846   :  { %2222 = vadd.xlane.f32.xlu1 %v2205_v21 }
 0x8b3   :  { %v2209_v48 = vpop.xlane.xlu0 %2208 }
 0x8b4   :  { %v2224_v52 = vmul.f32 0.0078125, %v2209_v48  ;;  %v6588_v48 = vld [vmem:[%s8716_s14 + $0x54] ss:$40 sps:$4 sm:$0xff]  }
 0x8b6   :  { %v7741_v57 = vsub.f32 %v2198_v3, %v2224_v52  ;;  %v6591_v52 = vld [vmem:[%s8716_s14 + $0x5c] ss:$40 sps:$4 sm:$0xff]  }
 0x8b7   :  { %v2211_v58 = vpop.xlane.xlu0 %2210 }
 0x8b8   :  { %v2225_v59 = vmul.f32 0.0078125, %v2211_v58  ;;  %v2240_v26 = vmul.f32 %v7741_v57, %v7741_v57  ;;  %v6586_v58 = vld [vmem:[%s8716_s14 + $0x50] ss:$40 sps:$4 sm:$0xff]  }
 0x8ba   :  { %v7745_v1 = vsub.f32 %v2199_v34, %v2225_v59  ;;  %2248 = vadd.xlane.f32.xlu0 %v2240_v26  ;;  %v7772_v34 = vld [vmem:[%s8715_s13] sm:$0x1f] }
 0x8bb   :  { %v2213_v2 = vpop.xlane.xlu1 %2212  ;;  %v2359_v50 = vsel %vm2358_vm3, %v7772_v34, -inf  ;;  %v6589_v59 = vld [vmem:[%s8716_s14 + $0x58] ss:$40 sps:$4 sm:$0xff]   ;;  %v6594_v26 = vld [vmem:[%s8716_s14 + $0x4] ss:$40 sps:$4 sm:$0xff]  }
 0x8bc   :  { %v2226_v8 = vmul.f32 0.0078125, %v2213_v2  ;;  %v2241_v55 = vmul.f32 %v7745_v1, %v7745_v1  ;;  %v6597_v2 = vld [vmem:[%s8716_s14 + $0xc] ss:$40 sps:$4 sm:$0xff]  }
 0x8be   :  { %v7749_v9 = vsub.f32 %v2200_v44, %v2226_v8  ;;  %2250 = vadd.xlane.f32.xlu0 %v2241_v55  ;;  %v6555_v44 = vld [vmem:[%s8716_s14 + $0x23c] ss:$40 sps:$4 sm:$0xff]   ;;  %v6592_v8 = vld [vmem:[%s8716_s14] ss:$40 sps:$4 sm:$0xff]  }
 0x8bf   :  { %v2215_v54 = vpop.xlane.xlu1 %2214  ;;  %3033 = vmatprep.subr.bf16.mxu0 %v6555_v44  ;;  %v6595_v55 = vld [vmem:[%s8716_s14 + $0x8] ss:$40 sps:$4 sm:$0xff]  }
 0x8c0   :  { %v2227_v10 = vmul.f32 0.0078125, %v2215_v54  ;;  %v2242_v11 = vmul.f32 %v7749_v9, %v7749_v9  ;;  %3034 = vmatpush1.bf16.msra.mxu0 %v6553_v40  ;;  %v6600_v54 = vld [vmem:[%s8716_s14 + $0x244] ss:$40 sps:$4 sm:$0xff]  }
 0x8c1   :  { %3035 = vmatprep.subr.bf16.mxu0 %v6561_v6 }
 0x8c2   :  { %v7753_v14 = vsub.f32 %v2201_v36, %v2227_v10  ;;  %2252 = vadd.xlane.f32.xlu1 %v2242_v11  ;;  %v6556_v36 = vld [vmem:[%s8716_s14 + $0x1e0] ss:$40 sps:$4 sm:$0xff]   ;;  %v6603_v10 = vld [vmem:[%s8716_s14 + $0x24c] ss:$40 sps:$4 sm:$0xff]  }
 0x8c3   :  { %v2217_v16 = vpop.xlane.xlu0 %2216  ;;  %2995 = vmatpush1.bf16.msra.mxu1 %v6556_v36 }
 0x8c4   :  { %v2228_v17 = vmul.f32 0.0078125, %v2217_v16  ;;  %v2243_v18 = vmul.f32 %v7753_v14, %v7753_v14  ;;  %3036 = vmatpush1.bf16.msra.mxu0 %v6559_v61  ;;  %2996 = vmatprep.subr.bf16.mxu1 %v6564_v43 }
 0x8c5   :  { %3037 = vmatprep.subr.bf16.mxu0 %v6567_v4 }
 0x8c6   :  { %v7757_v19 = vsub.f32 %v2202_v38, %v2228_v17  ;;  %2254 = vadd.xlane.f32.xlu1 %v2243_v18  ;;  %v6565_v38 = vld [vmem:[%s8716_s14 + $0x198] ss:$40 sps:$4 sm:$0xff]  }
 0x8c7   :  { %v2219_v20 = vpop.xlane.xlu1 %2218  ;;  %2997 = vmatpush1.bf16.msra.mxu1 %v6562_v45 }
 0x8c8   :  { %v2229_v53 = vmul.f32 0.0078125, %v2219_v20  ;;  %v2244_v23 = vmul.f32 %v7757_v19, %v7757_v19  ;;  %3038 = vmatpush1.bf16.msra.mxu0 %v6565_v38  ;;  %2998 = vmatprep.subr.bf16.mxu1 %v6570_v46 }
 0x8c9   :  { %3039 = vmatprep.subr.bf16.mxu0 %v6573_v15  ;;  %v5439_v15 = vld [vmem:[#allocation18] ss:$0 sm:$0xff] }
 0x8ca   :  { %v7761_v24 = vsub.f32 %v2203_v7, %v2229_v53  ;;  %2256 = vadd.xlane.f32.xlu0 %v2244_v23  ;;  %v6576_v7 = vld [vmem:[%s8716_s14 + $0xf4] ss:$40 sps:$4 sm:$0xff]  }
 0x8cb   :  { %v2221_v5 = vpop.xlane.xlu0 %2220  ;;  %2999 = vmatpush1.bf16.msra.mxu1 %v6568_v47 }
 0x8cc   :  { %v2230_v62 = vmul.f32 0.0078125, %v2221_v5  ;;  %v2245_v3 = vmul.f32 %v7761_v24, %v7761_v24  ;;  %3040 = vmatpush1.bf16.msra.mxu0 %v6571_v12  ;;  %3000 = vmatprep.subr.bf16.mxu1 %v6576_v7 }
 0x8cd   :  { %3041 = vmatprep.subr.bf16.mxu0 %v6579_v27 }
 0x8ce   :  { %v7765_v25 = vsub.f32 %v2204_v51, %v2230_v62  ;;  %2258 = vadd.xlane.f32.xlu1 %v2245_v3  ;;  %v6585_v51 = vld [vmem:[%s8716_s14 + $0xac] ss:$40 sps:$4 sm:$0xff]  }
 0x8cf   :  { %v2223_v28 = vpop.xlane.xlu1 %2222  ;;  %3001 = vmatpush1.bf16.msra.mxu1 %v6574_v49 }
 0x8d0   :  { %v2231_v29 = vmul.f32 0.0078125, %v2223_v28  ;;  %v2246_v31 = vmul.f32 %v7765_v25, %v7765_v25  ;;  %3042 = vmatpush1.bf16.msra.mxu0 %v6577_v22  ;;  %3002 = vmatprep.subr.bf16.mxu1 %v6582_v30 }
 0x8d1   :  { %3043 = vmatprep.subr.bf16.mxu0 %v6585_v51 }
 0x8d2   :  { %v7774_v35 = vsub.f32 %v2205_v21, %v2231_v29  ;;  %2260 = vadd.xlane.f32.xlu0 %v2246_v31  ;;  %v6583_v21 = vld [vmem:[%s8716_s14 + $0xa8] ss:$40 sps:$4 sm:$0xff]  }
 0x8d3   :  { %3003 = vmatpush1.bf16.msra.mxu1 %v6580_v56  ;;  %v5440_v56 = vld [vmem:[#allocation19] ss:$0 sm:$0xff] }
 0x8d4   :  { %v2247_v13 = vmul.f32 %v7774_v35, %v7774_v35  ;;  %3044 = vmatpush1.bf16.msra.mxu0 %v6583_v21  ;;  %3004 = vmatprep.subr.bf16.mxu1 %v6588_v48 }
 0x8d5   :  { %3045 = vmatprep.subr.bf16.mxu0 %v6591_v52 }
 0x8d6   :  { %2262 = vadd.xlane.f32.xlu1 %v2247_v13  ;;  %2360 = vmax.xlane.f32.xlu0 %v2359_v50 }
 0x8d7   :  { %3005 = vmatpush1.bf16.msra.mxu1 %v6586_v58 }
 0x8d8   :  { %3046 = vmatpush1.bf16.msra.mxu0 %v6589_v59  ;;  %3006 = vmatprep.subr.bf16.mxu1 %v6594_v26 }
 0x8d9   :  { %3047 = vmatprep.subr.bf16.mxu0 %v6597_v2 }
 0x8db   :  { %3007 = vmatpush1.bf16.msra.mxu1 %v6592_v8 }
 0x8dc   :  { %3048 = vmatpush1.bf16.msra.mxu0 %v6595_v55  ;;  %3074 = vmatprep.subr.bf16.mxu1 %v6600_v54 }
 0x8dd   :  { %3115 = vmatprep.subr.bf16.mxu0 %v6603_v10 }
 0x943   :  { %v2249_v11 = vpop.xlane.xlu0 %2248 }
 0x944   :  { %v2264_v20 = vmul.f32 0.0078125, %v2249_v11 }
 0x946   :  { %v2272_v62 = vadd.f32 1e-12, %v2264_v20 }
 0x947   :  { %v2251_v16 = vpop.xlane.xlu0 %2250 }
 0x948   :  { %v2265_v17 = vmul.f32 0.0078125, %v2251_v16 }
 0x94a   :  { %v2273_v18 = vadd.f32 1e-12, %v2265_v17 }
 0x94b   :  { %v2253_v53 = vpop.xlane.xlu1 %2252 }
 0x94c   :  { %v2266_v23 = vmul.f32 0.0078125, %v2253_v53  ;;  %6855 = vrsqrt.f32 %v2273_v18 }
 0x94e   :  { %v2274_v5 = vadd.f32 1e-12, %v2266_v23 }
 0x94f   :  { %v2255_v3 = vpop.xlane.xlu1 %2254 }
 0x950   :  { %6857 = vrsqrt.f32 %v2274_v5  ;;  %v2267_v28 = vmul.f32 0.0078125, %v2255_v3 }
 0x951   :  { %6859 = vrsqrt.f32 %v2272_v62 }
 0x952   :  { %v2275_v29 = vadd.f32 1e-12, %v2267_v28 }
 0x953   :  { %v2257_v31 = vpop.xlane.xlu0 %2256 }
 0x954   :  { %6861 = vrsqrt.f32 %v2275_v29  ;;  %v2268_v50 = vmul.f32 0.0078125, %v2257_v31 }
 0x956   :  { %v2276_v13 = vadd.f32 1e-12, %v2268_v50 }
 0x957   :  { %v2259_v63 = vpop.xlane.xlu1 %2258 }
 0x958   :  { %6863 = vrsqrt.f32 %v2276_v13  ;;  %v2269_v44 = vmul.f32 0.0078125, %v2259_v63 }
 0x959   :  { %v6856_v39 = vpop.eup %6855 }
 0x95a   :  { %v2277_v40 = vadd.f32 1e-12, %v2269_v44  ;;  %v2289_v61 = vmul.f32 %v6856_v39, %v7745_v1 }
 0x95b   :  { %v2261_v41 = vpop.xlane.xlu0 %2260 }
 0x95c   :  { %6865 = vrsqrt.f32 %v2277_v40  ;;  %v2270_v6 = vmul.f32 0.0078125, %v2261_v41  ;;  %v2303_v12 = vmul.f32 %v5439_v15, %v2289_v61 }
 0x95d   :  { %v6858_v36 = vpop.eup %6857 }
 0x95e   :  { %v2290_v43 = vmul.f32 %v6858_v36, %v7749_v9  ;;  %v2278_v4 = vadd.f32 1e-12, %v2270_v6  ;;  %v6860_v46 = vpop.eup %6859  ;;  %v7887_v9 = vld [vmem:[#allocation6] sm:$0xff]  ;;  %v2317_v58 = vadd.f32 %v5440_v56, %v2303_v12 }
 0x95f   :  { %v2263_v45 = vpop.xlane.xlu1 %2262  ;;  %v2361_v38 = vpop.xlane.xlu0 %2360  ;;  %v2288_v30 = vmul.f32 %v6860_v46, %v7741_v57  ;;  %v2326_v52 = vrot.slane %v7887_v9, 1  ;;  %v2327_v59 = vrot.slane %v7887_v9, 2  ;;  %v2329_v8 = vrot.slane %v7887_v9, 4 }
 0x960   :  { %6867 = vrsqrt.f32 %v2278_v4  ;;  %v2271_v7 = vmul.f32 0.0078125, %v2263_v45  ;;  %v2362_v27 = vsub.f32 %v7772_v34, %v2361_v38  ;;  %v2304_v49 = vmul.f32 %v5439_v15, %v2290_v43 }
 0x961   :  { %v6862_v47 = vpop.eup %6861  ;;  %v2302_v2 = vmul.f32 %v5439_v15, %v2288_v30  ;;  %v2342_v10 = vmul.f32 %v2326_v52, %v2317_v58  ;;  %v2331_v63 = vrot.slane %v7887_v9, 6  ;;  %v2332_v46 = vrot.slane %v7887_v9, 7 }
 0x962   :  { %v2291_v22 = vmul.f32 %v6862_v47, %v7753_v14  ;;  %v2279_v51 = vadd.f32 1e-12, %v2271_v7  ;;  %v2363_v1 = vmul.f32 1.442695, %v2362_v27  ;;  %v2318_v26 = vadd.f32 %v5440_v56, %v2304_v49 }
 0x963   :  { %v2328_v14 = vrot.slane %v7887_v9, 3  ;;  %v2316_v17 = vadd.f32 %v5440_v56, %v2302_v2  ;;  %v2350_v5 = vmul.f32 2.0, %v2342_v10 }
 0x964   :  { %v2305_v21 = vmul.f32 %v5439_v15, %v2291_v22  ;;  %6869 = vrsqrt.f32 %v2279_v51  ;;  %v2343_v11 = vmul.f32 %v2327_v59, %v2318_v26 }
 0x965   :  { %v6864_v48 = vpop.eup %6863  ;;  %6871 = vpow2.f32 %v2363_v1  ;;  %v2341_v29 = vmul.f32 %v7887_v9, %v2316_v17  ;;  %v2492_v39 = vpack.c.bf16 %v2350_v5, %v2350_v5 }
 0x966   :  { %v2292_v34 = vmul.f32 %v6864_v48, %v7757_v19  ;;  %v2319_v57 = vadd.f32 %v5440_v56, %v2305_v21  ;;  %v2330_v19 = vrot.slane %v7887_v9, 5  ;;  %v2351_v3 = vmul.f32 2.0, %v2343_v11 }
 0x967   :  { %v2349_v36 = vmul.f32 2.0, %v2341_v29  ;;  %v2562_v47 = vunpack.c.l.b16 %v2492_v39  ;;  %v6612_v29 = vld [vmem:[%s8716_s14 + $0x1a4] ss:$40 sps:$4 sm:$0xff]   ;;  %v6616_v39 = vld [vmem:[%s8716_s14 + $0x150] ss:$40 sps:$4 sm:$0xff]  }
 0x968   :  { %v2306_v55 = vmul.f32 %v5439_v15, %v2292_v34  ;;  %v2344_v18 = vmul.f32 %v2328_v14, %v2319_v57  ;;  %v2493_v41 = vpack.c.bf16 %v2351_v3, %v2351_v3  ;;  %v6604_v3 = vld [vmem:[%s8716_s14 + $0x1f0] ss:$40 sps:$4 sm:$0xff]  }
 0x969   :  { %v6866_v54 = vpop.eup %6865  ;;  %v2491_v30 = vpack.c.bf16 %v2349_v36, %v2349_v36  ;;  %v2569_v48 = vrot.slane %v2562_v47, 7  ;;  %v6625_v36 = vld [vmem:[%s8716_s14 + $0x108] ss:$40 sps:$4 sm:$0xff]  }
 0x96a   :  { %v2320_v16 = vadd.f32 %v5440_v56, %v2306_v55  ;;  %v2293_v20 = vmul.f32 %v6866_v54, %v7761_v24  ;;  %v2352_v31 = vmul.f32 2.0, %v2344_v18  ;;  %v2563_v49 = vunpack.c.l.b16 %v2493_v41  ;;  %v6627_v41 = vld [vmem:[%s8716_s14 + $0x10c] ss:$40 sps:$4 sm:$0xff]   ;;  %v6634_v47 = vld [vmem:[%s8716_s14 + $0x60] ss:$40 sps:$4 sm:$0xff]  }
 0x96b   :  { %v2561_v26 = vunpack.c.l.b16 %v2491_v30  ;;  %v6648_v30 = vld [vmem:[%s8716_s14 + $0x254] ss:$40 sps:$4 sm:$0xff]  }
 0x96c   :  { %v2345_v53 = vmul.f32 %v2329_v8, %v2320_v16  ;;  %v2307_v62 = vmul.f32 %v5439_v15, %v2293_v20  ;;  %v2494_v61 = vpack.c.bf16 %v2352_v31, %v2352_v31  ;;  %v2572_v59 = vrot.slane %v2563_v49, 6  ;;  %v6598_v20 = vld [vmem:[%s8716_s14 + $0x240] ss:$40 sps:$4 sm:$0xff]   ;;  %v6615_v31 = vld [vmem:[%s8716_s14 + $0x1ac] ss:$40 sps:$4 sm:$0xff]  }
 0x96d   :  { %v6868_v23 = vpop.eup %6867  ;;  %v2571_v14 = vsel %vm2570_vm4, %v2569_v48, %v2561_v26  ;;  %v6640_v49 = vld [vmem:[%s8716_s14 + $0x10] ss:$40 sps:$4 sm:$0xff]   ;;  %v6658_v26 = vld [vmem:[%s8716_s14 + $0x160] ss:$40 sps:$4 sm:$0xff]  }
 0x96e   :  { %v2294_v28 = vmul.f32 %v6868_v23, %v7765_v25  ;;  %v2321_v50 = vadd.f32 %v5440_v56, %v2307_v62  ;;  %v2353_v13 = vmul.f32 2.0, %v2345_v53  ;;  %v2564_v51 = vunpack.c.l.b16 %v2494_v61  ;;  %v6601_v53 = vld [vmem:[%s8716_s14 + $0x248] ss:$40 sps:$4 sm:$0xff]   ;;  %v6609_v62 = vld [vmem:[%s8716_s14 + $0x1fc] ss:$40 sps:$4 sm:$0xff]  }
 0x96f   :  { %v2574_v55 = vsel %vm2573_vm5, %v2572_v59, %v2571_v14  ;;  %v6630_v61 = vld [vmem:[%s8716_s14 + $0xb4] ss:$40 sps:$4 sm:$0xff]   ;;  %v6657_v59 = vld [vmem:[%s8718_s16 + $0x28] sm:$0xff]  }
 0x970   :  { %v2308_v44 = vmul.f32 %v5439_v15, %v2294_v28  ;;  %v2346_v40 = vmul.f32 %v2330_v19, %v2321_v50  ;;  %v2495_v25 = vpack.c.bf16 %v2353_v13, %v2353_v13  ;;  %v6606_v19 = vld [vmem:[%s8716_s14 + $0x1f4] ss:$40 sps:$4 sm:$0xff]   ;;  %v6607_v28 = vld [vmem:[%s8716_s14 + $0x1f8] ss:$40 sps:$4 sm:$0xff]   ;;  %v6613_v13 = vld [vmem:[%s8716_s14 + $0x1a8] ss:$40 sps:$4 sm:$0xff]  }
 0x971   :  { %v6870_v24 = vpop.eup %6869  ;;  %v6610_v50 = vld [vmem:[%s8716_s14 + $0x1a0] ss:$40 sps:$4 sm:$0xff]   ;;  %v6653_v48 = vld [vmem:[%s8718_s16 + $0x30] sm:$0xff]   ;;  %v6665_v14 = vld [vmem:[%s8718_s16 + $0x18] sm:$0xff]  }
 0x972   :  { %v2322_v6 = vadd.f32 %v5440_v56, %v2308_v44  ;;  %v2354_v43 = vmul.f32 2.0, %v2346_v40  ;;  %v2295_v4 = vmul.f32 %v6870_v24, %v7774_v35  ;;  %v7900_v45 = vpop.eup %6871  ;;  %v2565_v21 = vunpack.c.l.b16 %v2495_v25  ;;  %v6621_v44 = vld [vmem:[%s8716_s14 + $0x15c] ss:$40 sps:$4 sm:$0xff]   ;;  %v6619_v40 = vld [vmem:[%s8716_s14 + $0x158] ss:$40 sps:$4 sm:$0xff]  }
 0x973   :  { %v2365_v27 = vsel %vm2358_vm3, %v7900_v45, 0.0  ;;  %v6624_v24 = vld [vmem:[%s8716_s14 + $0x104] ss:$40 sps:$4 sm:$0xff]   ;;  %v6631_v25 = vld [vmem:[%s8716_s14 + $0xb8] ss:$40 sps:$4 sm:$0xff]  }
 0x974   :  { %v2347_v38 = vmul.f32 %v2331_v63, %v2322_v6  ;;  %v2496_v12 = vpack.c.bf16 %v2354_v43, %v2354_v43  ;;  %v2309_v7 = vmul.f32 %v5439_v15, %v2295_v4  ;;  %2366 = vadd.xlane.f32.xlu1 %v2365_v27  ;;  %v2575_v15 = vrot.slane %v2564_v51, 5  ;;  %v6618_v63 = vld [vmem:[%s8716_s14 + $0x154] ss:$40 sps:$4 sm:$0xff]   ;;  %v6622_v6 = vld [vmem:[%s8716_s14 + $0x100] ss:$40 sps:$4 sm:$0xff]  }
 0x975   :  { %v2578_v2 = vrot.slane %v2565_v21, 4  ;;  %v6633_v43 = vld [vmem:[%s8716_s14 + $0xbc] ss:$40 sps:$4 sm:$0xff]   ;;  %v6628_v4 = vld [vmem:[%s8716_s14 + $0xb0] ss:$40 sps:$4 sm:$0xff]  }
 0x976   :  { %v2355_v22 = vmul.f32 2.0, %v2347_v38  ;;  %v2323_v1 = vadd.f32 %v5440_v56, %v2309_v7  ;;  %v2566_v52 = vunpack.c.l.b16 %v2496_v12  ;;  %v2577_v54 = vsel %vm2576_vm6, %v2575_v15, %v2574_v55  ;;  %v6636_v38 = vld [vmem:[%s8716_s14 + $0x64] ss:$40 sps:$4 sm:$0xff]   ;;  %v6637_v12 = vld [vmem:[%s8716_s14 + $0x68] ss:$40 sps:$4 sm:$0xff]  }
 0x977   :  { %v2580_v11 = vsel %vm2579_vm7, %v2578_v2, %v2577_v54  ;;  %v6642_v7 = vld [vmem:[%s8716_s14 + $0x14] ss:$40 sps:$4 sm:$0xff]   ;;  %v6646_v51 = vld [vmem:[%s8716_s14 + $0x250] ss:$40 sps:$4 sm:$0xff]   ;;  %v6652_v21 = vld [vmem:[%s8716_s14 + $0x204] ss:$40 sps:$4 sm:$0xff]  }
 0x978   :  { %v2497_v35 = vpack.c.bf16 %v2355_v22, %v2355_v22  ;;  %v2348_v58 = vmul.f32 %v2332_v46, %v2323_v1  ;;  %v2581_v57 = vrot.slane %v2566_v52, 3  ;;  %v6639_v46 = vld [vmem:[%s8716_s14 + $0x6c] ss:$40 sps:$4 sm:$0xff]   ;;  %v6645_v27 = vld [vmem:[%s8716_s14 + $0x1c] ss:$40 sps:$4 sm:$0xff]  }
 0x979   :  { %v6643_v22 = vld [vmem:[%s8716_s14 + $0x18] ss:$40 sps:$4 sm:$0xff]   ;;  %v6656_v52 = vld [vmem:[%s8716_s14 + $0x1b4] ss:$40 sps:$4 sm:$0xff]  }
 0x97a   :  { %v2567_v9 = vunpack.c.l.b16 %v2497_v35  ;;  %v2356_v34 = vmul.f32 2.0, %v2348_v58  ;;  %v2583_v16 = vsel %vm2582_vm8, %v2581_v57, %v2580_v11  ;;  %v6649_v1 = vld [vmem:[%s8718_s16 + $0x38] sm:$0xff]   ;;  %v6650_v35 = vld [vmem:[%s8716_s14 + $0x200] ss:$40 sps:$4 sm:$0xff]   ;;  %v6668_v57 = vld [vmem:[%s8716_s14 + $0xc4] ss:$40 sps:$4 sm:$0xff]  }
 0x97b   :  { %v6654_v58 = vld [vmem:[%s8716_s14 + $0x1b0] ss:$40 sps:$4 sm:$0xff]   ;;  %v6661_v15 = vld [vmem:[%s8718_s16 + $0x20] sm:$0xff]  }
 0x97c   :  { %v2498_v8 = vpack.c.bf16 %v2356_v34, %v2356_v34  ;;  %v2584_v56 = vrot.slane %v2567_v9, 2  ;;  %v6660_v9 = vld [vmem:[%s8716_s14 + $0x164] ss:$40 sps:$4 sm:$0xff]   ;;  %v6664_v34 = vld [vmem:[%s8716_s14 + $0x114] ss:$40 sps:$4 sm:$0xff]  }
 0x97d   :  { %v6662_v2 = vld [vmem:[%s8716_s14 + $0x110] ss:$40 sps:$4 sm:$0xff]   ;;  %v6676_v11 = vld [vmem:[%s8716_s14 + $0x24] ss:$40 sps:$4 sm:$0xff]  }
 0x97e   :  { %v2568_v10 = vunpack.c.l.b16 %v2498_v8  ;;  %v2586_v18 = vsel %vm2585_vm9, %v2584_v56, %v2583_v16  ;;  %v6666_v8 = vld [vmem:[%s8716_s14 + $0xc0] ss:$40 sps:$4 sm:$0xff]   ;;  %v6669_v55 = vld [vmem:[%s8718_s16 + $0x10] sm:$0xff]  }
 0x97f   :  { %v6672_v56 = vld [vmem:[%s8716_s14 + $0x74] ss:$40 sps:$4 sm:$0xff]   ;;  %v6670_v54 = vld [vmem:[%s8716_s14 + $0x70] ss:$40 sps:$4 sm:$0xff]   ;;  %v6674_v16 = vld [vmem:[%s8716_s14 + $0x20] ss:$40 sps:$4 sm:$0xff]  }
 0x980   :  { %v2587_v17 = vrot.slane %v2568_v10, 1  ;;  %v6673_v10 = vld [vmem:[%s8718_s16 + $0x8] sm:$0xff]   ;;  %s7227_s14 = smov 120  }
 0x982   :  { %v2589_v23 = vsel %vm2588_vm10, %v2587_v17, %v2586_v18  ;;  %v6677_v17 = vld [vmem:[%s8718_s16] sm:$0xff]   ;;  %v6678_v18 = vld [vmem:[%s8720_s18 + $0x38] sm:$0xff]  }
 0x983   :  { %v7911_v5 = vpack.c.b16 %v2589_v23, %v2589_v23  ;;  %v6681_v23 = vld [vmem:[%s8720_s18 + $0x70] sm:$0xff]  }
 0x985   :  { %3025 = vmatmul.mubr.bf16.vlgmr.msra.gmra.mxu1 %v7911_v5  ;;  %3066 = vmatmul.mubr.bf16.vlgmr.msra.gmra.mxu0 %v7911_v5 }
 0x986   :  { %3075 = vmatpush1.bf16.msra.mxu1 %v6598_v20  ;;  %3116 = vmatpush1.bf16.msra.mxu0 %v6601_v53  ;;  %v6679_v20 = vld [vmem:[%s8720_s18 + $0x78] sm:$0xff]   ;;  %v6680_v53 = vld [vmem:[%s8720_s18 + $0x30] sm:$0xff]  }
 0x987   :  { %3076 = vmatprep.subr.bf16.mxu1 %v6606_v19  ;;  %3117 = vmatprep.subr.bf16.mxu0 %v6609_v62  ;;  %v6682_v19 = vld [vmem:[%s8720_s18 + $0x28] sm:$0xff]  }
 0x988   :  { %3106 = vmatprep.mubr.bf16.mxu1 %v7218_v0  ;;  %3147 = vmatprep.mubr.bf16.mxu0 %v7218_v0  ;;  %v6683_v62 = vld [vmem:[%s8720_s18 + $0x68] sm:$0xff]  }
 0x98a   :  { %3077 = vmatpush1.bf16.msra.mxu1 %v6604_v3  ;;  %3118 = vmatpush1.bf16.msra.mxu0 %v6607_v28  ;;  %v6684_v3 = vld [vmem:[%s8720_s18 + $0x20] sm:$0xff]  }
 0x98b   :  { %3078 = vmatprep.subr.bf16.mxu1 %v6612_v29  ;;  %3119 = vmatprep.subr.bf16.mxu0 %v6615_v31  ;;  %v6685_v28 = vld [vmem:[%s8720_s18 + $0x60] sm:$0xff]   ;;  %v6686_v29 = vld [vmem:[%s8720_s18 + $0x18] sm:$0xff]  }
 0x98c   :  { %v6687_v31 = vld [vmem:[%s8720_s18 + $0x58] sm:$0xff]  }
 0x98e   :  { %3079 = vmatpush1.bf16.msra.mxu1 %v6610_v50  ;;  %3120 = vmatpush1.bf16.msra.mxu0 %v6613_v13  ;;  %v7222_v50 = vmov 1   ;;  %v6688_v13 = vld [vmem:[%s8720_s18 + $0x10] sm:$0xff]  }
 0x98f   :  { %3080 = vmatprep.subr.bf16.mxu1 %v6618_v63  ;;  %3121 = vmatprep.subr.bf16.mxu0 %v6621_v44  ;;  %v6689_v63 = vld [vmem:[%s8720_s18 + $0x50] sm:$0xff]   ;;  %v6690_v44 = vld [vmem:[%s8720_s18 + $0x8] sm:$0xff]  }
 0x990   :  { %6451 = vset.pattern.permute.xlu1 %v7222_v50 }
 0x992   :  { %3081 = vmatpush1.bf16.msra.mxu1 %v6616_v39  ;;  %3122 = vmatpush1.bf16.msra.mxu0 %v6619_v40  ;;  %v6691_v39 = vld [vmem:[%s8720_s18 + $0x48] sm:$0xff]   ;;  %v6692_v40 = vld [vmem:[%s8720_s18] sm:$0xff]  }
 0x993   :  { %3082 = vmatprep.subr.bf16.mxu1 %v6624_v24  ;;  %3123 = vmatprep.subr.bf16.mxu0 %v6627_v41  ;;  %v6693_v24 = vld [vmem:[%s8720_s18 + $0x40] sm:$0xff]  }
 0x996   :  { %3083 = vmatpush1.bf16.msra.mxu1 %v6622_v6  ;;  %3124 = vmatpush1.bf16.msra.mxu0 %v6625_v36 }
 0x997   :  { %3084 = vmatprep.subr.bf16.mxu1 %v6630_v61  ;;  %3125 = vmatprep.subr.bf16.mxu0 %v6633_v43 }
 0x99a   :  { %3085 = vmatpush1.bf16.msra.mxu1 %v6628_v4  ;;  %3126 = vmatpush1.bf16.msra.mxu0 %v6631_v25 }
 0x99b   :  { %3086 = vmatprep.subr.bf16.mxu1 %v6636_v38  ;;  %3127 = vmatprep.subr.bf16.mxu0 %v6639_v46 }
 0x99e   :  { %3087 = vmatpush1.bf16.msra.mxu1 %v6634_v47  ;;  %3128 = vmatpush1.bf16.msra.mxu0 %v6637_v12 }
 0x99f   :  { %3088 = vmatprep.subr.bf16.mxu1 %v6642_v7  ;;  %3129 = vmatprep.subr.bf16.mxu0 %v6645_v27 }
 0x9a2   :  { %3089 = vmatpush1.bf16.msra.mxu1 %v6640_v49  ;;  %3130 = vmatpush1.bf16.msra.mxu0 %v6643_v22  ;;  %v7223_v49 = vmov 2  }
 0x9a3   :  { %3156 = vmatprep.subr.bf16.mxu1 %v6648_v30  ;;  %6071 = vmatprep.subr.bf16.mxu0 %v7219_v37 }
 0x9a5   :  { %3107 = vmatmul.mubr.bf16.vlgmr.msra.gmra.mxu1 %v7911_v5  ;;  %3148 = vmatmul.mubr.bf16.vlgmr.msra.gmra.mxu0 %v7911_v5 }
 0x9a6   :  { %3157 = vmatpush1.bf16.msra.mxu1 %v6646_v51  ;;  %6072 = vmatpush3.bf16.msra.mxu0 %v6649_v1 }
 0x9a7   :  { %3158 = vmatprep.subr.bf16.mxu1 %v6652_v21  ;;  %6073 = vmatprep.subr.bf16.mxu0 %v7219_v37 }
 0x9a8   :  { %3188 = vmatprep.mubr.bf16.mxu1 %v7218_v0  ;;  %6087 = vmatprep.mubr.msk.bf16.mxu0 %vm7220_vm0, %v7219_v37 }
 0x9aa   :  { %3159 = vmatpush1.bf16.msra.mxu1 %v6650_v35  ;;  %6074 = vmatpush3.bf16.msra.mxu0 %v6653_v48 }
 0x9ab   :  { %3160 = vmatprep.subr.bf16.mxu1 %v6656_v52  ;;  %6075 = vmatprep.subr.bf16.mxu0 %v7219_v37 }
 0x9ae   :  { %3161 = vmatpush1.bf16.msra.mxu1 %v6654_v58  ;;  %6076 = vmatpush3.bf16.msra.mxu0 %v6657_v59 }
 0x9af   :  { %3162 = vmatprep.subr.bf16.mxu1 %v6660_v9  ;;  %6077 = vmatprep.subr.bf16.mxu0 %v7219_v37 }
 0x9b2   :  { %3163 = vmatpush1.bf16.msra.mxu1 %v6658_v26  ;;  %6078 = vmatpush3.bf16.msra.mxu0 %v6661_v15 }
 0x9b3   :  { %3164 = vmatprep.subr.bf16.mxu1 %v6664_v34  ;;  %6079 = vmatprep.subr.bf16.mxu0 %v7219_v37  ;;  %v6694_v34 = vld [vmem:[%s8720_s18 + $0xb8] sm:$0xff]  }
 0x9b6   :  { %3165 = vmatpush1.bf16.msra.mxu1 %v6662_v2  ;;  %6080 = vmatpush3.bf16.msra.mxu0 %v6665_v14 }
 0x9b7   :  { %3166 = vmatprep.subr.bf16.mxu1 %v6668_v57  ;;  %6081 = vmatprep.subr.bf16.mxu0 %v7219_v37 }
 0x9ba   :  { %3167 = vmatpush1.bf16.msra.mxu1 %v6666_v8  ;;  %6082 = vmatpush3.bf16.msra.mxu0 %v6669_v55  ;;  %v6695_v55 = vld [vmem:[%s8720_s18 + $0xf8] sm:$0xff]  }
 0x9bb   :  { %3168 = vmatprep.subr.bf16.mxu1 %v6672_v56  ;;  %6083 = vmatprep.subr.bf16.mxu0 %v7219_v37 }
 0x9be   :  { %3169 = vmatpush1.bf16.msra.mxu1 %v6670_v54  ;;  %6084 = vmatpush3.bf16.msra.mxu0 %v6673_v10  ;;  %v6696_v54 = vld [vmem:[%s8720_s18 + $0xb0] sm:$0xff]  }
 0x9bf   :  { %3170 = vmatprep.subr.bf16.mxu1 %v6676_v11  ;;  %6085 = vmatprep.subr.bf16.mxu0 %v7219_v37  ;;  %v6697_v10 = vld [vmem:[%s8720_s18 + $0xf0] sm:$0xff]   ;;  %v6698_v11 = vld [vmem:[%s8720_s18 + $0xa8] sm:$0xff]  }
 0x9c2   :  { %3171 = vmatpush1.bf16.msra.mxu1 %v6674_v16  ;;  %6086 = vmatpush3.bf16.msra.mxu0 %v6677_v17  ;;  %v6699_v16 = vld [vmem:[%s8720_s18 + $0xe8] sm:$0xff]   ;;  %v6700_v17 = vld [vmem:[%s8720_s18 + $0xa0] sm:$0xff]  }
 0x9c3   :  { %6091 = vmatprep.subr.bf16.mxu1 %v7219_v37  ;;  %6111 = vmatprep.subr.bf16.mxu0 %v7219_v37 }
 0x9c5   :  { %3189 = vmatmul.mubr.bf16.vlgmr.msra.gmra.mxu1 %v7911_v5  ;;  %6088 = vmatmul.mubr.bf16.vlgmr.msra.gmra.mxu0 %v7911_v5 }
 0x9c6   :  { %6092 = vmatpush3.bf16.msra.mxu1 %v6678_v18  ;;  %6112 = vmatpush3.bf16.msra.mxu0 %v6679_v20  ;;  %v6701_v18 = vld [vmem:[%s8720_s18 + $0xe0] sm:$0xff]   ;;  %v6702_v20 = vld [vmem:[%s8720_s18 + $0x98] sm:$0xff]  }
 0x9c7   :  { %6093 = vmatprep.subr.bf16.mxu1 %v7219_v37  ;;  %6113 = vmatprep.subr.bf16.mxu0 %v7219_v37 }
 0x9c8   :  { %6107 = vmatprep.mubr.msk.bf16.mxu1 %vm7220_vm0, %v7219_v37  ;;  %6127 = vmatprep.mubr.msk.bf16.mxu0 %vm7220_vm0, %v7219_v37 }
 0x9ca   :  { %6094 = vmatpush3.bf16.msra.mxu1 %v6680_v53  ;;  %6114 = vmatpush3.bf16.msra.mxu0 %v6681_v23  ;;  %v2513_v53 = vsub.s32 2, %v7558_v32  ;;  %v6703_v23 = vld [vmem:[%s8720_s18 + $0xd8] sm:$0xff]  }
 0x9cb   :  { %6095 = vmatprep.subr.bf16.mxu1 %v7219_v37  ;;  %6115 = vmatprep.subr.bf16.mxu0 %v7219_v37 }
 0x9ce   :  { %6096 = vmatpush3.bf16.msra.mxu1 %v6682_v19  ;;  %6116 = vmatpush3.bf16.msra.mxu0 %v6683_v62  ;;  %v2517_v19 = vsub.s32 3, %v7558_v32  ;;  %v6704_v62 = vld [vmem:[%s8720_s18 + $0x90] sm:$0xff]  }
 0x9cf   :  { %6097 = vmatprep.subr.bf16.mxu1 %v7219_v37  ;;  %6117 = vmatprep.subr.bf16.mxu0 %v7219_v37 }
 0x9d2   :  { %6098 = vmatpush3.bf16.msra.mxu1 %v6684_v3  ;;  %6118 = vmatpush3.bf16.msra.mxu0 %v6685_v28  ;;  %v6705_v28 = vld [vmem:[%s8720_s18 + $0xd0] sm:$0xff]  }
 0x9d3   :  { %6099 = vmatprep.subr.bf16.mxu1 %v7219_v37  ;;  %6119 = vmatprep.subr.bf16.mxu0 %v7219_v37 }
 0x9d6   :  { %6100 = vmatpush3.bf16.msra.mxu1 %v6686_v29  ;;  %6120 = vmatpush3.bf16.msra.mxu0 %v6687_v31  ;;  %v6706_v31 = vld [vmem:[%s8720_s18 + $0x88] sm:$0xff]  }
 0x9d7   :  { %6101 = vmatprep.subr.bf16.mxu1 %v7219_v37  ;;  %6121 = vmatprep.subr.bf16.mxu0 %v7219_v37 }
 0x9da   :  { %6102 = vmatpush3.bf16.msra.mxu1 %v6688_v13  ;;  %6122 = vmatpush3.bf16.msra.mxu0 %v6689_v63  ;;  %v6707_v63 = vld [vmem:[%s8720_s18 + $0xc8] sm:$0xff]  }
 0x9db   :  { %6103 = vmatprep.subr.bf16.mxu1 %v7219_v37  ;;  %6123 = vmatprep.subr.bf16.mxu0 %v7219_v37 }
 0x9de   :  { %6104 = vmatpush3.bf16.msra.mxu1 %v6690_v44  ;;  %6124 = vmatpush3.bf16.msra.mxu0 %v6691_v39 }
 0x9df   :  { %6105 = vmatprep.subr.bf16.mxu1 %v7219_v37  ;;  %6125 = vmatprep.subr.bf16.mxu0 %v7219_v37 }
 0x9e2   :  { %6106 = vmatpush3.bf16.msra.mxu1 %v6692_v40  ;;  %6126 = vmatpush3.bf16.msra.mxu0 %v6693_v24  ;;  %v6708_v24 = vld [vmem:[%s8720_s18 + $0x80] sm:$0xff]  }
 0x9e3   :  { %6131 = vmatprep.subr.bf16.mxu1 %v7219_v37  ;;  %6151 = vmatprep.subr.bf16.mxu0 %v7219_v37 }
 0x9fd   :  { %v2367_v41 = vpop.xlane.xlu1 %2366 }
 0x9fe   :  { %6873 = vrcp.f32 %v2367_v41 }
 0xa0b   :  { %v6874_v6 = vpop.eup %6873 }
 0xa0c   :  { %v2369_v36 = vmul.f32 %v6874_v6, %v7900_v45 }
 0xa0e   :  { %v2370_v61 = vmul.f32 0.33333334, %v2369_v36 }
 0xa10   :  { %v2379_v43 = vrot.slane %v2370_v61, %v7561_v33  ;;  %v2372_v38 = vcombine.high %v2370_v61, %v2370_v61  ;;  %v6709_v61 = vld [vmem:[%s8720_s18 + $0xc0] sm:$0xff]  }
 0xa12   :  { %v2387_v4 = vcombine.high %v2379_v43, %v2379_v43  ;;  %v8162_v25 = vrot.slane %v2379_v43, %v7561_v33  ;;  %v2386_v7 = vrot.slane %v2372_v38, %v7561_v33 }
 0xa14   :  { %v2408_v46 = vrot.slane %v2387_v4, %v7561_v33  ;;  %v2409_v47 = vcombine.high %v8162_v25, %v8162_v25  ;;  %v2401_v27 = vrot.slane %v2386_v7, %v7561_v33  ;;  %v8185_v33 = vld [vmem:[%s8717_s15] sm:$0xff] }
 0xa15   :  { %v2506_v1 = vrot.slane %v8185_v33, %v7566_v42  ;;  %v2510_v21 = vrot.slane %v8185_v33, %v7728_v60  ;;  %v2514_v3 = vrot.slane %v8185_v33, %v2513_v53  ;;  %v2518_v29 = vrot.slane %v8185_v33, %v2517_v19 }
 0xa16   :  { %v5023_v12 = vrot.slane %v2408_v46, %v7566_v42  ;;  %v5027_v45 = vrot.slane %v2409_v47, %v7566_v42  ;;  %v2410_v22 = vcombine.high %v2408_v46, %v2408_v46  ;;  %v5035_v30 = vrot.slane %v2401_v27, %v7566_v42  ;;  %v6710_v46 = vld [vmem:[%s8720_s18 + $0x138] sm:$0xff]  }
 0xa17   :  { %v5019_v53 = vrot.slane %v8162_v25, %v7566_v42  ;;  %v6728_v25 = vld [vmem:[#allocation22 + $0x70] sm:$0xff]  }
 0xa18   :  { %5066 = vperm.xlu1 %6451, %v5023_v12   ;;  %5041 = vperm.xlu0 %6450, %v5023_v12   ;;  %v5031_v51 = vrot.slane %v2410_v22, %v7566_v42  ;;  %v6712_v22 = vld [vmem:[%s8720_s18 + $0x130] sm:$0xff]  }
 0xa1c   :  { %6452 = vset.pattern.permute.xlu1 %v7218_v0  ;;  %6459 = vset.pattern.permute.xlu0 %v7223_v49 }
 0xa1d   :  { %5045 = vperm.xlu1 %6452, %v5027_v45   ;;  %5100 = vperm.xlu0 %6459, %v5027_v45  }
 0xa21   :  { %6453 = vset.pattern.permute.xlu1 %v7222_v50  ;;  %5108 = vperm.xlu0 %6459, %v5035_v30  }
 0xa22   :  { %5070 = vperm.xlu1 %6453, %v5027_v45   ;;  %v6711_v45 = vld [vmem:[#allocation22 + $0x38] sm:$0xff]  }
 0xa25   :  { %6461 = vset.pattern.permute.xlu0 %v7218_v0 }
 0xa26   :  { %6454 = vset.pattern.permute.xlu1 %v7218_v0 }
 0xa27   :  { %5049 = vperm.xlu1 %6454, %v5031_v51  }
 0xa2b   :  { %6455 = vset.pattern.permute.xlu1 %v7222_v50 }
 0xa2c   :  { %5074 = vperm.xlu1 %6455, %v5031_v51  }
 0xa30   :  { %6456 = vset.pattern.permute.xlu1 %v7223_v49 }
 0xa31   :  { %5096 = vperm.xlu1 %6456, %v5023_v12  }
 0xa35   :  { %6457 = vset.pattern.permute.xlu1 %v7218_v0 }
 0xa36   :  { %5053 = vperm.xlu1 %6457, %v5035_v30  }
 0xa3a   :  { %6458 = vset.pattern.permute.xlu1 %v7222_v50 }
 0xa3b   :  { %5078 = vperm.xlu1 %6458, %v5035_v30   ;;  %v6713_v30 = vld [vmem:[#allocation22 + $0x30] sm:$0xff]  }
 0xa3f   :  { %6460 = vset.pattern.permute.xlu1 %v7223_v49 }
 0xa40   :  { %5104 = vperm.xlu1 %6460, %v5031_v51   ;;  %v6714_v51 = vld [vmem:[%s8720_s18 + $0x128] sm:$0xff]  }
 0xa44   :  { %6462 = vset.pattern.permute.xlu1 %v7222_v50 }
 0xa45   :  { %v3026_v35 = vpop.f32.mrf.mxu1  ;;  %v3067_v0 = vpop.f32.mrf.mxu0 }
 0xa46   :  { %v3027_v48 = vadd.f32 %v3026_v35, %v2506_v1  ;;  %v3068_v13 = vadd.f32 %v3067_v0, %v2514_v3  ;;  %v6715_v1 = vld [vmem:[#allocation22 + $0x28] sm:$0xff]   ;;  %v6717_v35 = vld [vmem:[#allocation22 + $0x20] sm:$0xff]  }
 0xa47   :  { %v3028_v52 = vpop.f32.mrf.mxu1  ;;  %v3069_v58 = vpop.f32.mrf.mxu0  ;;  %v6718_v0 = vld [vmem:[%s8720_s18 + $0x118] sm:$0xff]  }
 0xa48   :  { %v3197_v59 = vmax.f32 %v3027_v48, 0.0  ;;  %v3029_v9 = vadd.f32 %v3028_v52, %v2510_v21  ;;  %v3070_v44 = vadd.f32 %v3069_v58, %v2518_v29  ;;  %v3199_v41 = vmax.f32 %v3068_v13, 0.0  ;;  %v6716_v21 = vld [vmem:[%s8720_s18 + $0x120] sm:$0xff]   ;;  %v6719_v52 = vld [vmem:[#allocation22 + $0x18] sm:$0xff]  }
 0xa49   :  { %v3030_v26 = vpop.f32.mrf.mxu1  ;;  %v3071_v15 = vpop.f32.mrf.mxu0  ;;  %v2521_v48 = vsub.s32 4, %v7558_v32  ;;  %v2525_v58 = vsub.s32 5, %v7558_v32 }
 0xa4a   :  { %v3411_v2 = vpack.c.bf16 %v3197_v59, %v3197_v59  ;;  %v3198_v14 = vmax.f32 %v3029_v9, 0.0  ;;  %v3200_v43 = vmax.f32 %v3070_v44, 0.0  ;;  %v3413_v47 = vpack.c.bf16 %v3199_v41, %v3199_v41  ;;  %v6720_v59 = vld [vmem:[%s8720_s18 + $0x110] sm:$0xff]   ;;  %v6730_v44 = vld [vmem:[#allocation22 + $0x68] sm:$0xff]   ;;  %v6733_v41 = vld [vmem:[#allocation22 + $0xa0] sm:$0xff]  }
 0xa4b   :  { %v3031_v57 = vpop.f32.mrf.mxu1  ;;  %v3072_v8 = vpop.f32.mrf.mxu0  ;;  %v2522_v9 = vrot.slane %v8185_v33, %v2521_v48  ;;  %v6721_v26 = vld [vmem:[#allocation22 + $0x10] sm:$0xff]   ;;  %v2526_v15 = vrot.slane %v8185_v33, %v2525_v58  ;;  %v6747_v48 = vld [vmem:[#allocation22 + $0x128] sm:$0xff]   ;;  %v6749_v58 = vld [vmem:[#allocation22 + $0x120] sm:$0xff]  }
 0xa4c   :  { %v3412_v56 = vpack.c.bf16 %v3198_v14, %v3198_v14  ;;  %6108 = vmatmul.mubr.bf16.vlgmr.msra.gmra.mxu1 %v3411_v2  ;;  %v3414_v27 = vpack.c.bf16 %v3200_v43, %v3200_v43  ;;  %v5521_v14 = vld [vmem:[#allocation21] ss:$0 sm:$0xff]  ;;  %v6723_v57 = vld [vmem:[#allocation22 + $0x8] sm:$0xff]  }
 0xa4d   :  { %6132 = vmatpush3.bf16.msra.mxu1 %v6694_v34  ;;  %6147 = vmatprep.mubr.msk.bf16.mxu1 %vm7220_vm0, %v7219_v37  ;;  %v6722_v34 = vld [vmem:[%s8720_s18 + $0x108] sm:$0xff]   ;;  %v6735_v43 = vld [vmem:[#allocation22 + $0x98] sm:$0xff]  }
 0xa4e   :  { %6128 = vmatmul.mubr.bf16.vlgmr.msra.gmra.mxu0 %v3412_v56  ;;  %6133 = vmatprep.subr.bf16.mxu1 %v7219_v37 }
 0xa4f   :  { %6152 = vmatpush3.bf16.msra.mxu0 %v6695_v55  ;;  %6167 = vmatprep.mubr.msk.bf16.mxu0 %vm7220_vm0, %v7219_v37 }
 0xa50   :  { %6153 = vmatprep.subr.bf16.mxu0 %v7219_v37 }
 0xa51   :  { %6134 = vmatpush3.bf16.msra.mxu1 %v6696_v54  ;;  %v6724_v54 = vld [vmem:[%s8720_s18 + $0x100] sm:$0xff]   ;;  %s7226_s18 = smov 124  }
 0xa52   :  { %6135 = vmatprep.subr.bf16.mxu1 %v7219_v37 }
 0xa53   :  { %6154 = vmatpush3.bf16.msra.mxu0 %v6697_v10 }
 0xa54   :  { %6155 = vmatprep.subr.bf16.mxu0 %v7219_v37 }
 0xa55   :  { %6136 = vmatpush3.bf16.msra.mxu1 %v6698_v11 }
 0xa56   :  { %6137 = vmatprep.subr.bf16.mxu1 %v7219_v37 }
 0xa57   :  { %6156 = vmatpush3.bf16.msra.mxu0 %v6699_v16 }
 0xa58   :  { %6157 = vmatprep.subr.bf16.mxu0 %v7219_v37 }
 0xa59   :  { %6138 = vmatpush3.bf16.msra.mxu1 %v6700_v17 }
 0xa5a   :  { %6139 = vmatprep.subr.bf16.mxu1 %v7219_v37 }
 0xa5b   :  { %6158 = vmatpush3.bf16.msra.mxu0 %v6701_v18  ;;  %v6725_v18 = vld [vmem:[#allocation22] sm:$0xff]  }
 0xa5c   :  { %6159 = vmatprep.subr.bf16.mxu0 %v7219_v37 }
 0xa5d   :  { %6140 = vmatpush3.bf16.msra.mxu1 %v6702_v20 }
 0xa5e   :  { %6141 = vmatprep.subr.bf16.mxu1 %v7219_v37 }
 0xa5f   :  { %6160 = vmatpush3.bf16.msra.mxu0 %v6703_v23 }
 0xa60   :  { %6161 = vmatprep.subr.bf16.mxu0 %v7219_v37 }
 0xa61   :  { %6142 = vmatpush3.bf16.msra.mxu1 %v6704_v62  ;;  %v6726_v62 = vld [vmem:[#allocation22 + $0x78] sm:$0xff]  }
 0xa62   :  { %6143 = vmatprep.subr.bf16.mxu1 %v7219_v37 }
 0xa63   :  { %6162 = vmatpush3.bf16.msra.mxu0 %v6705_v28 }
 0xa64   :  { %6163 = vmatprep.subr.bf16.mxu0 %v7219_v37 }
 0xa65   :  { %v8255_v39 = vpop.f32.mrf.mxu1  ;;  %v8257_v40 = vpop.f32.mrf.mxu0  ;;  %6144 = vmatpush3.bf16.msra.mxu1 %v6706_v31  ;;  %v6727_v31 = vld [vmem:[#allocation22 + $0xb8] sm:$0xff]  }
 0xa66   :  { %6145 = vmatprep.subr.bf16.mxu1 %v7219_v37  ;;  %v3109_v2 = vadd.f32 %v8255_v39, %v2522_v9  ;;  %v6731_v39 = vld [vmem:[#allocation22 + $0xa8] sm:$0xff]  }
 0xa67   :  { %v8263_v6 = vpop.f32.mrf.mxu1  ;;  %v8265_v36 = vpop.f32.mrf.mxu0  ;;  %6164 = vmatpush3.bf16.msra.mxu0 %v6707_v63  ;;  %v6729_v63 = vld [vmem:[#allocation22 + $0xb0] sm:$0xff]   ;;  %v2500_v9 = vld [vmem:[%s8717_s15 + $0x8] sm:$0x3] }
 0xa68   :  { %6165 = vmatprep.subr.bf16.mxu0 %v7219_v37  ;;  %v3111_v8 = vadd.f32 %v8263_v6, %v2526_v15  ;;  %v3201_v10 = vmax.f32 %v3109_v2, 0.0  ;;  %v6734_v6 = vld [vmem:[#allocation22 + $0x58] sm:$0xff]   ;;  %v6752_v15 = vld [vmem:[#allocation22 + $0xd0] sm:$0xff]  }
 0xa69   :  { %v3112_v4 = vpop.f32.mrf.mxu1  ;;  %v3153_v38 = vpop.f32.mrf.mxu0  ;;  %6146 = vmatpush3.bf16.msra.mxu1 %v6708_v24  ;;  %v6732_v24 = vld [vmem:[#allocation22 + $0x60] sm:$0xff]   ;;  %v6753_v2 = vld [vmem:[#allocation22 + $0x110] sm:$0xff]  }
 0xa6a   :  { %6171 = vmatprep.subr.bf16.mxu1 %v7219_v37  ;;  %v3202_v20 = vmax.f32 %v3111_v8, 0.0  ;;  %v3415_v3 = vpack.c.bf16 %v3201_v10, %v3201_v10  ;;  %v2533_v4 = vsub.s32 7, %v7558_v32  ;;  %v6736_v38 = vld [vmem:[#allocation22 + $0x50] sm:$0xff]  }
 0xa6b   :  { %v3113_v12 = vpop.f32.mrf.mxu1  ;;  %v3154_v7 = vpop.f32.mrf.mxu0  ;;  %6166 = vmatpush3.bf16.msra.mxu0 %v6709_v61  ;;  %v2529_v61 = vsub.s32 6, %v7558_v32 }
 0xa6c   :  { %6148 = vmatmul.mubr.bf16.vlgmr.msra.gmra.mxu1 %v3413_v47  ;;  %6191 = vmatprep.subr.bf16.mxu0 %v7219_v37  ;;  %v3971_v13 = vpack.c.bf16 %v3202_v20, %v3202_v20  ;;  %v6737_v47 = vld [vmem:[#allocation22 + $0x90] sm:$0xff]   ;;  %v2534_v12 = vrot.slane %v8185_v33, %v2533_v4  ;;  %v6738_v7 = vld [vmem:[#allocation22 + $0x48] sm:$0xff]  }
 0xa6d   :  { %6172 = vmatpush3.bf16.msra.mxu1 %v6710_v46  ;;  %6187 = vmatprep.mubr.msk.bf16.mxu1 %vm7220_vm0, %v7219_v37  ;;  %v2530_v46 = vrot.slane %v8185_v33, %v2529_v61  ;;  %v6741_v33 = vld [vmem:[#allocation22 + $0x80] sm:$0xff]   ;;  %v6759_v20 = vld [vmem:[%s8724_s22 + $0x30] sm:$0xff]  }
 0xa6e   :  { %6168 = vmatmul.mubr.bf16.vlgmr.msra.gmra.mxu0 %v3414_v27  ;;  %6173 = vmatprep.subr.bf16.mxu1 %v7219_v37  ;;  %v3152_v27 = vadd.f32 %v8265_v36, %v2534_v12 }
 0xa6f   :  { %6192 = vmatpush3.bf16.msra.mxu0 %v6711_v45  ;;  %6207 = vmatprep.mubr.msk.bf16.mxu0 %vm7220_vm0, %v7219_v37  ;;  %v3150_v32 = vadd.f32 %v8257_v40, %v2530_v46  ;;  %v6739_v45 = vld [vmem:[#allocation22 + $0x88] sm:$0xff]   ;;  %v6742_v40 = vld [vmem:[#allocation22 + $0xf8] sm:$0xff]  }
 0xa70   :  { %6193 = vmatprep.subr.bf16.mxu0 %v7219_v37 }
 0xa71   :  { %6174 = vmatpush3.bf16.msra.mxu1 %v6712_v22  ;;  %v3203_v22 = vmax.f32 %v3150_v32, 0.0 }
 0xa72   :  { %6175 = vmatprep.subr.bf16.mxu1 %v7219_v37 }
 0xa73   :  { %6194 = vmatpush3.bf16.msra.mxu0 %v6713_v30  ;;  %v3204_v30 = vmax.f32 %v3152_v27, 0.0 }
 0xa74   :  { %6195 = vmatprep.subr.bf16.mxu0 %v7219_v37 }
 0xa75   :  { %6176 = vmatpush3.bf16.msra.mxu1 %v6714_v51  ;;  %v3972_v51 = vpack.c.bf16 %v3203_v22, %v3203_v22  ;;  %v3973_v36 = vpack.c.bf16 %v3204_v30, %v3204_v30 }
 0xa76   :  { %6177 = vmatprep.subr.bf16.mxu1 %v7219_v37 }
 0xa77   :  { %6196 = vmatpush3.bf16.msra.mxu0 %v6715_v1  ;;  %v6743_v1 = vld [vmem:[#allocation22 + $0x138] sm:$0xff]  }
 0xa78   :  { %6197 = vmatprep.subr.bf16.mxu0 %v7219_v37 }
 0xa79   :  { %6178 = vmatpush3.bf16.msra.mxu1 %v6716_v21  ;;  %v6744_v21 = vld [vmem:[#allocation22 + $0xf0] sm:$0xff]  }
 0xa7a   :  { %6179 = vmatprep.subr.bf16.mxu1 %v7219_v37 }
 0xa7b   :  { %6198 = vmatpush3.bf16.msra.mxu0 %v6717_v35  ;;  %v6745_v35 = vld [vmem:[#allocation22 + $0x130] sm:$0xff]  }
 0xa7c   :  { %6199 = vmatprep.subr.bf16.mxu0 %v7219_v37 }
 0xa7d   :  { %6180 = vmatpush3.bf16.msra.mxu1 %v6718_v0  ;;  %v6746_v0 = vld [vmem:[#allocation22 + $0xe8] sm:$0xff]  }
 0xa7e   :  { %6181 = vmatprep.subr.bf16.mxu1 %v7219_v37 }
 0xa7f   :  { %6200 = vmatpush3.bf16.msra.mxu0 %v6719_v52  ;;  %v6748_v52 = vld [vmem:[#allocation22 + $0xe0] sm:$0xff]  }
 0xa80   :  { %6201 = vmatprep.subr.bf16.mxu0 %v7219_v37 }
 0xa81   :  { %6182 = vmatpush3.bf16.msra.mxu1 %v6720_v59  ;;  %v6750_v59 = vld [vmem:[#allocation22 + $0xd8] sm:$0xff]  }
 0xa82   :  { %6183 = vmatprep.subr.bf16.mxu1 %v7219_v37 }
 0xa83   :  { %6202 = vmatpush3.bf16.msra.mxu0 %v6721_v26  ;;  %v6751_v26 = vld [vmem:[#allocation22 + $0x118] sm:$0xff]  }
 0xa84   :  { %6203 = vmatprep.subr.bf16.mxu0 %v7219_v37 }
 0xa85   :  { %v8316_v55 = vpop.f32.mrf.mxu1  ;;  %v3312_v56 = vpop.f32.mrf.mxu0  ;;  %6184 = vmatpush3.bf16.msra.mxu1 %v6722_v34  ;;  %v2538_v34 = vrot.slane %v2500_v9, %v7566_v42  ;;  %v6756_v42 = vld [vmem:[#allocation22 + $0xc0] sm:$0xff]  }
 0xa86   :  { %v8321_v11 = vadd.f32 %v5521_v14, %v3312_v56  ;;  %6185 = vmatprep.subr.bf16.mxu1 %v7219_v37  ;;  %v2542_v14 = vrot.slane %v2500_v9, %v7728_v60  ;;  %v6755_v56 = vld [vmem:[#allocation22 + $0x108] sm:$0xff]   ;;  %v6757_v60 = vld [vmem:[#allocation22 + $0x100] sm:$0xff]  }
 0xa87   :  { %v8324_v16 = vpop.f32.mrf.mxu1  ;;  %v6089_v17 = vpop.f32.mrf.mxu0  ;;  %6204 = vmatpush3.bf16.msra.mxu0 %v6723_v57  ;;  %v6754_v57 = vld [vmem:[#allocation22 + $0xc8] sm:$0xff]   ;;  %v3191_v8 = vadd.f32 %v8316_v55, %v2538_v34  ;;  %v6758_v55 = vld [vmem:[%s8724_s22 + $0x38] sm:$0xff]  }
 0xa88   :  { %3325 = vrot.lane.b32.xlu0 %v8321_v11, %s7224_s7  ;;  %3319 = vrot.lane.b32.xlu1 %v8321_v11, %s7225_s17  ;;  %v6773_v34 = vld [vmem:[%s8724_s22 + $0xa0] sm:$0xff]  }
 0xa89   :  { %v3194_v23 = vpop.f32.mrf.mxu1  ;;  %v3315_v19 = vpop.f32.mrf.mxu0  ;;  %6186 = vmatpush3.bf16.msra.mxu1 %v6724_v54  ;;  %6205 = vmatprep.subr.bf16.mxu0 %v7219_v37  ;;  %v3193_v54 = vadd.f32 %v8324_v16, %v2542_v14  ;;  %v3205_v10 = vmax.f32 %v3191_v8, 0.0  ;;  %v6777_v14 = vld [vmem:[%s8724_s22 + $0x90] sm:$0xff]   ;;  %v6779_v8 = vld [vmem:[%s8724_s22 + $0x88] sm:$0xff]  }
 0xa8a   :  { %6211 = vmatprep.subr.bf16.mxu1 %v7219_v37  ;;  %v6766_v23 = vld [vmem:[%s8724_s22 + $0x78] sm:$0xff]   ;;  %v6761_v19 = vld [vmem:[%s8724_s22 + $0x20] sm:$0xff]  }
 0xa8b   :  { %v3195_v28 = vpop.f32.mrf.mxu1  ;;  %v6090_v29 = vpop.f32.mrf.mxu0  ;;  %6206 = vmatpush3.bf16.msra.mxu0 %v6725_v18  ;;  %v3206_v17 = vmax.f32 %v3193_v54, 0.0  ;;  %v3974_v18 = vpack.c.bf16 %v3205_v10, %v3205_v10  ;;  %v5577_v54 = vld [vmem:[%s8723_s21 + $0x2] ss:$0 sm:$0xff] }
 0xa8c   :  { %6188 = vmatmul.mubr.bf16.vlgmr.msra.gmra.mxu1 %v3415_v3  ;;  %5037 = vperm.xlu0 %6461, %v5019_v53   ;;  %v6762_v3 = vld [vmem:[%s8724_s22 + $0x18] sm:$0xff]   ;;  %v6770_v28 = vld [vmem:[%s8724_s22 + $0x68] sm:$0xff]   ;;  %v6763_v29 = vld [vmem:[%s8724_s22 + $0x10] sm:$0xff]  }
 0xa8d   :  { %3322 = vrot.lane.b32.xlu1 %v8321_v11, %s7226_s18  ;;  %6212 = vmatpush3.bf16.msra.mxu1 %v6726_v62  ;;  %v3975_v16 = vpack.c.bf16 %v3206_v17, %v3206_v17  ;;  %v6768_v62 = vld [vmem:[%s8724_s22 + $0x70] sm:$0xff]   ;;  %v6781_v17 = vld [vmem:[%s8724_s22 + $0x80] sm:$0xff]  }
 0xa8e   :  { %6208 = vmatmul.mubr.bf16.vlgmr.msra.gmra.mxu0 %v3971_v13  ;;  %6231 = vmatprep.subr.bf16.mxu0 %v7219_v37  ;;  %v6764_v13 = vld [vmem:[%s8724_s22 + $0x8] sm:$0xff]  }
 0xa8f   :  { %6232 = vmatpush3.bf16.msra.mxu0 %v6727_v31  ;;  %6213 = vmatprep.subr.bf16.mxu1 %v7219_v37  ;;  %v6772_v31 = vld [vmem:[%s8724_s22 + $0x60] sm:$0xff]  }
 0xa90   :  { %6233 = vmatprep.subr.bf16.mxu0 %v7219_v37  ;;  %6227 = vmatprep.mubr.msk.bf16.mxu1 %vm7220_vm0, %v7219_v37 }
 0xa91   :  { %3328 = vrot.lane.b32.xlu1 %v8321_v11, %s7227_s14  ;;  %6214 = vmatpush3.bf16.msra.mxu1 %v6728_v25  ;;  %v6774_v25 = vld [vmem:[%s8724_s22 + $0x58] sm:$0xff]  }
 0xa92   :  { %6215 = vmatprep.subr.bf16.mxu1 %v7219_v37  ;;  %6247 = vmatprep.mubr.msk.bf16.mxu0 %vm7220_vm0, %v7219_v37 }
 0xa93   :  { %6234 = vmatpush3.bf16.msra.mxu0 %v6729_v63  ;;  %v6765_v63 = vld [vmem:[%s8724_s22] sm:$0xff]  }
 0xa94   :  { %6235 = vmatprep.subr.bf16.mxu0 %v7219_v37 }
 0xa95   :  { %5062 = vperm.xlu1 %6462, %v5019_v53   ;;  %6216 = vmatpush3.bf16.msra.mxu1 %v6730_v44  ;;  %v6776_v44 = vld [vmem:[%s8724_s22 + $0x50] sm:$0xff]  }
 0xa96   :  { %6217 = vmatprep.subr.bf16.mxu1 %v7219_v37 }
 0xa97   :  { %6236 = vmatpush3.bf16.msra.mxu0 %v6731_v39  ;;  %v6778_v39 = vld [vmem:[%s8724_s22 + $0x48] sm:$0xff]  }
 0xa98   :  { %6237 = vmatprep.subr.bf16.mxu0 %v7219_v37 }
 0xa99   :  { %6218 = vmatpush3.bf16.msra.mxu1 %v6732_v24  ;;  %6463 = vset.pattern.permute.xlu1 %v7223_v49  ;;  %v6780_v24 = vld [vmem:[%s8724_s22 + $0x40] sm:$0xff]  }
 0xa9a   :  { %6219 = vmatprep.subr.bf16.mxu1 %v7219_v37  ;;  %5092 = vperm.xlu1 %6463, %v5019_v53   ;;  %v6760_v53 = vld [vmem:[%s8724_s22 + $0x28] sm:$0xff]  }
 0xa9b   :  { %6238 = vmatpush3.bf16.msra.mxu0 %v6733_v41 }
 0xa9c   :  { %6239 = vmatprep.subr.bf16.mxu0 %v7219_v37 }
 0xa9d   :  { %6220 = vmatpush3.bf16.msra.mxu1 %v6734_v6 }
 0xa9e   :  { %6221 = vmatprep.subr.bf16.mxu1 %v7219_v37  ;;  %6464 = vset.pattern.permute.xlu1 %v7222_v50  ;;  %v6740_v50 = vld [vmem:[#allocation22 + $0x40] sm:$0xff]  }
 0xa9f   :  { %6240 = vmatpush3.bf16.msra.mxu0 %v6735_v43 }
 0xaa0   :  { %6241 = vmatprep.subr.bf16.mxu0 %v7219_v37 }
 0xaa1   :  { %6222 = vmatpush3.bf16.msra.mxu1 %v6736_v38 }
 0xaa2   :  { %6223 = vmatprep.subr.bf16.mxu1 %v7219_v37 }
 0xaa3   :  { %6242 = vmatpush3.bf16.msra.mxu0 %v6737_v47 }
 0xaa4   :  { %6243 = vmatprep.subr.bf16.mxu0 %v7219_v37 }
 0xaa5   :  { %6224 = vmatpush3.bf16.msra.mxu1 %v6738_v7 }
 0xaa6   :  { %6225 = vmatprep.subr.bf16.mxu1 %v7219_v37 }
 0xaa7   :  { %6244 = vmatpush3.bf16.msra.mxu0 %v6739_v45 }
 0xaa8   :  { %6245 = vmatprep.subr.bf16.mxu0 %v7219_v37 }
 0xaa9   :  { %6226 = vmatpush3.bf16.msra.mxu1 %v6740_v50 }
 0xaaa   :  { %6251 = vmatprep.subr.bf16.mxu1 %v7219_v37 }
 0xaab   :  { %6246 = vmatpush3.bf16.msra.mxu0 %v6741_v33 }
 0xaac   :  { %6228 = vmatmul.mubr.bf16.vlgmr.msra.gmra.mxu1 %v3972_v51  ;;  %6271 = vmatprep.subr.bf16.mxu0 %v7219_v37 }
 0xaad   :  { %6252 = vmatpush3.bf16.msra.mxu1 %v6742_v40  ;;  %6267 = vmatprep.mubr.msk.bf16.mxu1 %vm7220_vm0, %v7219_v37  ;;  %v5575_v40 = vld [vmem:[%s8723_s21] ss:$0 sm:$0xff] }
 0xaae   :  { %6248 = vmatmul.mubr.bf16.vlgmr.msra.gmra.mxu0 %v3973_v36  ;;  %6253 = vmatprep.subr.bf16.mxu1 %v7219_v37 }
 0xaaf   :  { %6272 = vmatpush3.bf16.msra.mxu0 %v6743_v1  ;;  %6287 = vmatprep.mubr.msk.bf16.mxu0 %vm7220_vm0, %v7219_v37 }
 0xab0   :  { %6273 = vmatprep.subr.bf16.mxu0 %v7219_v37 }
 0xab1   :  { %6254 = vmatpush3.bf16.msra.mxu1 %v6744_v21 }
 0xab2   :  { %6255 = vmatprep.subr.bf16.mxu1 %v7219_v37 }
 0xab3   :  { %6274 = vmatpush3.bf16.msra.mxu0 %v6745_v35 }
 0xab4   :  { %6275 = vmatprep.subr.bf16.mxu0 %v7219_v37 }
 0xab5   :  { %6256 = vmatpush3.bf16.msra.mxu1 %v6746_v0 }
 0xab6   :  { %6257 = vmatprep.subr.bf16.mxu1 %v7219_v37 }
 0xab7   :  { %6276 = vmatpush3.bf16.msra.mxu0 %v6747_v48 }
 0xab8   :  { %6277 = vmatprep.subr.bf16.mxu0 %v7219_v37 }
 0xab9   :  { %6258 = vmatpush3.bf16.msra.mxu1 %v6748_v52 }
 0xaba   :  { %6259 = vmatprep.subr.bf16.mxu1 %v7219_v37 }
 0xabb   :  { %6278 = vmatpush3.bf16.msra.mxu0 %v6749_v58  ;;  %v6767_v58 = vld [vmem:[%s8724_s22 + $0xb8] sm:$0xff]  }
 0xabc   :  { %6279 = vmatprep.subr.bf16.mxu0 %v7219_v37 }
 0xabd   :  { %6260 = vmatpush3.bf16.msra.mxu1 %v6750_v59 }
 0xabe   :  { %6261 = vmatprep.subr.bf16.mxu1 %v7219_v37 }
 0xabf   :  { %6280 = vmatpush3.bf16.msra.mxu0 %v6751_v26  ;;  %v6769_v26 = vld [vmem:[%s8724_s22 + $0xb0] sm:$0xff]  }
 0xac0   :  { %6281 = vmatprep.subr.bf16.mxu0 %v7219_v37 }
 0xac1   :  { %6262 = vmatpush3.bf16.msra.mxu1 %v6752_v15  ;;  %v6771_v15 = vld [vmem:[%s8724_s22 + $0xa8] sm:$0xff]  }
 0xac2   :  { %6263 = vmatprep.subr.bf16.mxu1 %v7219_v37 }
 0xac3   :  { %6282 = vmatpush3.bf16.msra.mxu0 %v6753_v2  ;;  %v6775_v2 = vld [vmem:[%s8724_s22 + $0x98] sm:$0xff]  }
 0xac4   :  { %6283 = vmatprep.subr.bf16.mxu0 %v7219_v37 }
 0xac5   :  { %6264 = vmatpush3.bf16.msra.mxu1 %v6754_v57  ;;  %v5576_v57 = vld [vmem:[%s8723_s21 + $0x1] ss:$0 sm:$0xff] }
 0xac6   :  { %6265 = vmatprep.subr.bf16.mxu1 %v7219_v37 }
 0xac7   :  { %6284 = vmatpush3.bf16.msra.mxu0 %v6755_v56 }
 0xac8   :  { %6285 = vmatprep.subr.bf16.mxu0 %v7219_v37 }
 0xac9   :  { %6266 = vmatpush3.bf16.msra.mxu1 %v6756_v42 }
 0xaca   :  { %6291 = vmatprep.subr.bf16.mxu1 %v7219_v37 }
 0xacb   :  { %6286 = vmatpush3.bf16.msra.mxu0 %v6757_v60 }
 0xacc   :  { %6268 = vmatmul.mubr.bf16.vlgmr.msra.gmra.mxu1 %v3974_v18  ;;  %6311 = vmatprep.subr.bf16.mxu0 %v7219_v37 }
 0xacd   :  { %6292 = vmatpush3.bf16.msra.mxu1 %v6758_v55  ;;  %6307 = vmatprep.mubr.msk.bf16.mxu1 %vm7220_vm0, %v7219_v37 }
 0xace   :  { %6288 = vmatmul.mubr.bf16.vlgmr.msra.gmra.mxu0 %v3975_v16  ;;  %6293 = vmatprep.subr.bf16.mxu1 %v7219_v37 }
 0xacf   :  { %6327 = vmatprep.mubr.msk.bf16.mxu0 %vm7220_vm0, %v7219_v37  ;;  %6312 = vmatpush3.bf16.msra.mxu0 %v6766_v23 }
 0xad0   :  { %6313 = vmatprep.subr.bf16.mxu0 %v7219_v37 }
 0xad1   :  { %6294 = vmatpush3.bf16.msra.mxu1 %v6759_v20 }
 0xad2   :  { %6295 = vmatprep.subr.bf16.mxu1 %v7219_v37 }
 0xad3   :  { %6314 = vmatpush3.bf16.msra.mxu0 %v6768_v62 }
 0xad4   :  { %6315 = vmatprep.subr.bf16.mxu0 %v7219_v37 }
 0xad5   :  { %6296 = vmatpush3.bf16.msra.mxu1 %v6760_v53  ;;  %v6782_v53 = vld [vmem:[%s8724_s22 + $0xf8] sm:$0xff]  }
 0xad6   :  { %6297 = vmatprep.subr.bf16.mxu1 %v7219_v37 }
 0xad7   :  { %6316 = vmatpush3.bf16.msra.mxu0 %v6770_v28  ;;  %v6783_v28 = vld [vmem:[%s8724_s22 + $0x138] sm:$0xff]  }
 0xad8   :  { %6317 = vmatprep.subr.bf16.mxu0 %v7219_v37 }
 0xad9   :  { %6298 = vmatpush3.bf16.msra.mxu1 %v6761_v19 }
 0xada   :  { %6299 = vmatprep.subr.bf16.mxu1 %v7219_v37 }
 0xadb   :  { %6318 = vmatpush3.bf16.msra.mxu0 %v6772_v31 }
 0xadc   :  { %6319 = vmatprep.subr.bf16.mxu0 %v7219_v37 }
 0xadd   :  { %6300 = vmatpush3.bf16.msra.mxu1 %v6762_v3 }
 0xade   :  { %6301 = vmatprep.subr.bf16.mxu1 %v7219_v37 }
 0xadf   :  { %6320 = vmatpush3.bf16.msra.mxu0 %v6774_v25  ;;  %v6785_v25 = vld [vmem:[%s8724_s22 + $0x130] sm:$0xff]  }
 0xae0   :  { %6321 = vmatprep.subr.bf16.mxu0 %v7219_v37 }
 0xae1   :  { %6302 = vmatpush3.bf16.msra.mxu1 %v6763_v29 }
 0xae2   :  { %6303 = vmatprep.subr.bf16.mxu1 %v7219_v37 }
 0xae3   :  { %6322 = vmatpush3.bf16.msra.mxu0 %v6776_v44  ;;  %v6787_v44 = vld [vmem:[%s8724_s22 + $0x128] sm:$0xff]  }
 0xae4   :  { %6323 = vmatprep.subr.bf16.mxu0 %v7219_v37 }
 0xae5   :  { %6304 = vmatpush3.bf16.msra.mxu1 %v6764_v13  ;;  %v6784_v13 = vld [vmem:[%s8724_s22 + $0xf0] sm:$0xff]  }
 0xae6   :  { %6305 = vmatprep.subr.bf16.mxu1 %v7219_v37 }
 0xae7   :  { %6324 = vmatpush3.bf16.msra.mxu0 %v6778_v39  ;;  %v6788_v39 = vld [vmem:[%s8724_s22 + $0xe0] sm:$0xff]  }
 0xae8   :  { %6325 = vmatprep.subr.bf16.mxu0 %v7219_v37 }
 0xae9   :  { %6306 = vmatpush3.bf16.msra.mxu1 %v6765_v63  ;;  %v6786_v63 = vld [vmem:[%s8724_s22 + $0xe8] sm:$0xff]  }
 0xaea   :  { %6331 = vmatprep.subr.bf16.mxu1 %v7219_v37 }
 0xaeb   :  { %6326 = vmatpush3.bf16.msra.mxu0 %v6780_v24  ;;  %v6789_v24 = vld [vmem:[%s8724_s22 + $0x120] sm:$0xff]  }
 0xaec   :  { %6351 = vmatprep.subr.bf16.mxu0 %v7219_v37 }
 0xb0c   :  { %v8458_v41 = vpop.f32.mrf.mxu1 }
 0xb0e   :  { %v6109_v6 = vpop.f32.mrf.mxu1  ;;  %v8460_v61 = vpop.f32.mrf.mxu0 }
 0xb0f   :  { %v6790_v6 = vld [vmem:[%s8724_s22 + $0xd8] sm:$0xff]  }
 0xb10   :  { %v3536_v43 = vpop.f32.mrf.mxu1  ;;  %v6129_v4 = vpop.f32.mrf.mxu0 }
 0xb11   :  { %v6791_v43 = vld [vmem:[%s8724_s22 + $0x118] sm:$0xff]   ;;  %v6792_v4 = vld [vmem:[%s8724_s22 + $0xd0] sm:$0xff]  }
 0xb12   :  { %v6110_v38 = vpop.f32.mrf.mxu1  ;;  %v3624_v46 = vpop.f32.mrf.mxu0 }
 0xb13   :  { %v6793_v38 = vld [vmem:[%s8724_s22 + $0x110] sm:$0xff]   ;;  %v6794_v46 = vld [vmem:[%s8724_s22 + $0xc8] sm:$0xff]  }
 0xb14   :  { %v6130_v47 = vpop.f32.mrf.mxu0 }
 0xb15   :  { %v5578_v47 = vld [vmem:[%s8723_s21 + $0x3] ss:$0 sm:$0xff] }
 0xb2c   :  { %v8462_v12 = vpop.f32.mrf.mxu1 }
 0xb2e   :  { %v6149_v7 = vpop.f32.mrf.mxu1  ;;  %v8464_v32 = vpop.f32.mrf.mxu0 }
 0xb2f   :  { %v6795_v7 = vld [vmem:[%s8724_s22 + $0x108] sm:$0xff]  }
 0xb30   :  { %v3712_v45 = vpop.f32.mrf.mxu1  ;;  %v6169_v27 = vpop.f32.mrf.mxu0 }
 0xb31   :  { %v5579_v27 = vld [vmem:[%s8723_s21 + $0x4] ss:$0 sm:$0xff] }
 0xb32   :  { %v6150_v50 = vpop.f32.mrf.mxu1  ;;  %v3800_v22 = vpop.f32.mrf.mxu0 }
 0xb33   :  { %v6796_v50 = vld [vmem:[%s8724_s22 + $0xc0] sm:$0xff]  }
 0xb34   :  { %v6170_v33 = vpop.f32.mrf.mxu0 }
 0xb4c   :  { %v8466_v30 = vpop.f32.mrf.mxu1 }
 0xb4e   :  { %v6189_v51 = vpop.f32.mrf.mxu1  ;;  %v4093_v1 = vpop.f32.mrf.mxu0 }
 0xb4f   :  { %v4094_v36 = vadd.f32 %v5575_v40, %v4093_v1  ;;  %v6797_v51 = vld [vmem:[%s8724_s22 + $0x100] sm:$0xff]  }
 0xb50   :  { %v3888_v21 = vpop.f32.mrf.mxu1  ;;  %v6209_v35 = vpop.f32.mrf.mxu0 }
 0xb51   :  { %v4451_v0 = vmax.f32 %v4094_v36, 0.0 }
 0xb52   :  { %v6190_v48 = vpop.f32.mrf.mxu1  ;;  %v4096_v52 = vpop.f32.mrf.mxu0 }
 0xb53   :  { %v4536_v59 = vpack.c.bf16 %v4451_v0, %v4451_v0  ;;  %v6798_v0 = vld [vmem:[%s8727_s25 + $0x38] sm:$0xff]  }
 0xb54   :  { %v6210_v9 = vpop.f32.mrf.mxu0 }
 0xb55   :  { %6308 = vmatmul.mubr.bf16.vlgmr.msra.gmra.mxu1 %v4536_v59 }
 0xb56   :  { %6332 = vmatpush3.bf16.msra.mxu1 %v6767_v58  ;;  %6347 = vmatprep.mubr.msk.bf16.mxu1 %vm7220_vm0, %v7219_v37 }
 0xb57   :  { %6333 = vmatprep.subr.bf16.mxu1 %v7219_v37 }
 0xb5a   :  { %6334 = vmatpush3.bf16.msra.mxu1 %v6769_v26 }
 0xb5b   :  { %6335 = vmatprep.subr.bf16.mxu1 %v7219_v37 }
 0xb5e   :  { %6336 = vmatpush3.bf16.msra.mxu1 %v6771_v15  ;;  %v6799_v15 = vld [vmem:[%s8727_s25 + $0x30] sm:$0xff]  }
 0xb5f   :  { %6337 = vmatprep.subr.bf16.mxu1 %v7219_v37 }
 0xb62   :  { %6338 = vmatpush3.bf16.msra.mxu1 %v6773_v34  ;;  %v6800_v34 = vld [vmem:[%s8727_s25 + $0x28] sm:$0xff]  }
 0xb63   :  { %6339 = vmatprep.subr.bf16.mxu1 %v7219_v37 }
 0xb66   :  { %6340 = vmatpush3.bf16.msra.mxu1 %v6775_v2  ;;  %v6801_v2 = vld [vmem:[%s8727_s25 + $0x20] sm:$0xff]  }
 0xb67   :  { %6341 = vmatprep.subr.bf16.mxu1 %v7219_v37 }
 0xb6a   :  { %6342 = vmatpush3.bf16.msra.mxu1 %v6777_v14  ;;  %v6802_v14 = vld [vmem:[%s8727_s25 + $0x18] sm:$0xff]  }
 0xb6b   :  { %6343 = vmatprep.subr.bf16.mxu1 %v7219_v37 }
 0xb6c   :  { %v4181_v56 = vpop.f32.mrf.mxu1 }
 0xb6d   :  { %v4182_v42 = vadd.f32 %v5576_v57, %v4181_v56  ;;  %v6803_v57 = vld [vmem:[%s8727_s25 + $0x10] sm:$0xff]   ;;  %v6805_v56 = vld [vmem:[%s8727_s25] sm:$0xff]  }
 0xb6e   :  { %v6229_v10 = vpop.f32.mrf.mxu1  ;;  %v4269_v60 = vpop.f32.mrf.mxu0  ;;  %6344 = vmatpush3.bf16.msra.mxu1 %v6779_v8  ;;  %v6804_v8 = vld [vmem:[%s8727_s25 + $0x8] sm:$0xff]  }
 0xb6f   :  { %v4452_v55 = vmax.f32 %v4182_v42, 0.0  ;;  %v4270_v18 = vadd.f32 %v5577_v54, %v4269_v60  ;;  %6345 = vmatprep.subr.bf16.mxu1 %v7219_v37  ;;  %v5067_v54 = vpop.permute.xlu1 %5066 }
 0xb70   :  { %v4184_v16 = vpop.f32.mrf.mxu1  ;;  %v6249_v20 = vpop.f32.mrf.mxu0 }
 0xb71   :  { %v4537_v23 = vpack.c.bf16 %v4452_v55, %v4452_v55  ;;  %v4453_v19 = vmax.f32 %v4270_v18, 0.0 }
 0xb72   :  { %v6230_v62 = vpop.f32.mrf.mxu1  ;;  %v4272_v3 = vpop.f32.mrf.mxu0  ;;  %6346 = vmatpush3.bf16.msra.mxu1 %v6781_v17 }
 0xb73   :  { %v4538_v29 = vpack.c.bf16 %v4453_v19, %v4453_v19  ;;  %6328 = vmatmul.mubr.bf16.vlgmr.msra.gmra.mxu0 %v4537_v23  ;;  %6371 = vmatprep.subr.bf16.mxu1 %v7219_v37  ;;  %v5046_v42 = vpop.permute.xlu1 %5045  ;;  %v5530_v3 = vld [vmem:[%s8721_s19] ss:$0 sm:$0xff] }
 0xb74   :  { %6352 = vmatpush3.bf16.msra.mxu0 %v6782_v53  ;;  %v6250_v31 = vpop.f32.mrf.mxu0  ;;  %6367 = vmatprep.mubr.msk.bf16.mxu0 %vm7220_vm0, %v7219_v37  ;;  %v5042_v53 = vpop.permute.xlu0 %5041 }
 0xb75   :  { %6348 = vmatmul.mubr.bf16.vlgmr.msra.gmra.mxu1 %v4538_v29  ;;  %6353 = vmatprep.subr.bf16.mxu0 %v7219_v37  ;;  %v3534_v29 = vadd.f32 %v5530_v3, %v8458_v41  ;;  %v5531_v41 = vld [vmem:[%s8721_s19 + $0x1] ss:$0 sm:$0xff] }
 0xb76   :  { %6372 = vmatpush3.bf16.msra.mxu1 %v6783_v28  ;;  %6387 = vmatprep.mubr.msk.bf16.mxu1 %vm7220_vm0, %v7219_v37 }
 0xb77   :  { %6373 = vmatprep.subr.bf16.mxu1 %v7219_v37  ;;  %v5071_v10 = vpop.permute.xlu1 %5070 }
 0xb78   :  { %6354 = vmatpush3.bf16.msra.mxu0 %v6784_v13 }
 0xb79   :  { %6355 = vmatprep.subr.bf16.mxu0 %v7219_v37 }
 0xb7a   :  { %6374 = vmatpush3.bf16.msra.mxu1 %v6785_v25  ;;  %v5620_v25 = vld [vmem:[%s8725_s23] ss:$0 sm:$0xff] }
 0xb7b   :  { %6375 = vmatprep.subr.bf16.mxu1 %v7219_v37  ;;  %v8621_v60 = vpop.permute.xlu1 %5049 }
 0xb7c   :  { %6356 = vmatpush3.bf16.msra.mxu0 %v6786_v63 }
 0xb7d   :  { %6357 = vmatprep.subr.bf16.mxu0 %v7219_v37 }
 0xb7e   :  { %6376 = vmatpush3.bf16.msra.mxu1 %v6787_v44 }
 0xb7f   :  { %6377 = vmatprep.subr.bf16.mxu1 %v7219_v37  ;;  %v8623_v17 = vpop.permute.xlu1 %5074 }
 0xb80   :  { %6358 = vmatpush3.bf16.msra.mxu0 %v6788_v39 }
 0xb81   :  { %6359 = vmatprep.subr.bf16.mxu0 %v7219_v37 }
 0xb82   :  { %6378 = vmatpush3.bf16.msra.mxu1 %v6789_v24 }
 0xb83   :  { %6379 = vmatprep.subr.bf16.mxu1 %v7219_v37  ;;  %v5097_v55 = vpop.permute.xlu1 %5096 }
 0xb84   :  { %6360 = vmatpush3.bf16.msra.mxu0 %v6790_v6 }
 0xb85   :  { %6361 = vmatprep.subr.bf16.mxu0 %v7219_v37 }
 0xb86   :  { %6380 = vmatpush3.bf16.msra.mxu1 %v6791_v43 }
 0xb87   :  { %6381 = vmatprep.subr.bf16.mxu1 %v7219_v37  ;;  %v8625_v18 = vpop.permute.xlu1 %5053 }
 0xb88   :  { %6362 = vmatpush3.bf16.msra.mxu0 %v6792_v4 }
 0xb89   :  { %6363 = vmatprep.subr.bf16.mxu0 %v7219_v37 }
 0xb8a   :  { %6382 = vmatpush3.bf16.msra.mxu1 %v6793_v38 }
 0xb8b   :  { %6383 = vmatprep.subr.bf16.mxu1 %v7219_v37  ;;  %v8627_v16 = vpop.permute.xlu1 %5078 }
 0xb8c   :  { %6364 = vmatpush3.bf16.msra.mxu0 %v6794_v46  ;;  %v4357_v45 = vpop.f32.mrf.mxu1 }
 0xb8d   :  { %v4358_v22 = vadd.f32 %v5578_v47, %v4357_v45  ;;  %6365 = vmatprep.subr.bf16.mxu0 %v7219_v37  ;;  %v5532_v45 = vld [vmem:[%s8721_s19 + $0x2] ss:$0 sm:$0xff] }
 0xb8e   :  { %v6269_v33 = vpop.f32.mrf.mxu1  ;;  %v4445_v40 = vpop.f32.mrf.mxu0  ;;  %6384 = vmatpush3.bf16.msra.mxu1 %v6795_v7 }
 0xb8f   :  { %v4454_v1 = vmax.f32 %v4358_v22, 0.0  ;;  %v4446_v36 = vadd.f32 %v5579_v27, %v4445_v40  ;;  %6385 = vmatprep.subr.bf16.mxu1 %v7219_v37  ;;  %v8629_v20 = vpop.permute.xlu1 %5104  ;;  %v3622_v27 = vadd.f32 %v5531_v41, %v8460_v61  ;;  %v5622_v40 = vld [vmem:[%s8725_s23 + $0x2] ss:$0 sm:$0xff] }
 0xb90   :  { %6366 = vmatpush3.bf16.msra.mxu0 %v6796_v50  ;;  %v4360_v21 = vpop.f32.mrf.mxu1  ;;  %v6289_v35 = vpop.f32.mrf.mxu0  ;;  %v5621_v50 = vld [vmem:[%s8725_s23 + $0x1] ss:$0 sm:$0xff] }
 0xb91   :  { %v4539_v48 = vpack.c.bf16 %v4454_v1, %v4454_v1  ;;  %v4455_v52 = vmax.f32 %v4446_v36, 0.0  ;;  %6391 = vmatprep.subr.bf16.mxu0 %v7219_v37  ;;  %v5082_v22 = vmul.f32 %v5067_v54, %v3622_v27 }
 0xb92   :  { %v6270_v58 = vpop.f32.mrf.mxu1  ;;  %v4448_v59 = vpop.f32.mrf.mxu0  ;;  %6386 = vmatpush3.bf16.msra.mxu1 %v6797_v51 }
 0xb93   :  { %v4540_v9 = vpack.c.bf16 %v4455_v52, %v4455_v52  ;;  %6368 = vmatmul.mubr.bf16.vlgmr.msra.gmra.mxu0 %v4539_v48  ;;  %6411 = vmatprep.subr.bf16.mxu1 %v7219_v37  ;;  %v3320_v23 = vpop.permute.xlu1 %3319 }
 0xb94   :  { %6392 = vmatpush3.bf16.msra.mxu0 %v6798_v0  ;;  %v6290_v26 = vpop.f32.mrf.mxu0  ;;  %6407 = vmatprep.mubr.msk.bf16.mxu0 %vm7220_vm0, %v7219_v37  ;;  %v5057_v51 = vmul.f32 %v5042_v53, %v3320_v23 }
 0xb95   :  { %6388 = vmatmul.mubr.bf16.vlgmr.msra.gmra.mxu1 %v4540_v9  ;;  %6393 = vmatprep.subr.bf16.mxu0 %v7219_v37 }
 0xb96   :  { %6413 = vmatprep.mubr.msk.bf16.mxu1 %vm7220_vm0, %v7219_v37  ;;  %v5087_v48 = vadd.f32 %v5082_v22, %v5057_v51 }
 0xb97   :  { %v3323_v19 = vpop.permute.xlu1 %3322 }
 0xb98   :  { %6394 = vmatpush3.bf16.msra.mxu0 %v6799_v15  ;;  %v5058_v0 = vmul.f32 %v5046_v42, %v3323_v19 }
 0xb99   :  { %6395 = vmatprep.subr.bf16.mxu0 %v7219_v37 }
 0xb9c   :  { %6396 = vmatpush3.bf16.msra.mxu0 %v6800_v34 }
 0xb9d   :  { %6397 = vmatprep.subr.bf16.mxu0 %v7219_v37 }
 0xba0   :  { %6398 = vmatpush3.bf16.msra.mxu0 %v6801_v2 }
 0xba1   :  { %6399 = vmatprep.subr.bf16.mxu0 %v7219_v37 }
 0xba4   :  { %6400 = vmatpush3.bf16.msra.mxu0 %v6802_v14 }
 0xba5   :  { %6401 = vmatprep.subr.bf16.mxu0 %v7219_v37 }
 0xba8   :  { %6402 = vmatpush3.bf16.msra.mxu0 %v6803_v57  ;;  %v5533_v57 = vld [vmem:[%s8721_s19 + $0x3] ss:$0 sm:$0xff] }
 0xba9   :  { %6403 = vmatprep.subr.bf16.mxu0 %v7219_v37  ;;  %v3798_v54 = vadd.f32 %v5533_v57, %v8464_v32 }
 0xbab   :  { %v5084_v53 = vmul.f32 %v8623_v17, %v3798_v54 }
 0xbac   :  { %6404 = vmatpush3.bf16.msra.mxu0 %v6804_v8  ;;  %v5534_v8 = vld [vmem:[%s8721_s19 + $0x4] ss:$0 sm:$0xff] }
 0xbad   :  { %6405 = vmatprep.subr.bf16.mxu0 %v7219_v37  ;;  %v5101_v37 = vpop.permute.xlu0 %5100 }
 0xbb0   :  { %6406 = vmatpush3.bf16.msra.mxu0 %v6805_v56  ;;  %v6806_v56 = vld [vmem:[%s8726_s24] sm:$0x1f]  }
 0xbb1   :  { %v8631_v62 = vpop.permute.xlu0 %5108  ;;  %v5262_v42 = vsel %vm5260_vm11, %v6806_v56, 0 }
 0xbb2   :  { %6412 = vmatpush3.bf16.msra.mxu1 %v5262_v42 }
 0xbb3   :  { %6408 = vmatmul.mubr.bf16.vlgmr.msra.gmra.mxu0 %v7911_v5  ;;  %v8633_v5 = vpop.permute.xlu1 %3328 }
 0xbb5   :  { %v3326_v28 = vpop.permute.xlu0 %3325 }
 0xbb6   :  { %v5059_v19 = vmul.f32 %v8621_v60, %v3326_v28 }
 0xbb7   :  { %v5063_v31 = vpop.permute.xlu1 %5062 }
 0xbb8   :  { %v5081_v63 = vmul.f32 %v5063_v31, %v3534_v29 }
 0xbb9   :  { %v5038_v13 = vpop.permute.xlu0 %5037 }
 0xbba   :  { %v5056_v39 = vmul.f32 %v5038_v13, %v8321_v11  ;;  %v3710_v11 = vadd.f32 %v5532_v45, %v8462_v12  ;;  %v5089_v13 = vadd.f32 %v5084_v53, %v5059_v19 }
 0xbbb   :  { %v5093_v6 = vpop.permute.xlu1 %5092 }
 0xbbc   :  { %v5086_v4 = vadd.f32 %v5081_v63, %v5056_v39  ;;  %v5083_v1 = vmul.f32 %v5071_v10, %v3710_v11  ;;  %v3886_v10 = vadd.f32 %v5534_v8, %v8466_v30  ;;  %v5060_v30 = vmul.f32 %v8625_v18, %v8633_v5 }
 0xbbe   :  { %v5088_v26 = vadd.f32 %v5083_v1, %v5058_v0  ;;  %v5085_v32 = vmul.f32 %v8627_v16, %v3886_v10  ;;  %v7231_v0 = vmov 4  }
 0xc15   :  { %v4658_v44 = vpop.f32.mrf.mxu1 }
 0xc16   :  { %v4659_v24 = vadd.f32 %v5620_v25, %v4658_v44 }
 0xc17   :  { %v6309_v43 = vpop.f32.mrf.mxu1 }
 0xc18   :  { %v5111_v38 = vmul.f32 %v5093_v6, %v4659_v24  ;;  %v5090_v6 = vadd.f32 %v5085_v32, %v5060_v30 }
 0xc19   :  { %v4661_v46 = vpop.f32.mrf.mxu1 }
 0xc1a   :  { %v8643_v47 = vadd.f32 %v5111_v38, %v5086_v4 }
 0xc1b   :  { %v6310_v7 = vpop.f32.mrf.mxu1 }
 0xc33   :  { %v4746_v33 = vpop.f32.mrf.mxu0 }
 0xc34   :  { %v4747_v36 = vadd.f32 %v5621_v50, %v4746_v33  ;;  %v5675_v33 = vld [vmem:[#allocation24] ss:$0 sm:$0xff] }
 0xc35   :  { %v6329_v21 = vpop.f32.mrf.mxu0  ;;  %v4834_v35 = vpop.f32.mrf.mxu1 }
 0xc36   :  { %v5112_v61 = vmul.f32 %v5097_v55, %v4747_v36  ;;  %v4835_v52 = vadd.f32 %v5622_v40, %v4834_v35  ;;  %v5623_v55 = vld [vmem:[%s8725_s23 + $0x3] ss:$0 sm:$0xff]  ;;  %v7230_v35 = vmov 3  }
 0xc37   :  { %v4749_v12 = vpop.f32.mrf.mxu0  ;;  %v6349_v58 = vpop.f32.mrf.mxu1 }
 0xc38   :  { %v5113_v59 = vmul.f32 %v5101_v37, %v4835_v52  ;;  %v8659_v9 = vadd.f32 %v5112_v61, %v5087_v48  ;;  %v5624_v37 = vld [vmem:[%s8725_s23 + $0x4] ss:$0 sm:$0xff]  ;;  %s7229_s23 = smov 6  }
 0xc39   :  { %v6330_v15 = vpop.f32.mrf.mxu0  ;;  %v4837_v34 = vpop.f32.mrf.mxu1 }
 0xc3a   :  { %5122 = vrot.lane.b32.xlu0 %v8659_v9, %s7228_s28  ;;  %v8662_v2 = vadd.f32 %v5113_v59, %v5088_v26 }
 0xc3b   :  { %v6350_v14 = vpop.f32.mrf.mxu1 }
 0xc3c   :  { %5126 = vrot.lane.b32.xlu1 %v8662_v2, %s8757_s12 }
 0xc53   :  { %v4922_v23 = vpop.f32.mrf.mxu0 }
 0xc54   :  { %v4923_v3 = vadd.f32 %v5623_v55, %v4922_v23 }
 0xc55   :  { %v6369_v29 = vpop.f32.mrf.mxu0  ;;  %v5010_v31 = vpop.f32.mrf.mxu1 }
 0xc56   :  { %v5114_v25 = vmul.f32 %v8629_v20, %v4923_v3  ;;  %v5011_v63 = vadd.f32 %v5624_v37, %v5010_v31 }
 0xc57   :  { %v4925_v17 = vpop.f32.mrf.mxu0  ;;  %v6389_v44 = vpop.f32.mrf.mxu1 }
 0xc58   :  { %v5115_v39 = vmul.f32 %v8631_v62, %v5011_v63  ;;  %v5119_v24 = vadd.f32 %v5114_v25, %v5089_v13 }
 0xc59   :  { %v6370_v43 = vpop.f32.mrf.mxu0  ;;  %v5013_v60 = vpop.f32.mrf.mxu1 }
 0xc5a   :  { %5130 = vrot.lane.b32.xlu0 %v5119_v24, %s7229_s23  ;;  %v5120_v16 = vadd.f32 %v5115_v39, %v5090_v6 }
 0xc5b   :  { %v6390_v28 = vpop.f32.mrf.mxu1 }
 0xc5c   :  { %5134 = vrot.lane.b32.xlu1 %v5120_v16, %s7210_s10 }
 0xc73   :  { %v5245_v4 = vpop.f32.mrf.mxu0 }
 0xc75   :  { %v6409_v18 = vpop.f32.mrf.mxu0 }
 0xc77   :  { %v5248_v5 = vpop.f32.mrf.mxu0 }
 0xc79   :  { %v6410_v38 = vpop.f32.mrf.mxu0 }
 0xcac   :  { %v5123_v20 = vpop.permute.xlu0 %5122 }
 0xcad   :  { %v5138_v46 = vsel %vm5137_vm12, %v8643_v47, %v5123_v20 }
 0xcae   :  { %v5127_v62 = vpop.permute.xlu1 %5126 }
 0xcaf   :  { %v5140_v7 = vsel %vm5139_vm13, %v5138_v46, %v5127_v62 }
 0xccc   :  { %v5131_v41 = vpop.permute.xlu0 %5130 }
 0xccd   :  { %v5142_v45 = vsel %vm5141_vm14, %v5140_v7, %v5131_v41 }
 0xcce   :  { %v5135_v27 = vpop.permute.xlu1 %5134 }
 0xccf   :  { %v5143_v11 = vsel %vm1055_vm2, %v5142_v45, %v5135_v27 }
 0xcd0   :  { %v5146_v50 = vpack.c.bf16 %v5143_v11, %v5143_v11 }
 0xcd2   :  { %6414 = vmatmul.mubr.msk.bf16.vlgmr.msra.gmra.mxu1 %vm5256_vm15, %v5146_v50 }
 0xd92   :  { %v5298_v22 = vpop.f32.mrf.mxu1 }
 0xd93   :  { %v5299_v40 = vadd.f32 %v5298_v22, %v5245_v4 }
 0xd94   :  { %v6415_v51 = vpop.f32.mrf.mxu1 }
 0xd95   :  { %v5311_v1 = vadd.f32 %v5675_v33, %v5299_v40 }
 0xd96   :  { %v5301_v36 = vpop.f32.mrf.mxu1 }
 0xd97   :  { %5319 = vperm.xlu1 %6464, %v5311_v1   ;;  %5314 = vperm.xlu0 %6461, %v5311_v1  }
 0xd98   :  { %v6416_v21 = vpop.f32.mrf.mxu1 }
 0xd9b   :  { %6466 = vset.pattern.permute.xlu1 %v7230_v35  ;;  %6465 = vset.pattern.permute.xlu0 %v7223_v49 }
 0xd9c   :  { %5331 = vperm.xlu1 %6466, %v5311_v1   ;;  %5325 = vperm.xlu0 %6465, %v5311_v1  }
 0xda0   :  { %6467 = vset.pattern.permute.xlu1 %v7231_v0  ;;  %6468 = vset.pattern.permute.xlu0 %v7231_v0 }
 0xda1   :  { %5337 = vperm.xlu1 %6467, %v5311_v1  }
 0xe12   :  { %v5320_v48 = vpop.permute.xlu1 %5319  ;;  %v5315_v61 = vpop.permute.xlu0 %5314 }
 0xe13   :  { %v5322_v52 = vmul.f32 %v5320_v48, %v8659_v9  ;;  %v5317_v12 = vmul.f32 %v5315_v61, %v8643_v47 }
 0xe15   :  { %v5323_v26 = vadd.f32 %v5322_v52, %v5317_v12 }
 0xe17   :  { %v5332_v58 = vpop.permute.xlu1 %5331  ;;  %v5326_v59 = vpop.permute.xlu0 %5325 }
 0xe18   :  { %v5328_v15 = vmul.f32 %v5326_v59, %v8662_v2  ;;  %v5334_v34 = vmul.f32 %v5332_v58, %v5119_v24 }
 0xe1a   :  { %v5329_v14 = vadd.f32 %v5328_v15, %v5323_v26 }
 0xe1c   :  { %v5338_v49 = vpop.permute.xlu1 %5337  ;;  %v5335_v57 = vadd.f32 %v5334_v34, %v5329_v14 }
 0xe1d   :  { %v5340_v8 = vmul.f32 %v5338_v49, %v5120_v16 }
 0xe1f   :  { %v5341_v56 = vadd.f32 %v5340_v8, %v5335_v57 }
 0xe21   :  { %v5342_v54 = vmul.f32 0.2, %v5341_v56 }
 0xe23   :  { %5343 = vst.msk [vmem:[%s8729_s27] sm:$0xff] %vm5137_vm12, %v5342_v54 }
 0xe24   :  { %5348 = vsyncpa [#allocation3], 1 }
 0xe25   :  { %5349 = vsyncpa [#allocation5], 1 }
 0xe26   :  { %5350 = vsyncpa [#allocation8], 1 }
 0xe27   :  { %5351 = vsyncpa [#allocation11], 1 }
 0xe28   :  { %5352 = vsyncpa [#allocation14], 1 }
 0xe29   :  { %5353 = vsyncpa [#allocation17], 1 }
 0xe2a   :  { %5354 = vsyncpa [#allocation20], 1 }
 0xe2b   :  { %5355 = vsyncpa [#allocation23], 1 }

</bundles_post_ra>
